<compile_context>
chip_gen: v5e
topology: v5e:2x2
jax: 0.10.0
libtpu: 0.0.40
codegen_flags: <defaults>
</compile_context>

<pallas_src>
import functools

import jax
import jax.numpy as jnp
from jax.experimental import pallas as pl
from jax.experimental.pallas import tpu as pltpu

LANE = 128


def _round_up(x, m):
    return (x + m - 1) // m * m


def _bottleneck_kernel(H, W, C, P,
                       x_ref, w1_ref, w2_ref, w3_ref,
                       b1_ref, b2_ref, b3_ref,
                       out_ref, o1pad_ref):
    """Fused bottleneck for one batch element (lane-padded channels).

    x_ref    : (1, H, W, C)   NHWC input tile, f32  (C = padded inplanes = padded 4P)
    w1_ref   : (C, P)         conv1 1x1 weight (BN1 scale folded), bf16
    w2_ref   : (9, P, P)      conv2 3x3 per-tap weights (BN2 scale folded), bf16
    w3_ref   : (P, C)         conv3 1x1 weight (BN3 scale folded), bf16
    b1/b2/b3 : (1, P|P|C)     folded BatchNorm biases, f32
    out_ref  : (1, H, W, C)   f32
    o1pad_ref: (H+2, W+2, P)  VMEM scratch: zero-halo conv1 output, bf16
    """
    HW = H * W
    bf16 = jnp.bfloat16

    # ---- conv1 (1x1, BN scale pre-folded) + bias + relu  [MXU bf16/f32-acc] -
    # Cast to bf16 immediately; do not keep an f32 copy of x live across the
    # three matmuls (the residual re-reads the resident VMEM block later).
    x1 = x_ref[0].reshape(HW, C).astype(bf16)
    o1 = jnp.dot(x1, w1_ref[...], preferred_element_type=jnp.float32)
    o1 = jnp.maximum(o1 + b1_ref[...], 0.0)                      # (HW, P) f32

    # ---- bf16 zero-halo buffer for conv2: border-only zeroing each step ----
    zrow = jnp.zeros((1, W + 2, P), bf16)
    zcol = jnp.zeros((H + 2, 1, P), bf16)
    o1pad_ref[0:1, :, :] = zrow
    o1pad_ref[H + 1:H + 2, :, :] = zrow
    o1pad_ref[:, 0:1, :] = zcol
    o1pad_ref[:, W + 1:W + 2, :] = zcol
    o1pad_ref[1:H + 1, 1:W + 1, :] = o1.astype(bf16).reshape(H, W, P)

    # ---- conv2 (3x3, stride 1, pad 1): 9 accumulating MXU dots -------------
    # Padded P >= 128, so per-tap K fills the systolic depth; no im2col buffer.
    o2 = None
    for ki in range(3):
        for kj in range(3):
            t = ki * 3 + kj
            win = o1pad_ref[ki:ki + H, kj:kj + W, :].reshape(HW, P)
            d = jnp.dot(win, w2_ref[t], preferred_element_type=jnp.float32)
            o2 = d if o2 is None else o2 + d
    o2 = jnp.maximum(o2 + b2_ref[...], 0.0)                      # (HW, P) f32

    # ---- conv3 (1x1) + bias + identity residual + relu ----------------------
    o3 = jnp.dot(o2.astype(bf16), w3_ref[...],
                 preferred_element_type=jnp.float32)
    o3 = o3 + b3_ref[...] + x_ref[0].reshape(HW, C)              # residual stays f32
    out_ref[...] = jnp.maximum(o3, 0.0).reshape(1, H, W, C)


def bottleneck_pallas(x_nchw, params, eps=1e-5):
    N, Cin, H, W = x_nchw.shape
    P = params["w1"].shape[0]          # conv1 weight: (planes, inplanes, 1, 1)
    Cout = 4 * P
    assert Cin == Cout, "identity residual requires inplanes == planes * 4"

    Ppad = _round_up(P, LANE)
    Cpad = _round_up(Cin, LANE)        # == padded Cout since Cin == 4P

    # NCHW -> NHWC, channels zero-padded to a lane-dense multiple of 128.
    x = jnp.transpose(x_nchw, (0, 2, 3, 1)).astype(jnp.float32)
    x = jnp.pad(x, ((0, 0), (0, 0), (0, 0), (0, Cpad - Cin)))

    # Fold eval-mode BatchNorm into per-channel scale / bias (exact).
    def fold(g, b, m, v):
        s = g / jnp.sqrt(v + eps)
        return s, b - m * s

    s1, b1 = fold(params["g1"], params["b1"], params["m1"], params["v1"])
    s2, b2 = fold(params["g2"], params["b2"], params["m2"], params["v2"])
    s3, b3 = fold(params["g3"], params["b3"], params["m3"], params["v3"])

    def padw(w, r, c):
        return jnp.zeros((r, c), w.dtype).at[:w.shape[0], :w.shape[1]].set(w)

    # BN scale folded into conv weights; all channel dims zero-padded to the
    # lane-dense sizes.  Matmul operands bf16, biases stay f32 for epilogues.
    w1 = padw(params["w1"][:, :, 0, 0].T * s1[None, :],
              Cpad, Ppad).astype(jnp.bfloat16)                          # (Cpad, Ppad)
    w2t = (jnp.transpose(params["w2"], (2, 3, 1, 0))
           * s2[None, None, None, :]).reshape(9, P, P)                  # (9, Pin, Pout)
    w2 = jnp.zeros((9, Ppad, Ppad), jnp.float32).at[:, :P, :P].set(w2t)
    w2 = w2.astype(jnp.bfloat16)                                        # (9, Ppad, Ppad)
    w3 = padw(params["w3"][:, :, 0, 0].T * s3[None, :],
              Ppad, Cpad).astype(jnp.bfloat16)                          # (Ppad, Cpad)
    b1p = jnp.zeros((1, Ppad), jnp.float32).at[0, :P].set(b1)
    b2p = jnp.zeros((1, Ppad), jnp.float32).at[0, :P].set(b2)
    b3p = jnp.zeros((1, Cpad), jnp.float32).at[0, :Cout].set(b3)

    kernel = functools.partial(_bottleneck_kernel, H, W, Cpad, Ppad)

    def full_spec(a):
        nd = a.ndim
        return pl.BlockSpec(a.shape, lambda n, _nd=nd: (0,) * _nd)

    # Honest per-step VMEM accounting: double-buffered x/out blocks and
    # weights, single halo scratch, in-kernel temporaries; capped below the
    # physical VMEM of the current generation with compiler-scratch headroom.
    x_blk = H * W * Cpad * 4
    o_blk = H * W * Cpad * 4
    w_all = 2 * (w1.size + w2.size + w3.size) + 4 * (b1p.size + b2p.size + b3p.size)
    halo = (H + 2) * (W + 2) * Ppad * 2
    temps = H * W * (3 * Ppad * 4 + 2 * Ppad * 2 + Cpad * 4)
    est = 2 * (x_blk + o_blk) + 2 * w_all + halo + temps
    try:
        vmem_cap = int(pltpu.get_tpu_info().vmem_capacity_bytes)
    except Exception:
        vmem_cap = 64 * 1024 * 1024                      # v7x per-TC worst case
    budget = max(32 * 1024 * 1024, vmem_cap - 16 * 1024 * 1024)
    vmem_limit = int(min(budget, max(32 * 1024 * 1024, 2 * est)))

    out_nhwc = pl.pallas_call(
        kernel,
        out_shape=jax.ShapeDtypeStruct((N, H, W, Cpad), jnp.float32),
        grid=(N,),
        in_specs=[
            pl.BlockSpec((1, H, W, Cpad), lambda n: (n, 0, 0, 0)),
            full_spec(w1), full_spec(w2), full_spec(w3),
            full_spec(b1p), full_spec(b2p), full_spec(b3p),
        ],
        out_specs=pl.BlockSpec((1, H, W, Cpad), lambda n: (n, 0, 0, 0)),
        scratch_shapes=[
            pltpu.VMEM((H + 2, W + 2, Ppad), jnp.bfloat16),   # zero-halo conv1 out
        ],
        compiler_params=pltpu.CompilerParams(
            dimension_semantics=("parallel",),                # batch elems independent
            vmem_limit_bytes=vmem_limit),
    )(x, w1, w2, w3, b1p, b2p, b3p)

    out = out_nhwc[..., :Cout]                                 # drop lane padding
    return jnp.transpose(out, (0, 3, 1, 2))                    # back to NCHW


# ----------------------------- reference (plain JAX, f32) -------------------
def bottleneck_ref(x, params, eps=1e-5):
    def conv(x, w, stride=1, pad=0):
        return jax.lax.conv_general_dilated(
            x, w, (stride, stride), [(pad, pad), (pad, pad)],
            dimension_numbers=("NCHW", "OIHW", "NCHW"))

    def bn(x, g, b, m, v):
        s = g / jnp.sqrt(v + eps)
        return x * s[None, :, None, None] + (b - m * s)[None, :, None, None]

    out = jax.nn.relu(bn(conv(x, params["w1"]),
                         params["g1"], params["b1"], params["m1"], params["v1"]))
    out = jax.nn.relu(bn(conv(out, params["w2"], 1, 1),
                         params["g2"], params["b2"], params["m2"], params["v2"]))
    out = bn(conv(out, params["w3"]),
             params["g3"], params["b3"], params["m3"], params["v3"])
    return jax.nn.relu(out + x)


def init_params(key, inplanes, planes):
    ks = jax.random.split(key, 6)

    def bn_params(k, c):
        k1, k2, k3, k4 = jax.random.split(k, 4)
        return (1.0 + 0.1 * jax.random.normal(k1, (c,), jnp.float32),           # gamma
                0.1 * jax.random.normal(k2, (c,), jnp.float32),                 # beta
                0.1 * jax.random.normal(k3, (c,), jnp.float32),                 # running mean
                1.0 + 0.1 * jnp.abs(jax.random.normal(k4, (c,), jnp.float32)))  # running var

    p = {}
    p["w1"] = 0.2 * jax.random.normal(ks[0], (planes, inplanes, 1, 1), jnp.float32)
    p["w2"] = 0.2 * jax.random.normal(ks[1], (planes, planes, 3, 3), jnp.float32)
    p["w3"] = 0.2 * jax.random.normal(ks[2], (4 * planes, planes, 1, 1), jnp.float32)
    p["g1"], p["b1"], p["m1"], p["v1"] = bn_params(ks[3], planes)
    p["g2"], p["b2"], p["m2"], p["v2"] = bn_params(ks[4], planes)
    p["g3"], p["b3"], p["m3"], p["v3"] = bn_params(ks[5], 4 * planes)
    return p


if __name__ == "__main__":
    N, planes, H, W = 2, 4, 16, 16
    inplanes = 4 * planes                      # identity residual requirement

    key = jax.random.PRNGKey(0)
    k_x, k_p = jax.random.split(key)
    params = init_params(k_p, inplanes, planes)
    x = jax.random.normal(k_x, (N, inplanes, H, W), jnp.float32)   # NCHW like PyTorch

    out = jax.block_until_ready(bottleneck_pallas(x, params))
    ref = bottleneck_ref(x, params)

    assert out.shape == (N, inplanes, H, W), out.shape
    max_err = float(jnp.max(jnp.abs(out - ref)))
    # bf16 matmul operands (f32 accumulation) vs f32 reference -> loosened tol.
    assert bool(jnp.allclose(out, ref, atol=5e-2, rtol=5e-2)), \
        f"mismatch vs reference: max abs err {max_err}"
    print("KERNEL_OK")
</pallas_src>

<mosaic_0001>
module attributes {stable_mosaic.version = 11 : i64} {
  func.func @_bottleneck_kernel(%arg0: i32, %arg1: memref<1x16x16x128xf32, #tpu.memory_space<vmem>>, %arg2: memref<128x128xbf16, #tpu.memory_space<vmem>>, %arg3: memref<9x128x128xbf16, #tpu.memory_space<vmem>>, %arg4: memref<128x128xbf16, #tpu.memory_space<vmem>>, %arg5: memref<1x128xf32, #tpu.memory_space<vmem>>, %arg6: memref<1x128xf32, #tpu.memory_space<vmem>>, %arg7: memref<1x128xf32, #tpu.memory_space<vmem>>, %arg8: memref<1x16x16x128xf32, #tpu.memory_space<vmem>>, %arg9: memref<18x18x128xbf16, #tpu.memory_space<vmem>>) attributes {dimension_semantics = [#tpu.dimension_semantics<parallel>], iteration_bounds = array<i64: 2>, scalar_prefetch = 0 : i64, scratch_operands = 1 : i64, tpu.core_type = #tpu.core_type<tc>, window_params = [{transform_indices = @transform_0, window_bounds = array<i64: 1, 16, 16, 128>}, {pipeline_mode = #tpu.pipeline_mode<synchronous>, transform_indices = @transform_1, window_bounds = array<i64: 128, 128>}, {pipeline_mode = #tpu.pipeline_mode<synchronous>, transform_indices = @transform_2, window_bounds = array<i64: 9, 128, 128>}, {pipeline_mode = #tpu.pipeline_mode<synchronous>, transform_indices = @transform_3, window_bounds = array<i64: 128, 128>}, {pipeline_mode = #tpu.pipeline_mode<synchronous>, transform_indices = @transform_4, window_bounds = array<i64: 1, 128>}, {pipeline_mode = #tpu.pipeline_mode<synchronous>, transform_indices = @transform_5, window_bounds = array<i64: 1, 128>}, {pipeline_mode = #tpu.pipeline_mode<synchronous>, transform_indices = @transform_6, window_bounds = array<i64: 1, 128>}, {transform_indices = @transform_7, window_bounds = array<i64: 1, 16, 16, 128>}]} {
    %c0 = arith.constant 0 : index
    %c0_0 = arith.constant 0 : index
    %c0_1 = arith.constant 0 : index
    %c0_2 = arith.constant 0 : index
    %0 = vector.load %arg1[%c0, %c0_0, %c0_1, %c0_2] : memref<1x16x16x128xf32, #tpu.memory_space<vmem>>, vector<1x16x16x128xf32>
    %1 = vector.shape_cast %0 : vector<1x16x16x128xf32> to vector<16x16x128xf32>
    %2 = vector.shape_cast %1 : vector<16x16x128xf32> to vector<256x128xf32>
    %3 = arith.truncf %2 : vector<256x128xf32> to vector<256x128xbf16>
    %c0_3 = arith.constant 0 : index
    %c0_4 = arith.constant 0 : index
    %4 = vector.load %arg2[%c0_3, %c0_4] : memref<128x128xbf16, #tpu.memory_space<vmem>>, vector<128x128xbf16>
    %cst = arith.constant dense<0.000000e+00> : vector<256x128xf32>
    %5 = tpu.matmul %3, %4, %cst {dimension_numbers = #tpu.dot_dimension_numbers<[1], [0], [0], [1], [0, 0, 1, 1], [], []>} : vector<256x128xbf16>, vector<128x128xbf16>, vector<256x128xf32> -> vector<256x128xf32>
    %c0_5 = arith.constant 0 : index
    %c0_6 = arith.constant 0 : index
    %6 = vector.load %arg5[%c0_5, %c0_6] : memref<1x128xf32, #tpu.memory_space<vmem>>, vector<1x128xf32>
    %7 = vector.broadcast %6 : vector<1x128xf32> to vector<256x128xf32>
    %8 = arith.addf %5, %7 : vector<256x128xf32>
    %cst_7 = arith.constant 0.000000e+00 : f32
    %9 = vector.broadcast %cst_7 : f32 to vector<256x128xf32>
    %10 = arith.maximumf %8, %9 : vector<256x128xf32>
    %cst_8 = arith.constant 0.000000e+00 : bf16
    %11 = vector.broadcast %cst_8 : bf16 to vector<1x18x128xbf16>
    %cst_9 = arith.constant 0.000000e+00 : bf16
    %12 = vector.broadcast %cst_9 : bf16 to vector<18x1x128xbf16>
    %c0_10 = arith.constant 0 : index
    %c0_11 = arith.constant 0 : index
    %c0_12 = arith.constant 0 : index
    %13 = vector.load %arg9[%c0_10, %c0_11, %c0_12] : memref<18x18x128xbf16, #tpu.memory_space<vmem>>, vector<1x18x128xbf16>
    tpu.vector_store %arg9[%c0_10, %c0_11, %c0_12], %11 {strides = array<i32>} : memref<18x18x128xbf16, #tpu.memory_space<vmem>>, vector<1x18x128xbf16>,
    %c17 = arith.constant 17 : index
    %c0_13 = arith.constant 0 : index
    %c0_14 = arith.constant 0 : index
    %14 = vector.load %arg9[%c17, %c0_13, %c0_14] : memref<18x18x128xbf16, #tpu.memory_space<vmem>>, vector<1x18x128xbf16>
    tpu.vector_store %arg9[%c17, %c0_13, %c0_14], %11 {strides = array<i32>} : memref<18x18x128xbf16, #tpu.memory_space<vmem>>, vector<1x18x128xbf16>,
    %c0_15 = arith.constant 0 : index
    %c0_16 = arith.constant 0 : index
    %c0_17 = arith.constant 0 : index
    %15 = vector.load %arg9[%c0_15, %c0_16, %c0_17] : memref<18x18x128xbf16, #tpu.memory_space<vmem>>, vector<18x1x128xbf16>
    tpu.vector_store %arg9[%c0_15, %c0_16, %c0_17], %12 {strides = array<i32>} : memref<18x18x128xbf16, #tpu.memory_space<vmem>>, vector<18x1x128xbf16>,
    %c0_18 = arith.constant 0 : index
    %c17_19 = arith.constant 17 : index
    %c0_20 = arith.constant 0 : index
    %16 = vector.load %arg9[%c0_18, %c17_19, %c0_20] : memref<18x18x128xbf16, #tpu.memory_space<vmem>>, vector<18x1x128xbf16>
    tpu.vector_store %arg9[%c0_18, %c17_19, %c0_20], %12 {strides = array<i32>} : memref<18x18x128xbf16, #tpu.memory_space<vmem>>, vector<18x1x128xbf16>,
    %17 = arith.truncf %10 : vector<256x128xf32> to vector<256x128xbf16>
    %18 = vector.shape_cast %17 : vector<256x128xbf16> to vector<16x16x128xbf16>
    %c1 = arith.constant 1 : index
    %c1_21 = arith.constant 1 : index
    %c0_22 = arith.constant 0 : index
    %19 = vector.load %arg9[%c1, %c1_21, %c0_22] : memref<18x18x128xbf16, #tpu.memory_space<vmem>>, vector<16x16x128xbf16>
    tpu.vector_store %arg9[%c1, %c1_21, %c0_22], %18 {strides = array<i32>} : memref<18x18x128xbf16, #tpu.memory_space<vmem>>, vector<16x16x128xbf16>,
    %c0_23 = arith.constant 0 : index
    %c0_24 = arith.constant 0 : index
    %c0_25 = arith.constant 0 : index
    %20 = vector.load %arg9[%c0_23, %c0_24, %c0_25] : memref<18x18x128xbf16, #tpu.memory_space<vmem>>, vector<16x16x128xbf16>
    %21 = vector.shape_cast %20 : vector<16x16x128xbf16> to vector<256x128xbf16>
    %c0_26 = arith.constant 0 : index
    %c0_27 = arith.constant 0 : index
    %c0_28 = arith.constant 0 : index
    %22 = vector.load %arg3[%c0_26, %c0_27, %c0_28] : memref<9x128x128xbf16, #tpu.memory_space<vmem>>, vector<1x128x128xbf16>
    %23 = vector.shape_cast %22 : vector<1x128x128xbf16> to vector<128x128xbf16>
    %cst_29 = arith.constant dense<0.000000e+00> : vector<256x128xf32>
    %24 = tpu.matmul %21, %23, %cst_29 {dimension_numbers = #tpu.dot_dimension_numbers<[1], [0], [0], [1], [0, 0, 1, 1], [], []>} : vector<256x128xbf16>, vector<128x128xbf16>, vector<256x128xf32> -> vector<256x128xf32>
    %c0_30 = arith.constant 0 : index
    %c1_31 = arith.constant 1 : index
    %c0_32 = arith.constant 0 : index
    %25 = vector.load %arg9[%c0_30, %c1_31, %c0_32] : memref<18x18x128xbf16, #tpu.memory_space<vmem>>, vector<16x16x128xbf16>
    %26 = vector.shape_cast %25 : vector<16x16x128xbf16> to vector<256x128xbf16>
    %c1_33 = arith.constant 1 : index
    %c0_34 = arith.constant 0 : index
    %c0_35 = arith.constant 0 : index
    %27 = vector.load %arg3[%c1_33, %c0_34, %c0_35] : memref<9x128x128xbf16, #tpu.memory_space<vmem>>, vector<1x128x128xbf16>
    %28 = vector.shape_cast %27 : vector<1x128x128xbf16> to vector<128x128xbf16>
    %cst_36 = arith.constant dense<0.000000e+00> : vector<256x128xf32>
    %29 = tpu.matmul %26, %28, %cst_36 {dimension_numbers = #tpu.dot_dimension_numbers<[1], [0], [0], [1], [0, 0, 1, 1], [], []>} : vector<256x128xbf16>, vector<128x128xbf16>, vector<256x128xf32> -> vector<256x128xf32>
    %30 = arith.addf %24, %29 : vector<256x128xf32>
    %c0_37 = arith.constant 0 : index
    %c2 = arith.constant 2 : index
    %c0_38 = arith.constant 0 : index
    %31 = vector.load %arg9[%c0_37, %c2, %c0_38] : memref<18x18x128xbf16, #tpu.memory_space<vmem>>, vector<16x16x128xbf16>
    %32 = vector.shape_cast %31 : vector<16x16x128xbf16> to vector<256x128xbf16>
    %c2_39 = arith.constant 2 : index
    %c0_40 = arith.constant 0 : index
    %c0_41 = arith.constant 0 : index
    %33 = vector.load %arg3[%c2_39, %c0_40, %c0_41] : memref<9x128x128xbf16, #tpu.memory_space<vmem>>, vector<1x128x128xbf16>
    %34 = vector.shape_cast %33 : vector<1x128x128xbf16> to vector<128x128xbf16>
    %cst_42 = arith.constant dense<0.000000e+00> : vector<256x128xf32>
    %35 = tpu.matmul %32, %34, %cst_42 {dimension_numbers = #tpu.dot_dimension_numbers<[1], [0], [0], [1], [0, 0, 1, 1], [], []>} : vector<256x128xbf16>, vector<128x128xbf16>, vector<256x128xf32> -> vector<256x128xf32>
    %36 = arith.addf %30, %35 : vector<256x128xf32>
    %c1_43 = arith.constant 1 : index
    %c0_44 = arith.constant 0 : index
    %c0_45 = arith.constant 0 : index
    %37 = vector.load %arg9[%c1_43, %c0_44, %c0_45] : memref<18x18x128xbf16, #tpu.memory_space<vmem>>, vector<16x16x128xbf16>
    %38 = vector.shape_cast %37 : vector<16x16x128xbf16> to vector<256x128xbf16>
    %c3 = arith.constant 3 : index
    %c0_46 = arith.constant 0 : index
    %c0_47 = arith.constant 0 : index
    %39 = vector.load %arg3[%c3, %c0_46, %c0_47] : memref<9x128x128xbf16, #tpu.memory_space<vmem>>, vector<1x128x128xbf16>
    %40 = vector.shape_cast %39 : vector<1x128x128xbf16> to vector<128x128xbf16>
    %cst_48 = arith.constant dense<0.000000e+00> : vector<256x128xf32>
    %41 = tpu.matmul %38, %40, %cst_48 {dimension_numbers = #tpu.dot_dimension_numbers<[1], [0], [0], [1], [0, 0, 1, 1], [], []>} : vector<256x128xbf16>, vector<128x128xbf16>, vector<256x128xf32> -> vector<256x128xf32>
    %42 = arith.addf %36, %41 : vector<256x128xf32>
    %c1_49 = arith.constant 1 : index
    %c1_50 = arith.constant 1 : index
    %c0_51 = arith.constant 0 : index
    %43 = vector.load %arg9[%c1_49, %c1_50, %c0_51] : memref<18x18x128xbf16, #tpu.memory_space<vmem>>, vector<16x16x128xbf16>
    %44 = vector.shape_cast %43 : vector<16x16x128xbf16> to vector<256x128xbf16>
    %c4 = arith.constant 4 : index
    %c0_52 = arith.constant 0 : index
    %c0_53 = arith.constant 0 : index
    %45 = vector.load %arg3[%c4, %c0_52, %c0_53] : memref<9x128x128xbf16, #tpu.memory_space<vmem>>, vector<1x128x128xbf16>
    %46 = vector.shape_cast %45 : vector<1x128x128xbf16> to vector<128x128xbf16>
    %cst_54 = arith.constant dense<0.000000e+00> : vector<256x128xf32>
    %47 = tpu.matmul %44, %46, %cst_54 {dimension_numbers = #tpu.dot_dimension_numbers<[1], [0], [0], [1], [0, 0, 1, 1], [], []>} : vector<256x128xbf16>, vector<128x128xbf16>, vector<256x128xf32> -> vector<256x128xf32>
    %48 = arith.addf %42, %47 : vector<256x128xf32>
    %c1_55 = arith.constant 1 : index
    %c2_56 = arith.constant 2 : index
    %c0_57 = arith.constant 0 : index
    %49 = vector.load %arg9[%c1_55, %c2_56, %c0_57] : memref<18x18x128xbf16, #tpu.memory_space<vmem>>, vector<16x16x128xbf16>
    %50 = vector.shape_cast %49 : vector<16x16x128xbf16> to vector<256x128xbf16>
    %c5 = arith.constant 5 : index
    %c0_58 = arith.constant 0 : index
    %c0_59 = arith.constant 0 : index
    %51 = vector.load %arg3[%c5, %c0_58, %c0_59] : memref<9x128x128xbf16, #tpu.memory_space<vmem>>, vector<1x128x128xbf16>
    %52 = vector.shape_cast %51 : vector<1x128x128xbf16> to vector<128x128xbf16>
    %cst_60 = arith.constant dense<0.000000e+00> : vector<256x128xf32>
    %53 = tpu.matmul %50, %52, %cst_60 {dimension_numbers = #tpu.dot_dimension_numbers<[1], [0], [0], [1], [0, 0, 1, 1], [], []>} : vector<256x128xbf16>, vector<128x128xbf16>, vector<256x128xf32> -> vector<256x128xf32>
    %54 = arith.addf %48, %53 : vector<256x128xf32>
    %c2_61 = arith.constant 2 : index
    %c0_62 = arith.constant 0 : index
    %c0_63 = arith.constant 0 : index
    %55 = vector.load %arg9[%c2_61, %c0_62, %c0_63] : memref<18x18x128xbf16, #tpu.memory_space<vmem>>, vector<16x16x128xbf16>
    %56 = vector.shape_cast %55 : vector<16x16x128xbf16> to vector<256x128xbf16>
    %c6 = arith.constant 6 : index
    %c0_64 = arith.constant 0 : index
    %c0_65 = arith.constant 0 : index
    %57 = vector.load %arg3[%c6, %c0_64, %c0_65] : memref<9x128x128xbf16, #tpu.memory_space<vmem>>, vector<1x128x128xbf16>
    %58 = vector.shape_cast %57 : vector<1x128x128xbf16> to vector<128x128xbf16>
    %cst_66 = arith.constant dense<0.000000e+00> : vector<256x128xf32>
    %59 = tpu.matmul %56, %58, %cst_66 {dimension_numbers = #tpu.dot_dimension_numbers<[1], [0], [0], [1], [0, 0, 1, 1], [], []>} : vector<256x128xbf16>, vector<128x128xbf16>, vector<256x128xf32> -> vector<256x128xf32>
    %60 = arith.addf %54, %59 : vector<256x128xf32>
    %c2_67 = arith.constant 2 : index
    %c1_68 = arith.constant 1 : index
    %c0_69 = arith.constant 0 : index
    %61 = vector.load %arg9[%c2_67, %c1_68, %c0_69] : memref<18x18x128xbf16, #tpu.memory_space<vmem>>, vector<16x16x128xbf16>
    %62 = vector.shape_cast %61 : vector<16x16x128xbf16> to vector<256x128xbf16>
    %c7 = arith.constant 7 : index
    %c0_70 = arith.constant 0 : index
    %c0_71 = arith.constant 0 : index
    %63 = vector.load %arg3[%c7, %c0_70, %c0_71] : memref<9x128x128xbf16, #tpu.memory_space<vmem>>, vector<1x128x128xbf16>
    %64 = vector.shape_cast %63 : vector<1x128x128xbf16> to vector<128x128xbf16>
    %cst_72 = arith.constant dense<0.000000e+00> : vector<256x128xf32>
    %65 = tpu.matmul %62, %64, %cst_72 {dimension_numbers = #tpu.dot_dimension_numbers<[1], [0], [0], [1], [0, 0, 1, 1], [], []>} : vector<256x128xbf16>, vector<128x128xbf16>, vector<256x128xf32> -> vector<256x128xf32>
    %66 = arith.addf %60, %65 : vector<256x128xf32>
    %c2_73 = arith.constant 2 : index
    %c2_74 = arith.constant 2 : index
    %c0_75 = arith.constant 0 : index
    %67 = vector.load %arg9[%c2_73, %c2_74, %c0_75] : memref<18x18x128xbf16, #tpu.memory_space<vmem>>, vector<16x16x128xbf16>
    %68 = vector.shape_cast %67 : vector<16x16x128xbf16> to vector<256x128xbf16>
    %c8 = arith.constant 8 : index
    %c0_76 = arith.constant 0 : index
    %c0_77 = arith.constant 0 : index
    %69 = vector.load %arg3[%c8, %c0_76, %c0_77] : memref<9x128x128xbf16, #tpu.memory_space<vmem>>, vector<1x128x128xbf16>
    %70 = vector.shape_cast %69 : vector<1x128x128xbf16> to vector<128x128xbf16>
    %cst_78 = arith.constant dense<0.000000e+00> : vector<256x128xf32>
    %71 = tpu.matmul %68, %70, %cst_78 {dimension_numbers = #tpu.dot_dimension_numbers<[1], [0], [0], [1], [0, 0, 1, 1], [], []>} : vector<256x128xbf16>, vector<128x128xbf16>, vector<256x128xf32> -> vector<256x128xf32>
    %72 = arith.addf %66, %71 : vector<256x128xf32>
    %c0_79 = arith.constant 0 : index
    %c0_80 = arith.constant 0 : index
    %73 = vector.load %arg6[%c0_79, %c0_80] : memref<1x128xf32, #tpu.memory_space<vmem>>, vector<1x128xf32>
    %74 = vector.broadcast %73 : vector<1x128xf32> to vector<256x128xf32>
    %75 = arith.addf %72, %74 : vector<256x128xf32>
    %cst_81 = arith.constant 0.000000e+00 : f32
    %76 = vector.broadcast %cst_81 : f32 to vector<256x128xf32>
    %77 = arith.maximumf %75, %76 : vector<256x128xf32>
    %78 = arith.truncf %77 : vector<256x128xf32> to vector<256x128xbf16>
    %c0_82 = arith.constant 0 : index
    %c0_83 = arith.constant 0 : index
    %79 = vector.load %arg4[%c0_82, %c0_83] : memref<128x128xbf16, #tpu.memory_space<vmem>>, vector<128x128xbf16>
    %cst_84 = arith.constant dense<0.000000e+00> : vector<256x128xf32>
    %80 = tpu.matmul %78, %79, %cst_84 {dimension_numbers = #tpu.dot_dimension_numbers<[1], [0], [0], [1], [0, 0, 1, 1], [], []>} : vector<256x128xbf16>, vector<128x128xbf16>, vector<256x128xf32> -> vector<256x128xf32>
    %c0_85 = arith.constant 0 : index
    %c0_86 = arith.constant 0 : index
    %81 = vector.load %arg7[%c0_85, %c0_86] : memref<1x128xf32, #tpu.memory_space<vmem>>, vector<1x128xf32>
    %82 = vector.broadcast %81 : vector<1x128xf32> to vector<256x128xf32>
    %83 = arith.addf %80, %82 : vector<256x128xf32>
    %c0_87 = arith.constant 0 : index
    %c0_88 = arith.constant 0 : index
    %c0_89 = arith.constant 0 : index
    %c0_90 = arith.constant 0 : index
    %84 = vector.load %arg1[%c0_87, %c0_88, %c0_89, %c0_90] : memref<1x16x16x128xf32, #tpu.memory_space<vmem>>, vector<1x16x16x128xf32>
    %85 = vector.shape_cast %84 : vector<1x16x16x128xf32> to vector<16x16x128xf32>
    %86 = vector.shape_cast %85 : vector<16x16x128xf32> to vector<256x128xf32>
    %87 = arith.addf %83, %86 : vector<256x128xf32>
    %cst_91 = arith.constant 0.000000e+00 : f32
    %88 = vector.broadcast %cst_91 : f32 to vector<256x128xf32>
    %89 = arith.maximumf %87, %88 : vector<256x128xf32>
    %90 = vector.shape_cast %89 : vector<256x128xf32> to vector<1x16x16x128xf32>
    %c0_92 = arith.constant 0 : index
    %c0_93 = arith.constant 0 : index
    %c0_94 = arith.constant 0 : index
    %c0_95 = arith.constant 0 : index
    %91 = vector.load %arg8[%c0_92, %c0_93, %c0_94, %c0_95] : memref<1x16x16x128xf32, #tpu.memory_space<vmem>>, vector<1x16x16x128xf32>
    tpu.vector_store %arg8[%c0_92, %c0_93, %c0_94, %c0_95], %90 {strides = array<i32>} : memref<1x16x16x128xf32, #tpu.memory_space<vmem>>, vector<1x16x16x128xf32>,
    return
  }
  func.func @transform_0(%arg0: i32) -> (i32, i32, i32, i32) {
    %c0_i32 = arith.constant 0 : i32
    %c0_i32_0 = arith.constant 0 : i32
    %c0_i32_1 = arith.constant 0 : i32
    %c0_i32_2 = arith.constant 0 : i32
    return %arg0, %c0_i32, %c0_i32_0, %c0_i32_1 : i32, i32, i32, i32
  }
  func.func @transform_1(%arg0: i32) -> (i32, i32) {
    %c0_i32 = arith.constant 0 : i32
    %c0_i32_0 = arith.constant 0 : i32
    %c0_i32_1 = arith.constant 0 : i32
    return %c0_i32, %c0_i32_0 : i32, i32
  }
  func.func @transform_2(%arg0: i32) -> (i32, i32, i32) {
    %c0_i32 = arith.constant 0 : i32
    %c0_i32_0 = arith.constant 0 : i32
    %c0_i32_1 = arith.constant 0 : i32
    %c0_i32_2 = arith.constant 0 : i32
    return %c0_i32, %c0_i32_0, %c0_i32_1 : i32, i32, i32
  }
  func.func @transform_3(%arg0: i32) -> (i32, i32) {
    %c0_i32 = arith.constant 0 : i32
    %c0_i32_0 = arith.constant 0 : i32
    %c0_i32_1 = arith.constant 0 : i32
    return %c0_i32, %c0_i32_0 : i32, i32
  }
  func.func @transform_4(%arg0: i32) -> (i32, i32) {
    %c0_i32 = arith.constant 0 : i32
    %c0_i32_0 = arith.constant 0 : i32
    %c0_i32_1 = arith.constant 0 : i32
    return %c0_i32, %c0_i32_0 : i32, i32
  }
  func.func @transform_5(%arg0: i32) -> (i32, i32) {
    %c0_i32 = arith.constant 0 : i32
    %c0_i32_0 = arith.constant 0 : i32
    %c0_i32_1 = arith.constant 0 : i32
    return %c0_i32, %c0_i32_0 : i32, i32
  }
  func.func @transform_6(%arg0: i32) -> (i32, i32) {
    %c0_i32 = arith.constant 0 : i32
    %c0_i32_0 = arith.constant 0 : i32
    %c0_i32_1 = arith.constant 0 : i32
    return %c0_i32, %c0_i32_0 : i32, i32
  }
  func.func @transform_7(%arg0: i32) -> (i32, i32, i32, i32) {
    %c0_i32 = arith.constant 0 : i32
    %c0_i32_0 = arith.constant 0 : i32
    %c0_i32_1 = arith.constant 0 : i32
    %c0_i32_2 = arith.constant 0 : i32
    return %arg0, %c0_i32, %c0_i32_0, %c0_i32_1 : i32, i32, i32, i32
  }
}

</mosaic_0001>

<bundles_post_ra>
// kernel: tpu_custom_call.1
= control target key start
LH: loop header
LB: loop body
LE: loop exit
PB: predicated region body
PF: predicated region fallthrough
CT: control target
= control target key end

     0   :  { %s9153_s0 = inlined_call_operand.hbm [shape: f32[2,16,16,128], index: 0, kind: input, shape index: {}]   ;;  %s9154_s1 = inlined_call_operand.hbm [shape: bf16[128,128], index: 1, kind: input, shape index: {}]   ;;  %s9155_s2 = inlined_call_operand.hbm [shape: bf16[9,128,128], index: 2, kind: input, shape index: {}]   ;;  %s9156_s3 = inlined_call_operand.hbm [shape: bf16[128,128], index: 3, kind: input, shape index: {}]   ;;  %s9157_s4 = inlined_call_operand.vmem [shape: f32[1,128], index: 4, kind: input, shape index: {}]   ;;  %s9158_s5 = inlined_call_operand.vmem [shape: f32[1,128], index: 5, kind: input, shape index: {}]   ;;  %s9159_s6 = inlined_call_operand.vmem [shape: f32[1,128], index: 6, kind: input, shape index: {}]   ;;  %s9160_s7 = inlined_call_operand.hbm [shape: f32[2,16,16,128], index: 7, kind: output, shape index: {}]  }
   0x1   :  { %9167 = sst [smem:[#allocation99_spill]] %s9154_s1 }
   0x2   :  { %12 = vsyncpa [#allocation4], 0 }
   0x3   :  { %14 = vsyncpa [#allocation4 + $0x1], 0 }
   0x4   :  { %15 = vsyncpa [#allocation7], 0 }
   0x5   :  { %16 = vsyncpa [#allocation10], 0 }
   0x6   :  { %17 = vsyncpa [#allocation5], 0 }
   0x7   :  { %19 = vsyncpa [#allocation5 + $0x1], 0  ;;  %s6964_s24 = smov 0   ;;  %s6966_s25 = smov 0  }
   0x8   :  { %s6968_s26 = smov 0   ;;  %s6970_s27 = smov 0  }
   0x9 LB: > { %s6985_s28 = sadd.s32 4294967295, %s6912_s27   ;;  %s5823_s29 = sadd.s32 4294967294, %s6912_s27   ;;  %s6912_s27 = sphi %s6970_s27, %s9421_s27   ;;  %s6908_s26 = sphi %s6968_s26, %s9420_s26   ;;  %s6904_s25 = sphi %s6966_s25, %s9419_s25   ;;  %s6900_s24 = sphi %s6964_s24, %s9418_s24  }
   0xa   : > { %p45_p0 = scmp.ne.s32.totalorder %s6904_s25, %s6900_s24  ;;  %p46_p1 = scmp.eq.s32.totalorder %s6985_s28, 0 }
   0xb   : > { %p195_p2 = scmp.eq.s32.totalorder %s6985_s28, 1  ;;  %p201_p3 = scmp.eq.s32.totalorder %s5823_s29, 1 }
   0xc   : > { %p6994_p4 = por %p46_p1, %p45_p0  ;;  %p5824_p5 = scmp.ge.s32.totalorder %s6912_s27, 1 }
   0xd   : > { %p6999_p6 = por %p201_p3, %p45_p0  ;;  %p208_p7 = scmp.lt.s32.totalorder %s6912_s27, 3 }
   0xe   : > { %s9170_s1 = sld [smem:[#allocation99_spill]]  ;;  %s6914_s13 = smov [#allocation6]  }
   0xf   : > { %p7007_p8 = pnand %p5824_p5, %p208_p7  ;;  %s221_s14 = sshll.u32 %s6914_s13, 4  ;;  %s222_s14 = int_to_ptr.vmem [resolvable:$true] %s221_s14 }
  0x10   : > { %s233_s18 = sshll.u32 %s9155_s2, 4  ;;  %s6915_s19 = smov 64   ;;  %s234_s18 = int_to_ptr.hbm [resolvable:$true] %s233_s18 }
  0x11   : > { %p6613_p9 = pneg %p7007_p8  ;;  %s6916_s20 = smov 4  }
  0x12   : > { %s6917_s21 = smov [#allocation8]   ;;  %s247_s9 = sshll.u32 %s9156_s3, 4  ;;  %s248_s9 = int_to_ptr.hbm [resolvable:$true] %s247_s9 }
  0x13   : > { %p7015_p10 = pnand %p6613_p9, %p46_p1  ;;  %s235_s22 = sshll.u32 %s6917_s21, 4  ;;  %s236_s22 = int_to_ptr.vmem [resolvable:$true] %s235_s22 }
  0x14   : > { %s219_s11 = sshll.u32 %s9170_s1, 4  ;;  %s6918_s10 = smov [#allocation9]   ;;  %s220_s11 = int_to_ptr.hbm [resolvable:$true] %s219_s11 }
  0x15   : > { %6616 = dma.hbm_to_vmem [thread:$0]  (!%p7015_p10), %s220_s11, 1024, %s222_s14, [#allocation7], %s6915_s19, %s6915_s19, %s6916_s20  }
  0x16   : > { %6619 = dma.hbm_to_vmem [thread:$0]  (!%p7015_p10), %s234_s18, 9216, %s236_s22, [#allocation7], %s6915_s19, %s6915_s19, %s6916_s20  }
  0x17   : > { %s249_s13 = sshll.u32 %s6918_s10, 4  ;;  %s7031_s11 = sadd.s32 1, %s6912_s27   ;;  %s250_s13 = int_to_ptr.vmem [resolvable:$true] %s249_s13 }
  0x18   : > { %6622 = dma.hbm_to_vmem [thread:$0]  (!%p7015_p10), %s248_s9, 1024, %s250_s13, [#allocation10], %s6915_s19, %s6915_s19, %s6916_s20  }
  0x19   : > { %s29_s14 = ssub.s32 %s6912_s27, %s7031_s11  ;;  %s32_s16 = sadd.s32 1, %s6908_s26 }
  0x1a   : > { %p30_p12 = scmp.eq.s32.totalorder %s29_s14, 0  ;;  %p39_p13 = scmp.ne.s32.totalorder %s6908_s26, %s6904_s25 }
  0x1b   : > { %p40_p0 = scmp.eq.s32.totalorder %s6912_s27, 0  ;;  %p6634_p3 = scmp.lt.s32.totalorder %s6912_s27, 2 }
  0x1c   : > { %s7043_s17 = scalar_select %p30_p12, %s6908_s26, %s32_s16  }
  0x1d   : > { %p41_p5 = por %p40_p0, %p39_p13  ;;  %p7047_p7 = por %p195_p2, %p39_p13 }
  0x1e   : > { %s272_s21 = sand.u32 1, %s6908_s26   ;;  %s6435_s22 = sshll.u32 %s6912_s27, 8 }
  0x1f   : > { %s5829_s15 = sshll.u32 %s272_s21, 8  ;;  %s281_s20 = scalar_lea.hbm %s9153_s0, %s6435_s22 }
  0x20   : > { %s282_s29 = sshll.u32 %s281_s20, 4  ;;  %s276_s9 = scalar_lea.vmem [#allocation3], %s5829_s15  ;;  %s283_s29 = int_to_ptr.hbm [resolvable:$true] %s282_s29 }
  0x21   : > { %s284_s10 = sshll.u32 %s276_s9, 4  ;;  %p7058_p9 = pnand %p6634_p3, %p41_p5  ;;  %s285_s10 = int_to_ptr.vmem [resolvable:$true] %s284_s10 }
  0x22   : > { %s273_s14 = scalar_lea.sflag [#allocation4], %s272_s21  ;;  %s6808_s16 = sshra.s32 %s283_s29, 4  ;;  %s6809_s16 = int_to_ptr.hbm [resolvable:$true] %s6808_s16 }
  0x23   : > { %s6810_s1 = scalar_lea.hbm %s6809_s16, 256  ;;  %p6812_p10 = pneg %p7058_p9 }
  0x24   : > { %p6811_p2 = scmp.ne.s32.totalorder %s6809_s16, %s6810_s1  ;;  %s6815_s23 = scalar_lea.hbm %s9153_s0, 512 }
  0x25   : > { %p6816_p0 = scmp.lt.s32.totalorder %s6809_s16, %s9153_s0  ;;  %p6817_p3 = scmp.lt.s32.totalorder %s6815_s23, %s6810_s1 }
  0x26   : > { %p6813_p12 = pnand %p6812_p10, %p6811_p2 }
  0x27   : > { %p6818_p5 = por %p6817_p3, %p6816_p0 }
  0x28   : > { %p6814_p13 = pneg %p6813_p12 }
  0x2a   : > { %p6819_p11 = pnand %p6818_p5, %p6814_p13 }
  0x2c   : > { %6822 = shalt.err (!%p6819_p11)
}
  0x2d   : > { %s6919_s21 = smov 128   ;;  %s6920_s9 = smov 8  }
  0x2e   : > { %6626 = dma.hbm_to_vmem [thread:$0]  (!%p7058_p9), %s283_s29, 4096, %s285_s10, %s273_s14, %s6919_s21, %s6919_s21, %s6920_s9  }
  0x2f   : > { %296 = sbr.rel (%p7007_p8) target bundleno = 1362 (0x552), region = 48 }
  0x34   : > { %s7075_s22 = sand.u32 1, %s6904_s25  }
  0x35   : > { %s5833_s16 = sshll.u32 %s7075_s22, 8  ;;  %s299_s1 = scalar_lea.sflag [#allocation4], %s7075_s22 }
  0x36   : > { %s7081_s15 = scalar_lea.vmem [#allocation3], %s5833_s16 }
  0x37   : > { %6883 = dma.done.wait (%p6994_p4), %s299_s1, 4096  }
  0x38   : > { %6885 = vsyncadd (%p6994_p4), %s299_s1, 4294963200 }
  0x39   : > { %6887 = dma.done.wait (%p46_p1), [#allocation7], 10240  }
  0x3a   : > { %6889 = vsyncadd (%p46_p1), [#allocation7], 4294957056 }
  0x3b   : > { %6891 = dma.done.wait (%p46_p1), [#allocation10], 1024  }
  0x3c   : > { %6893 = vsyncadd (%p46_p1), [#allocation10], 4294966272  ;;  %v6443_v0 = vld [vmem:[#allocation6 + $0x38] sm:$0xff]  ;;  %v6442_v1 = vld [vmem:[#allocation6 + $0x30] sm:$0xff]  ;;  %v6921_v35 = vmov 0   ;;  %vm594_vm0 = vcmask 1040384  }
  0x3d   : > { %466 = vmatpush.bf16.msra.mxu0 %v6443_v0  ;;  %6573 = vmatpush.bf16.msra.mxu3 %v6443_v0  ;;  %v6441_v2 = vld [vmem:[#allocation6 + $0x28] sm:$0xff]  ;;  %v6440_v3 = vld [vmem:[#allocation6 + $0x20] sm:$0xff]  ;;  %v6439_v4 = vld [vmem:[#allocation6 + $0x18] sm:$0xff]  ;;  %587 = vst [vmem:[#allocation2] sm:$0xf] %v6921_v35  ;;  %v9175_v39 = vmov 0 }
  0x3e   : > { %v6438_v5 = vld [vmem:[#allocation6 + $0x10] sm:$0xff]  ;;  %v6437_v6 = vld [vmem:[#allocation6 + $0x8] sm:$0xff]  ;;  %v6436_v7 = vld [vmem:[#allocation6] sm:$0xff]  ;;  %588 = vst [vmem:[#allocation2 + $0x4] sm:$0xf] %v6921_v35  ;;  %v9178_v44 = vmov 0 }
  0x3f   : > { %v350_v8 = vld [vmem:[%s7081_s15] sm:$0xff]  ;;  %v351_v9 = vld [vmem:[%s7081_s15 + $0x8] sm:$0xff]  ;;  %v352_v11 = vld [vmem:[%s7081_s15 + $0x10] sm:$0xff]  ;;  %589 = vst [vmem:[#allocation2 + $0x8] sm:$0x1] %v6921_v35  ;;  %vm1062_vm8 = vcmask 1043456  }
  0x40   : > { %v382_v10 = vpack.c.bf16 %v351_v9, %v350_v8  ;;  %v353_v12 = vld [vmem:[%s7081_s15 + $0x18] sm:$0xff]  ;;  %v354_v14 = vld [vmem:[%s7081_s15 + $0x20] sm:$0xff]  ;;  %v355_v15 = vld [vmem:[%s7081_s15 + $0x28] sm:$0xff]  ;;  %591 = vst [vmem:[#allocation2 + $0xcc] sm:$0xf] %v6921_v35  ;;  %vm2126_vm12 = vcmask 1042432  }
  0x41   : > { %467 = vmatpush.bf16.msra.mxu0 %v6442_v1  ;;  %6574 = vmatpush.bf16.msra.mxu3 %v6442_v1  ;;  %v383_v13 = vpack.c.bf16 %v353_v12, %v352_v11  ;;  %v384_v16 = vpack.c.bf16 %v355_v15, %v354_v14  ;;  %v356_v17 = vld [vmem:[%s7081_s15 + $0x30] sm:$0xff]  ;;  %v357_v18 = vld [vmem:[%s7081_s15 + $0x38] sm:$0xff]  ;;  %v358_v20 = vld [vmem:[%s7081_s15 + $0x40] sm:$0xff]  ;;  %vm595_vm1 = vsmask.f32 256  ;;  %vm2127_vm13 = vcmask 1046532  }
  0x42   : > { %v385_v19 = vpack.c.bf16 %v357_v18, %v356_v17  ;;  %v359_v21 = vld [vmem:[%s7081_s15 + $0x48] sm:$0xff]  ;;  %v7105_v23 = vld [vmem:[#allocation8 + $0x38] sm:$0xff]  ;;  %v360_v24 = vld [vmem:[%s7081_s15 + $0x50] sm:$0xff]  ;;  %592 = vst [vmem:[#allocation2 + $0xd0] sm:$0xf] %v6921_v35  ;;  %s8967_s9 = scalar_lea.vmem [#allocation11], %s5833_s16 }
  0x43   : > { %v386_v22 = vpack.c.bf16 %v359_v21, %v358_v20  ;;  %1989 = vmatpush.bf16.msra.mxu2 %v7105_v23  ;;  %v361_v25 = vld [vmem:[%s7081_s15 + $0x58] sm:$0xff]  ;;  %v7110_v27 = vld [vmem:[#allocation8 + $0x30] sm:$0xff]  ;;  %v7113_v29 = vld [vmem:[#allocation8 + $0x28] sm:$0xff]  ;;  %vm651_vm3 = vsmask.f32 7938  ;;  %s6572_s16 = sshll.u32 %s6985_s28, 8 }
  0x44   : > { %v387_v26 = vpack.c.bf16 %v361_v25, %v360_v24  ;;  %v6475_v28 = vld [vmem:[#allocation8 + $0x78] sm:$0xff]  ;;  %v7116_v30 = vld [vmem:[#allocation8 + $0x20] sm:$0xff]  ;;  %v363_v32 = vld [vmem:[%s7081_s15 + $0x68] sm:$0xff]  ;;  %593 = vst [vmem:[#allocation2 + $0xd4] sm:$0x1] %v6921_v35  ;;  %s5717_s12 = scalar_lea.hbm %s9160_s7, %s6572_s16  ;;  %s5718_s29 = sshll.u32 %s8967_s9, 4  ;;  %s5719_s29 = int_to_ptr.vmem [resolvable:$true] %s5718_s29 }
  0x45   : > { %468 = vmatpush.bf16.msra.mxu0 %v6441_v2  ;;  %6575 = vmatpush.bf16.msra.mxu3 %v6441_v2  ;;  %v362_v31 = vld [vmem:[%s7081_s15 + $0x60] sm:$0xff]  ;;  %v6474_v33 = vld [vmem:[#allocation8 + $0x70] sm:$0xff]  ;;  %v7121_v34 = vld [vmem:[#allocation8 + $0x18] sm:$0xff]  ;;  %vm1240_vm5 = vsmask.f32 3328  ;;  %s5720_s10 = sshll.u32 %s5717_s12, 4  ;;  %s5721_s10 = int_to_ptr.hbm [resolvable:$true] %s5720_s10 }
  0x46   : > { %1756 = vmatpush.bf16.msra.mxu1 %v6475_v28  ;;  %v388_v36 = vpack.c.bf16 %v363_v32, %v362_v31  ;;  %v6473_v37 = vld [vmem:[#allocation8 + $0x68] sm:$0xff]  ;;  %v7124_v38 = vld [vmem:[#allocation8 + $0x10] sm:$0xff]  ;;  %vm7128_vm2 = vmand %vm594_vm0, %vm595_vm1  ;;  %vm1241_vm6 = vsmask.f32 7440  ;;  %vm739_vm10 = vsmask.f32 4368 }
  0x47   : > { %1990 = vmatpush.bf16.msra.mxu2 %v7110_v27  ;;  %v9176_v39 = vsel %vm7128_vm2, 4294967295, %v9175_v39  ;;  %v600_v40 = vld [vmem:[#allocation2 + $0xc] sm:$0x1]  ;;  %v597_v42 = vld [vmem:[#allocation2] sm:$0x1]  ;;  %vm7139_vm4 = vmand %vm594_vm0, %vm651_vm3  ;;  %s5706_s13 = scalar_lea.sflag [#allocation5], %s7075_s22 }
  0x48   : > { %9177 = vst [vmem:[#allocation16_spill] sm:$0xff] %v9176_v39  ;;  %v601_v41 = vsel %vm7128_vm2, 0, %v600_v40  ;;  %v598_v43 = vsel %vm7128_vm2, 0, %v597_v42  ;;  %v9179_v44 = vsel %vm7139_vm4, 4294967295, %v9178_v44  ;;  %v6472_v45 = vld [vmem:[#allocation8 + $0x60] sm:$0xff]  ;;  %v7143_v46 = vld [vmem:[#allocation8 + $0x8] sm:$0xff]  ;;  %vm7157_vm7 = vmor %vm1240_vm5, %vm1241_vm6 }
  0x49   : > { %469 = vmatpush.bf16.msra.mxu0 %v6440_v3  ;;  %6576 = vmatpush.bf16.msra.mxu3 %v6440_v3  ;;  %602 = vst [vmem:[#allocation2 + $0xc] sm:$0x1] %v601_v41  ;;  %v653_v47 = vld [vmem:[#allocation2 + $0x8] sm:$0x1]  ;;  %v656_v49 = vld [vmem:[#allocation2 + $0x14] sm:$0x1]  ;;  %vm7179_vm9 = vmand %vm1062_vm8, %vm651_vm3 }
  0x4a   : > { %1757 = vmatpush.bf16.msra.mxu1 %v6474_v33  ;;  %9180 = vst [vmem:[#allocation17_spill] sm:$0xff] %v9179_v44  ;;  %v654_v48 = vsel %vm7139_vm4, 0, %v653_v47  ;;  %v6471_v50 = vld [vmem:[#allocation8 + $0x58] sm:$0xff]  ;;  %v7148_v51 = vld [vmem:[#allocation8] sm:$0xff]  ;;  %v364_v52 = vld [vmem:[%s7081_s15 + $0x70] sm:$0xff]  ;;  %v657_v54 = vsel %vm7139_vm4, 0, %v656_v49 }
  0x4b   : > { %1991 = vmatpush.bf16.msra.mxu2 %v7113_v29  ;;  %599 = vst [vmem:[#allocation2] sm:$0x1] %v598_v43  ;;  %v365_v53 = vld [vmem:[%s7081_s15 + $0x78] sm:$0xff]  ;;  %v6470_v58 = vld [vmem:[#allocation8 + $0x50] sm:$0xff]  ;;  %v1177_v59 = vld [vmem:[#allocation2 + $0x4] sm:$0xf] }
  0x4c   : > { %655 = vst [vmem:[#allocation2 + $0x8] sm:$0x1] %v654_v48  ;;  %v389_v57 = vpack.c.bf16 %v365_v53, %v364_v52  ;;  %v1253_v62 = vshll.u32 %v1177_v59, 16  ;;  %v1257_v63 = vshrl.u32 %v1177_v59, 16  ;;  %v6468_v15 = vld [vmem:[#allocation8 + $0x40] sm:$0xff]  ;;  %v6507_v35 = vld [vmem:[#allocation8 + $0xf8] sm:$0xff]  ;;  %vm7194_vm11 = vmor %vm595_vm1, %vm739_vm10 }
  0x4d   : > { %470 = vmatpush.bf16.msra.mxu0 %v6439_v4  ;;  %6577 = vmatpush.bf16.msra.mxu3 %v6439_v4  ;;  %658 = vst [vmem:[#allocation2 + $0x14] sm:$0x1] %v657_v54  ;;  %v6469_v4 = vld [vmem:[#allocation8 + $0x48] sm:$0xff]  ;;  %v366_v21 = vld [vmem:[%s7081_s15 + $0x80] sm:$0xff]  ;;  %v6506_v42 = vld [vmem:[#allocation8 + $0xf0] sm:$0xff]  ;;  %s6852_s28 = sshra.s32 %s5721_s10, 4  ;;  %s6853_s28 = int_to_ptr.hbm [resolvable:$true] %s6852_s28 }
  0x4e   : > { %1758 = vmatpush.bf16.msra.mxu1 %v6473_v37  ;;  %v1255_v2 = vrot.slane %v1253_v62, 5  ;;  %v1259_v3 = vrot.slane %v1257_v63, 4  ;;  %v659_v24 = vld [vmem:[#allocation2 + $0x20] sm:$0x1]  ;;  %vm7449_vm14 = vmor %vm2126_vm12, %vm2127_vm13  ;;  %s6854_s14 = scalar_lea.hbm %s6853_s28, 256  ;;  %p6859_p11 = scmp.lt.s32.totalorder %s6853_s28, %s9160_s7 }
  0x4f   : > { %1992 = vmatpush.bf16.msra.mxu2 %v7116_v30  ;;  %v7170_v25 = vld [vmem:[%s9157_s4] ss:$0 sm:$0xff]  ;;  %p6855_p1 = scmp.ne.s32.totalorder %s6853_s28, %s6854_s14 }
  0x50   : > { %v1260_v8 = vor.u32 %v1259_v3, %v1255_v2  ;;  %v6505_v54 = vld [vmem:[#allocation8 + $0xe8] sm:$0xff] }
  0x51   : > { %471 = vmatpush.bf16.msra.mxu0 %v6438_v5  ;;  %6578 = vmatpush.bf16.msra.mxu3 %v6438_v5  ;;  %v375_v62 = vld [vmem:[%s7081_s15 + $0xc8] sm:$0xff]  ;;  %p6856_p4 = pnand %p6855_p1, %p7047_p7 }
  0x52   : > { %1759 = vmatpush.bf16.msra.mxu1 %v6472_v45  ;;  %v6444_v55 = vld [vmem:[#allocation2] sm:$0xff] }
  0x53   : > { %1993 = vmatpush.bf16.msra.mxu2 %v7121_v34  ;;  %v1176_v56 = vld [vmem:[#allocation2] sm:$0xf]  ;;  %v1224_v5 = vld [vmem:[#allocation2 + $0x8] sm:$0x1]  ;;  %p6857_p8 = pneg %p6856_p4 }
  0x54   : > { %v1244_v60 = vshrl.u32 %v1176_v56, 16  ;;  %v1247_v61 = vshll.u32 %v1176_v56, 16  ;;  %v1263_v9 = vshll.u32 %v1224_v5, 16  ;;  %v369_v56 = vld [vmem:[%s7081_s15 + $0x98] sm:$0xff] }
  0x55   : > { %472 = vmatpush.bf16.msra.mxu0 %v6437_v6  ;;  %6579 = vmatpush.bf16.msra.mxu3 %v6437_v6 }
  0x56   : > { %1760 = vmatpush.bf16.msra.mxu1 %v6471_v50  ;;  %v1246_v0 = vrot.slane %v1244_v60, 4  ;;  %v1249_v1 = vrot.slane %v1247_v61, 5  ;;  %v1265_v14 = vrot.slane %v1263_v9, 5  ;;  %v374_v61 = vld [vmem:[%s7081_s15 + $0xc0] sm:$0xff] }
  0x57   : > { %1994 = vmatpush.bf16.msra.mxu2 %v7124_v38  ;;  %v394_v63 = vpack.c.bf16 %v375_v62, %v374_v61 }
  0x58   : > { %v1250_v6 = vor.u32 %v1249_v1, %v1246_v0 }
  0x59   : > { %473 = vmatpush.bf16.msra.mxu0 %v6436_v7  ;;  %6580 = vmatpush.bf16.msra.mxu3 %v6436_v7  ;;  %v603_v7 = vld [vmem:[#allocation2 + $0x18] sm:$0x1] }
  0x5a   : > { %1761 = vmatpush.bf16.msra.mxu1 %v6470_v58  ;;  %v1251_v11 = vrot.slane %v1250_v6, 4 }
  0x5b   : > { %1995 = vmatpush.bf16.msra.mxu2 %v7143_v46 }
  0x5c   : > { %474 = vmatmul.bf16.vlgmr.msra.gmra.mxu0 %v382_v10  ;;  %v604_v10 = vsel %vm7128_vm2, 0, %v603_v7  ;;  %534 = vmatmul.bf16.vlgmr.msra.gmra.mxu3 %v394_v63 }
  0x5d   : > { %6581 = vmatpush.bf16.msrb.mxu3 %v6475_v28  ;;  %605 = vst [vmem:[#allocation2 + $0x18] sm:$0x1] %v604_v10  ;;  %2684 = vmatpush.bf16.msrb.mxu0 %v6507_v35 }
  0x5e   : > { %1762 = vmatpush.bf16.msra.mxu1 %v6469_v4 }
  0x5f   : > { %1996 = vmatpush.bf16.msra.mxu2 %v7148_v51 }
  0x61   : > { %6582 = vmatpush.bf16.msrb.mxu3 %v6474_v33  ;;  %2685 = vmatpush.bf16.msrb.mxu0 %v6506_v42  ;;  %v371_v42 = vld [vmem:[%s7081_s15 + $0xa8] sm:$0xff] }
  0x62   : > { %1997 = vmatmul.bf16.vlgmr.msra.gmra.mxu2 %v6444_v55  ;;  %1763 = vmatpush.bf16.msra.mxu1 %v6468_v15  ;;  %v368_v55 = vld [vmem:[%s7081_s15 + $0x90] sm:$0xff] }
  0x63   : > { %v391_v1 = vpack.c.bf16 %v369_v56, %v368_v55 }
  0x65   : > { %6583 = vmatpush.bf16.msrb.mxu3 %v6473_v37  ;;  %2686 = vmatpush.bf16.msrb.mxu0 %v6505_v54 }
  0x69   : > { %6584 = vmatpush.bf16.msrb.mxu3 %v6472_v45 }
  0x6c   : > { %479 = vmatmul.bf16.gmra.mxu0 %v383_v13  ;;  %v1261_v13 = vrot.slane %v1260_v8, 4  ;;  %v1068_v8 = vld [vmem:[#allocation2 + $0x14] sm:$0x1] }
  0x6d   : > { %6585 = vmatpush.bf16.msrb.mxu3 %v6471_v50  ;;  %v1064_v50 = vld [vmem:[#allocation2 + $0xc] sm:$0xf] }
  0x6e   : > { %v1266_v17 = vsel %vm7157_vm7, %v1261_v13, %v1265_v14  ;;  %v6503_v14 = vld [vmem:[#allocation8 + $0xd8] sm:$0xff] }
  0x71   : > { %6586 = vmatpush.bf16.msrb.mxu3 %v6470_v58 }
  0x75   : > { %6587 = vmatpush.bf16.msrb.mxu3 %v6469_v4 }
  0x79   : > { %6588 = vmatpush.bf16.msrb.mxu3 %v6468_v15  ;;  %v609_v15 = vld [vmem:[#allocation2 + $0x30] sm:$0x1] }
  0x7c   : > { %484 = vmatmul.bf16.gmra.mxu0 %v384_v16  ;;  %v1256_v16 = vsel %vm7157_vm7, %v1251_v11, %v1255_v2  ;;  %v6504_v2 = vld [vmem:[#allocation8 + $0xe0] sm:$0xff] }
  0x7d   : > { %v1644_v18 = vunpack.c.l.b16 %v1256_v16  ;;  %2687 = vmatpush.bf16.msrb.mxu0 %v6504_v2  ;;  %6589 = vmatpush.bf16.msra.mxu3 %v7105_v23 }
  0x81   : > { %2688 = vmatpush.bf16.msrb.mxu0 %v6503_v14  ;;  %6590 = vmatpush.bf16.msra.mxu3 %v7110_v27 }
  0x85   : > { %6591 = vmatpush.bf16.msra.mxu3 %v7113_v29 }
  0x89   : > { %6592 = vmatpush.bf16.msra.mxu3 %v7116_v30 }
  0x8c   : > { %489 = vmatmul.bf16.gmra.mxu0 %v385_v19  ;;  %v1645_v19 = vunpack.c.l.b16 %v1266_v17 }
  0x8d   : > { %6593 = vmatpush.bf16.msra.mxu3 %v7121_v34 }
  0x8e   : > { %v1676_v20 = vpack.c.b16 %v1645_v19, %v1644_v18  ;;  %v610_v19 = vsel %vm7128_vm2, 0, %v609_v15 }
  0x8f   : > { %611 = vst [vmem:[#allocation2 + $0x30] sm:$0x1] %v610_v19 }
  0x90   : > { %1764 = vmatmul.bf16.vlgmr.msra.gmra.mxu1 %v1676_v20 }
  0x91   : > { %6594 = vmatpush.bf16.msra.mxu3 %v7124_v38 }
  0x95   : > { %6595 = vmatpush.bf16.msra.mxu3 %v7143_v46 }
  0x99   : > { %6596 = vmatpush.bf16.msra.mxu3 %v7148_v51 }
  0x9c   : > { %494 = vmatmul.bf16.gmra.mxu0 %v386_v22  ;;  %v367_v22 = vld [vmem:[%s7081_s15 + $0x88] sm:$0xff] }
  0x9d   : > { %v390_v28 = vpack.c.bf16 %v367_v22, %v366_v21 }
  0xac   : > { %499 = vmatmul.bf16.gmra.mxu0 %v387_v26  ;;  %v660_v26 = vsel %vm7139_vm4, 0, %v659_v24  ;;  %v6502_v24 = vld [vmem:[#allocation8 + $0xd0] sm:$0xff] }
  0xad   : > { %661 = vst [vmem:[#allocation2 + $0x20] sm:$0x1] %v660_v26  ;;  %2689 = vmatpush.bf16.msrb.mxu0 %v6502_v24 }
  0xbc   : > { %504 = vmatmul.bf16.gmra.mxu0 %v388_v36  ;;  %v606_v36 = vld [vmem:[#allocation2 + $0x24] sm:$0x1] }
  0xbd   : > { %v607_v40 = vsel %vm7128_vm2, 0, %v606_v36 }
  0xbe   : > { %608 = vst [vmem:[#allocation2 + $0x24] sm:$0x1] %v607_v40  ;;  %v6501_v40 = vld [vmem:[#allocation8 + $0xc8] sm:$0xff] }
  0xbf   : > { %2690 = vmatpush.bf16.msrb.mxu0 %v6501_v40 }
  0xc5   : > { %v1078_v38 = vld [vmem:[#allocation2 + $0x24] sm:$0xf] }
  0xcc   : > { %509 = vmatmul.bf16.gmra.mxu0 %v389_v57  ;;  %v662_v57 = vld [vmem:[#allocation2 + $0x2c] sm:$0x1] }
  0xcd   : > { %v663_v60 = vsel %vm7139_vm4, 0, %v662_v57 }
  0xce   : > { %664 = vst [vmem:[#allocation2 + $0x2c] sm:$0x1] %v663_v60 }
  0xd9   : > { %v475_v31 = vpop.f32.mrf.mxu0 }
  0xda   : > { %v476_v32 = vadd.f32 %v7170_v25, %v475_v31 }
  0xdc   : > { %v555_v33 = vmax.f32 %v476_v32, 0.0  ;;  %514 = vmatmul.bf16.gmra.mxu0 %v390_v28 }
  0xde   : > { %v707_v37 = vpack.c.bf16 %v555_v33, %v555_v33  ;;  %v1071_v33 = vld [vmem:[#allocation2 + $0x18] sm:$0xf] }
  0xe0   : > { %v742_v41 = vshrl.u32 %v707_v37, 16  ;;  %v745_v47 = vshll.u32 %v707_v37, 16 }
  0xe1   : > { %v477_v43 = vpop.f32.mrf.mxu0 }
  0xe2   : > { %v744_v45 = vrot.slane %v742_v41, 7  ;;  %v478_v48 = vadd.f32 %v7170_v25, %v477_v43  ;;  %v370_v41 = vld [vmem:[%s7081_s15 + $0xa0] sm:$0xff] }
  0xe3   : > { %v665_v43 = vld [vmem:[#allocation2 + $0x38] sm:$0x1] }
  0xe4   : > { %v747_v52 = vor.u32 %v745_v47, %v744_v45  ;;  %v556_v53 = vmax.f32 %v478_v48, 0.0  ;;  %v748_v9 = vrot.slane %v744_v45, 4  ;;  %v666_v29 = vsel %vm7139_vm4, 0, %v665_v43  ;;  %v373_v43 = vld [vmem:[%s7081_s15 + $0xb8] sm:$0xff] }
  0xe5   : > { %667 = vst [vmem:[#allocation2 + $0x38] sm:$0x1] %v666_v29 }
  0xe6   : > { %v1065_v58 = vsel %vm7179_vm9, %v747_v52, %v1064_v50  ;;  %v708_v59 = vpack.c.bf16 %v556_v53, %v556_v53  ;;  %v376_v52 = vld [vmem:[%s7081_s15 + $0xd0] sm:$0xff] }
  0xe7   : > { %1066 = vst [vmem:[#allocation2 + $0xc] sm:$0xf] %v1065_v58  ;;  %v392_v58 = vpack.c.bf16 %v371_v42, %v370_v41  ;;  %v372_v42 = vld [vmem:[%s7081_s15 + $0xb0] sm:$0xff] }
  0xe8   : > { %v750_v0 = vshrl.u32 %v708_v59, 16  ;;  %v753_v5 = vshll.u32 %v708_v59, 16  ;;  %v377_v59 = vld [vmem:[%s7081_s15 + $0xd8] sm:$0xff] }
  0xe9   : > { %v480_v3 = vpop.f32.mrf.mxu0 }
  0xea   : > { %v752_v4 = vrot.slane %v750_v0, 7  ;;  %v481_v6 = vadd.f32 %v7170_v25, %v480_v3  ;;  %v395_v0 = vpack.c.bf16 %v377_v59, %v376_v52 }
  0xec   : > { %v755_v10 = vor.u32 %v753_v5, %v752_v4  ;;  %v757_v11 = vrot.slane %v752_v4, 4  ;;  %v557_v13 = vmax.f32 %v481_v6, 0.0  ;;  %519 = vmatmul.bf16.gmra.mxu0 %v391_v1  ;;  %v6500_v1 = vld [vmem:[#allocation8 + $0xc0] sm:$0xff]  ;;  %v1075_v4 = vld [vmem:[#allocation2 + $0x20] sm:$0x1]  ;;  %539 = vmatmul.bf16.gmra.mxu3 %v395_v0 }
  0xed   : > { %2691 = vmatpush.bf16.msrb.mxu0 %v6500_v1 }
  0xee   : > { %v756_v16 = vsel %vm7194_vm11, %v748_v9, %v755_v10  ;;  %v1069_v17 = vsel %vm7128_vm2, %v757_v11, %v1068_v8  ;;  %v709_v23 = vpack.c.bf16 %v557_v13, %v557_v13  ;;  %v1178_v18 = vld [vmem:[#allocation2 + $0xc] sm:$0xf] }
  0xef   : > { %1067 = vst [vmem:[#allocation2 + $0x10] sm:$0xf] %v756_v16  ;;  %v1268_v20 = vshrl.u32 %v1178_v18, 16  ;;  %v1271_v21 = vshll.u32 %v1178_v18, 16  ;;  %v612_v16 = vld [vmem:[#allocation2 + $0x3c] sm:$0x1] }
  0xf0   : > { %1070 = vst [vmem:[#allocation2 + $0x14] sm:$0x1] %v1069_v17  ;;  %v759_v22 = vshrl.u32 %v709_v23, 16  ;;  %v762_v31 = vshll.u32 %v709_v23, 16  ;;  %v613_v19 = vsel %vm7128_vm2, 0, %v612_v16 }
  0xf1   : > { %v482_v26 = vpop.f32.mrf.mxu0  ;;  %v1270_v27 = vrot.slane %v1268_v20, 4  ;;  %v1273_v35 = vrot.slane %v1271_v21, 5  ;;  %614 = vst [vmem:[#allocation2 + $0x3c] sm:$0x1] %v613_v19  ;;  %v615_v19 = vld [vmem:[#allocation2 + $0x48] sm:$0x1] }
  0xf2   : > { %v761_v28 = vrot.slane %v759_v22, 7  ;;  %v483_v32 = vadd.f32 %v7170_v25, %v482_v26 }
  0xf3   : > { %v1274_v54 = vor.u32 %v1273_v35, %v1270_v27 }
  0xf4   : > { %v764_v36 = vor.u32 %v762_v31, %v761_v28  ;;  %v558_v37 = vmax.f32 %v483_v32, 0.0  ;;  %v765_v8 = vrot.slane %v761_v28, 4 }
  0xf5   : > { %v1275_v5 = vrot.slane %v1274_v54, 4 }
  0xf6   : > { %v1072_v45 = vsel %vm7179_vm9, %v764_v36, %v1071_v33  ;;  %v710_v47 = vpack.c.bf16 %v558_v37, %v558_v37  ;;  %v6445_v48 = vld [vmem:[#allocation2 + $0xc] sm:$0xff] }
  0xf7   : > { %v1179_v50 = vld [vmem:[#allocation2 + $0x10] sm:$0xf]  ;;  %1073 = vst [vmem:[#allocation2 + $0x18] sm:$0xf] %v1072_v45  ;;  %v1225_v53 = vld [vmem:[#allocation2 + $0x14] sm:$0x1]  ;;  %2002 = vmatmul.bf16.gmra.mxu2 %v6445_v48 }
  0xf8   : > { %v1277_v55 = vshll.u32 %v1179_v50, 16  ;;  %v1281_v56 = vshrl.u32 %v1179_v50, 16  ;;  %v767_v57 = vshrl.u32 %v710_v47, 16  ;;  %v1287_v63 = vshll.u32 %v1225_v53, 16 }
  0xf9   : > { %v485_v60 = vpop.f32.mrf.mxu0  ;;  %v770_v3 = vshll.u32 %v710_v47, 16 }
  0xfa   : > { %v1279_v61 = vrot.slane %v1277_v55, 5  ;;  %v1283_v62 = vrot.slane %v1281_v56, 4  ;;  %v769_v2 = vrot.slane %v767_v57, 7  ;;  %v486_v30 = vadd.f32 %v7170_v25, %v485_v60  ;;  %v378_v56 = vld [vmem:[%s7081_s15 + $0xe0] sm:$0xff] }
  0xfb   : > { %v1289_v15 = vrot.slane %v1287_v63, 5  ;;  %v393_v55 = vpack.c.bf16 %v373_v43, %v372_v42 }
  0xfc   : > { %v1284_v6 = vor.u32 %v1283_v62, %v1279_v61  ;;  %v772_v9 = vor.u32 %v770_v3, %v769_v2  ;;  %v774_v10 = vrot.slane %v769_v2, 4  ;;  %v559_v11 = vmax.f32 %v486_v30, 0.0  ;;  %524 = vmatmul.bf16.gmra.mxu0 %v392_v58  ;;  %v379_v62 = vld [vmem:[%s7081_s15 + $0xe8] sm:$0xff]  ;;  %v1082_v2 = vld [vmem:[#allocation2 + $0x2c] sm:$0x1] }
  0xfd   : > { %v1280_v13 = vsel %vm7157_vm7, %v1275_v5, %v1279_v61  ;;  %v668_v61 = vld [vmem:[#allocation2 + $0x44] sm:$0x1] }
  0xfe   : > { %v1285_v14 = vrot.slane %v1284_v6, 4  ;;  %v773_v17 = vsel %vm7194_vm11, %v765_v8, %v772_v9  ;;  %v1076_v34 = vsel %vm7128_vm2, %v774_v10, %v1075_v4  ;;  %v711_v23 = vpack.c.bf16 %v559_v11, %v559_v11  ;;  %v1180_v18 = vld [vmem:[#allocation2 + $0x18] sm:$0xf] }
  0xff   : > { %1074 = vst [vmem:[#allocation2 + $0x1c] sm:$0xf] %v773_v17  ;;  %v1292_v21 = vshrl.u32 %v1180_v18, 16  ;;  %v1295_v22 = vshll.u32 %v1180_v18, 16  ;;  %v1646_v26 = vunpack.c.l.b16 %v1280_v13  ;;  %v669_v51 = vsel %vm7139_vm4, 0, %v668_v61 }
 0x100   : > { %v1290_v20 = vsel %vm7157_vm7, %v1285_v14, %v1289_v15  ;;  %1077 = vst [vmem:[#allocation2 + $0x20] sm:$0x1] %v1076_v34  ;;  %v776_v24 = vshrl.u32 %v711_v23, 16  ;;  %v779_v33 = vshll.u32 %v711_v23, 16  ;;  %v396_v4 = vpack.c.bf16 %v379_v62, %v378_v56  ;;  %v1089_v61 = vld [vmem:[#allocation2 + $0x38] sm:$0x1] }
 0x101   : > { %v1647_v28 = vunpack.c.l.b16 %v1290_v20  ;;  %v487_v31 = vpop.f32.mrf.mxu0  ;;  %v1294_v36 = vrot.slane %v1292_v21, 4  ;;  %v1297_v37 = vrot.slane %v1295_v22, 5  ;;  %670 = vst [vmem:[#allocation2 + $0x44] sm:$0x1] %v669_v51 }
 0x102   : > { %v778_v32 = vrot.slane %v776_v24, 7  ;;  %v488_v27 = vadd.f32 %v7170_v25, %v487_v31  ;;  %544 = vmatmul.bf16.gmra.mxu3 %v396_v4  ;;  %v616_v24 = vsel %vm7128_vm2, 0, %v615_v19 }
 0x103   : > { %v1677_v35 = vpack.c.b16 %v1647_v28, %v1646_v26  ;;  %v1298_v29 = vor.u32 %v1297_v37, %v1294_v36  ;;  %617 = vst [vmem:[#allocation2 + $0x48] sm:$0x1] %v616_v24 }
 0x104   : > { %v781_v40 = vor.u32 %v779_v33, %v778_v32  ;;  %v560_v41 = vmax.f32 %v488_v27, 0.0  ;;  %v782_v5 = vrot.slane %v778_v32, 4  ;;  %v1085_v27 = vld [vmem:[#allocation2 + $0x30] sm:$0xf] }
 0x105   : > { %1769 = vmatmul.bf16.gmra.mxu1 %v1677_v35  ;;  %v1299_v3 = vrot.slane %v1298_v29, 4 }
 0x106   : > { %v1079_v45 = vsel %vm7179_vm9, %v781_v40, %v1078_v38  ;;  %v712_v47 = vpack.c.bf16 %v560_v41, %v560_v41  ;;  %v6446_v48 = vld [vmem:[#allocation2 + $0x18] sm:$0xff] }
 0x107   : > { %v1181_v50 = vld [vmem:[#allocation2 + $0x1c] sm:$0xf]  ;;  %1080 = vst [vmem:[#allocation2 + $0x24] sm:$0xf] %v1079_v45  ;;  %v1226_v46 = vld [vmem:[#allocation2 + $0x20] sm:$0x1]  ;;  %2007 = vmatmul.bf16.gmra.mxu2 %v6446_v48 }
 0x108   : > { %v1301_v52 = vshll.u32 %v1181_v50, 16  ;;  %v1305_v53 = vshrl.u32 %v1181_v50, 16  ;;  %v784_v54 = vshrl.u32 %v712_v47, 16  ;;  %v1311_v60 = vshll.u32 %v1226_v46, 16 }
 0x109   : > { %v490_v57 = vpop.f32.mrf.mxu0  ;;  %v787_v0 = vshll.u32 %v712_v47, 16 }
 0x10a   : > { %v1303_v58 = vrot.slane %v1301_v52, 5  ;;  %v1307_v59 = vrot.slane %v1305_v53, 4  ;;  %v786_v63 = vrot.slane %v784_v54, 7  ;;  %v491_v1 = vadd.f32 %v7170_v25, %v490_v57 }
 0x10b   : > { %v1313_v13 = vrot.slane %v1311_v60, 5 }
 0x10c   : > { %v1308_v30 = vor.u32 %v1307_v59, %v1303_v58  ;;  %v789_v6 = vor.u32 %v787_v0, %v786_v63  ;;  %v791_v8 = vrot.slane %v786_v63, 4  ;;  %v561_v9 = vmax.f32 %v491_v1, 0.0  ;;  %529 = vmatmul.bf16.gmra.mxu0 %v393_v55  ;;  %v671_v55 = vld [vmem:[#allocation2 + $0x50] sm:$0x1] }
 0x10d   : > { %v1304_v10 = vsel %vm7157_vm7, %v1299_v3, %v1303_v58  ;;  %v6484_v59 = vld [vmem:[#allocation2 + $0xc] sm:$0xff]  ;;  %v672_v60 = vsel %vm7139_vm4, 0, %v671_v55 }
 0x10e   : > { %v1309_v11 = vrot.slane %v1308_v30, 4  ;;  %v790_v14 = vsel %vm7194_vm11, %v782_v5, %v789_v6  ;;  %v1083_v15 = vsel %vm7128_vm2, %v791_v8, %v1082_v2  ;;  %v713_v16 = vpack.c.bf16 %v561_v9, %v561_v9  ;;  %v1182_v17 = vld [vmem:[#allocation2 + $0x24] sm:$0xf]  ;;  %673 = vst [vmem:[#allocation2 + $0x50] sm:$0x1] %v672_v60 }
 0x10f   : > { %1081 = vst [vmem:[#allocation2 + $0x28] sm:$0xf] %v790_v14  ;;  %v1316_v23 = vshrl.u32 %v1182_v17, 16  ;;  %v1319_v18 = vshll.u32 %v1182_v17, 16  ;;  %v1648_v21 = vunpack.c.l.b16 %v1304_v10  ;;  %v618_v14 = vld [vmem:[#allocation2 + $0x54] sm:$0x1] }
 0x110   : > { %v1314_v34 = vsel %vm7157_vm7, %v1309_v11, %v1313_v13  ;;  %1084 = vst [vmem:[#allocation2 + $0x2c] sm:$0x1] %v1083_v15  ;;  %v793_v20 = vshrl.u32 %v713_v16, 16  ;;  %v796_v31 = vshll.u32 %v713_v16, 16 }
 0x111   : > { %v1649_v22 = vunpack.c.l.b16 %v1314_v34  ;;  %v492_v26 = vpop.f32.mrf.mxu0  ;;  %v1318_v35 = vrot.slane %v1316_v23, 4  ;;  %v1321_v38 = vrot.slane %v1319_v18, 5  ;;  %v619_v34 = vsel %vm7128_vm2, 0, %v618_v14 }
 0x112   : > { %v795_v28 = vrot.slane %v793_v20, 7  ;;  %v493_v32 = vadd.f32 %v7170_v25, %v492_v26  ;;  %620 = vst [vmem:[#allocation2 + $0x54] sm:$0x1] %v619_v34 }
 0x113   : > { %v1678_v33 = vpack.c.b16 %v1649_v22, %v1648_v21  ;;  %v1322_v47 = vor.u32 %v1321_v38, %v1318_v35  ;;  %v1092_v22 = vld [vmem:[#allocation2 + $0x3c] sm:$0xf] }
 0x114   : > { %v798_v36 = vor.u32 %v796_v31, %v795_v28  ;;  %v562_v37 = vmax.f32 %v493_v32, 0.0  ;;  %v799_v0 = vrot.slane %v795_v28, 4 }
 0x115   : > { %1774 = vmatmul.bf16.gmra.mxu1 %v1678_v33  ;;  %v1323_v62 = vrot.slane %v1322_v47, 4 }
 0x116   : > { %v1086_v40 = vsel %vm7179_vm9, %v798_v36, %v1085_v27  ;;  %v714_v41 = vpack.c.bf16 %v562_v37, %v562_v37  ;;  %v6447_v42 = vld [vmem:[#allocation2 + $0x24] sm:$0xff] }
 0x117   : > { %v1183_v43 = vld [vmem:[#allocation2 + $0x28] sm:$0xf]  ;;  %1087 = vst [vmem:[#allocation2 + $0x30] sm:$0xf] %v1086_v40  ;;  %v1227_v45 = vld [vmem:[#allocation2 + $0x2c] sm:$0x1]  ;;  %2012 = vmatmul.bf16.gmra.mxu2 %v6447_v42 }
 0x118   : > { %v1325_v48 = vshll.u32 %v1183_v43, 16  ;;  %v1329_v50 = vshrl.u32 %v1183_v43, 16  ;;  %v801_v46 = vshrl.u32 %v714_v41, 16  ;;  %v1335_v54 = vshll.u32 %v1227_v45, 16 }
 0x119   : > { %v495_v29 = vpop.f32.mrf.mxu0  ;;  %v804_v57 = vshll.u32 %v714_v41, 16 }
 0x11a   : > { %v1327_v52 = vrot.slane %v1325_v48, 5  ;;  %v1331_v53 = vrot.slane %v1329_v50, 4  ;;  %v803_v56 = vrot.slane %v801_v46, 7  ;;  %v496_v58 = vadd.f32 %v7170_v25, %v495_v29  ;;  %v674_v48 = vld [vmem:[#allocation2 + $0x5c] sm:$0x1] }
 0x11b   : > { %v1337_v4 = vrot.slane %v1335_v54, 5  ;;  %v1096_v54 = vld [vmem:[#allocation2 + $0x44] sm:$0x1] }
 0x11c   : > { %v1332_v63 = vor.u32 %v1331_v53, %v1327_v52  ;;  %v806_v1 = vor.u32 %v804_v57, %v803_v56  ;;  %v808_v51 = vrot.slane %v803_v56, 4  ;;  %v563_v2 = vmax.f32 %v496_v58, 0.0  ;;  %2692 = vmatmul.bf16.vlgmr.msrb.gmra.mxu0 %v6484_v59 }
 0x11d   : > { %v1328_v3 = vsel %vm7157_vm7, %v1323_v62, %v1327_v52  ;;  %v6485_v52 = vld [vmem:[#allocation2 + $0x18] sm:$0xff]  ;;  %v675_v53 = vsel %vm7139_vm4, 0, %v674_v48 }
 0x11e   : > { %v1333_v30 = vrot.slane %v1332_v63, 4  ;;  %v807_v5 = vsel %vm7194_vm11, %v799_v0, %v806_v1  ;;  %v1090_v6 = vsel %vm7128_vm2, %v808_v51, %v1089_v61  ;;  %v715_v8 = vpack.c.bf16 %v563_v2, %v563_v2  ;;  %v1184_v9 = vld [vmem:[#allocation2 + $0x30] sm:$0xf]  ;;  %676 = vst [vmem:[#allocation2 + $0x5c] sm:$0x1] %v675_v53 }
 0x11f   : > { %1088 = vst [vmem:[#allocation2 + $0x34] sm:$0xf] %v807_v5  ;;  %v1340_v11 = vshrl.u32 %v1184_v9, 16  ;;  %v1343_v13 = vshll.u32 %v1184_v9, 16  ;;  %v1650_v16 = vunpack.c.l.b16 %v1328_v3  ;;  %v621_v5 = vld [vmem:[#allocation2 + $0x60] sm:$0x1] }
 0x120   : > { %v1338_v10 = vsel %vm7157_vm7, %v1333_v30, %v1337_v4  ;;  %1091 = vst [vmem:[#allocation2 + $0x38] sm:$0x1] %v1090_v6  ;;  %v810_v15 = vshrl.u32 %v715_v8, 16  ;;  %v813_v19 = vshll.u32 %v715_v8, 16 }
 0x121   : > { %v1651_v17 = vunpack.c.l.b16 %v1338_v10  ;;  %v497_v23 = vpop.f32.mrf.mxu0  ;;  %v1342_v24 = vrot.slane %v1340_v11, 4  ;;  %v1345_v26 = vrot.slane %v1343_v13, 5  ;;  %v622_v10 = vsel %vm7128_vm2, 0, %v621_v5 }
 0x122   : > { %v812_v18 = vrot.slane %v810_v15, 7  ;;  %v498_v20 = vadd.f32 %v7170_v25, %v497_v23  ;;  %623 = vst [vmem:[#allocation2 + $0x60] sm:$0x1] %v622_v10 }
 0x123   : > { %v1679_v21 = vpack.c.b16 %v1651_v17, %v1650_v16  ;;  %v1346_v36 = vor.u32 %v1345_v26, %v1342_v24  ;;  %v1099_v17 = vld [vmem:[#allocation2 + $0x48] sm:$0xf] }
 0x124   : > { %v815_v28 = vor.u32 %v813_v19, %v812_v18  ;;  %v564_v31 = vmax.f32 %v498_v20, 0.0  ;;  %v816_v57 = vrot.slane %v812_v18, 4 }
 0x125   : > { %1779 = vmatmul.bf16.gmra.mxu1 %v1679_v21  ;;  %v1347_v55 = vrot.slane %v1346_v36, 4 }
 0x126   : > { %v1093_v32 = vsel %vm7179_vm9, %v815_v28, %v1092_v22  ;;  %v716_v33 = vpack.c.bf16 %v564_v31, %v564_v31  ;;  %v6448_v27 = vld [vmem:[#allocation2 + $0x30] sm:$0xff] }
 0x127   : > { %v1185_v35 = vld [vmem:[#allocation2 + $0x34] sm:$0xf]  ;;  %1094 = vst [vmem:[#allocation2 + $0x3c] sm:$0xf] %v1093_v32  ;;  %v1228_v38 = vld [vmem:[#allocation2 + $0x38] sm:$0x1]  ;;  %2017 = vmatmul.bf16.gmra.mxu2 %v6448_v27 }
 0x128   : > { %v1349_v37 = vshll.u32 %v1185_v35, 16  ;;  %v1353_v40 = vshrl.u32 %v1185_v35, 16  ;;  %v818_v41 = vshrl.u32 %v716_v33, 16  ;;  %v1359_v47 = vshll.u32 %v1228_v38, 16 }
 0x129   : > { %v500_v42 = vpop.f32.mrf.mxu0  ;;  %v821_v46 = vshll.u32 %v716_v33, 16 }
 0x12a   : > { %v1351_v43 = vrot.slane %v1349_v37, 5  ;;  %v1355_v45 = vrot.slane %v1353_v40, 4  ;;  %v820_v50 = vrot.slane %v818_v41, 7  ;;  %v501_v29 = vadd.f32 %v7170_v25, %v500_v42  ;;  %v677_v37 = vld [vmem:[#allocation2 + $0x68] sm:$0x1] }
 0x12b   : > { %v1361_v63 = vrot.slane %v1359_v47, 5  ;;  %v1103_v47 = vld [vmem:[#allocation2 + $0x50] sm:$0x1] }
 0x12c   : > { %v1356_v56 = vor.u32 %v1355_v45, %v1351_v43  ;;  %v823_v58 = vor.u32 %v821_v46, %v820_v50  ;;  %v825_v59 = vrot.slane %v820_v50, 4  ;;  %v565_v60 = vmax.f32 %v501_v29, 0.0  ;;  %2697 = vmatmul.bf16.gmra.mxu0 %v6485_v52 }
 0x12d   : > { %v1352_v61 = vsel %vm7157_vm7, %v1347_v55, %v1351_v43  ;;  %v6486_v43 = vld [vmem:[#allocation2 + $0x24] sm:$0xff]  ;;  %v678_v45 = vsel %vm7139_vm4, 0, %v677_v37  ;;  %v381_v37 = vld [vmem:[%s7081_s15 + $0xf8] sm:$0xff] }
 0x12e   : > { %v1357_v62 = vrot.slane %v1356_v56, 4  ;;  %v824_v0 = vsel %vm7194_vm11, %v816_v57, %v823_v58  ;;  %v1097_v1 = vsel %vm7128_vm2, %v825_v59, %v1096_v54  ;;  %v717_v51 = vpack.c.bf16 %v565_v60, %v565_v60  ;;  %v1186_v2 = vld [vmem:[#allocation2 + $0x3c] sm:$0xf]  ;;  %679 = vst [vmem:[#allocation2 + $0x68] sm:$0x1] %v678_v45 }
 0x12f   : > { %1095 = vst [vmem:[#allocation2 + $0x40] sm:$0xf] %v824_v0  ;;  %v1364_v30 = vshrl.u32 %v1186_v2, 16  ;;  %v1367_v4 = vshll.u32 %v1186_v2, 16  ;;  %v1652_v8 = vunpack.c.l.b16 %v1352_v61  ;;  %v624_v0 = vld [vmem:[#allocation2 + $0x6c] sm:$0x1] }
 0x130   : > { %v1362_v3 = vsel %vm7157_vm7, %v1357_v62, %v1361_v63  ;;  %1098 = vst [vmem:[#allocation2 + $0x44] sm:$0x1] %v1097_v1  ;;  %v827_v6 = vshrl.u32 %v717_v51, 16  ;;  %v830_v14 = vshll.u32 %v717_v51, 16 }
 0x131   : > { %v1653_v9 = vunpack.c.l.b16 %v1362_v3  ;;  %v502_v11 = vpop.f32.mrf.mxu0  ;;  %v1366_v34 = vrot.slane %v1364_v30, 4  ;;  %v1369_v23 = vrot.slane %v1367_v4, 5  ;;  %v625_v3 = vsel %vm7128_vm2, 0, %v624_v0 }
 0x132   : > { %v829_v13 = vrot.slane %v827_v6, 7  ;;  %v503_v15 = vadd.f32 %v7170_v25, %v502_v11  ;;  %626 = vst [vmem:[#allocation2 + $0x6c] sm:$0x1] %v625_v3 }
 0x133   : > { %v1680_v16 = vpack.c.b16 %v1653_v9, %v1652_v8  ;;  %v1370_v28 = vor.u32 %v1369_v23, %v1366_v34  ;;  %v1106_v9 = vld [vmem:[#allocation2 + $0x54] sm:$0xf] }
 0x134   : > { %v832_v18 = vor.u32 %v830_v14, %v829_v13  ;;  %v566_v19 = vmax.f32 %v503_v15, 0.0  ;;  %v833_v46 = vrot.slane %v829_v13, 4 }
 0x135   : > { %1784 = vmatmul.bf16.gmra.mxu1 %v1680_v16  ;;  %v1371_v48 = vrot.slane %v1370_v28, 4 }
 0x136   : > { %v1100_v20 = vsel %vm7179_vm9, %v832_v18, %v1099_v17  ;;  %v718_v21 = vpack.c.bf16 %v566_v19, %v566_v19  ;;  %v6449_v22 = vld [vmem:[#allocation2 + $0x3c] sm:$0xff] }
 0x137   : > { %v1187_v24 = vld [vmem:[#allocation2 + $0x40] sm:$0xf]  ;;  %1101 = vst [vmem:[#allocation2 + $0x48] sm:$0xf] %v1100_v20  ;;  %v1229_v26 = vld [vmem:[#allocation2 + $0x44] sm:$0x1]  ;;  %2022 = vmatmul.bf16.gmra.mxu2 %v6449_v22 }
 0x138   : > { %v1373_v31 = vshll.u32 %v1187_v24, 16  ;;  %v1377_v32 = vshrl.u32 %v1187_v24, 16  ;;  %v835_v33 = vshrl.u32 %v718_v21, 16  ;;  %v1383_v36 = vshll.u32 %v1229_v26, 16 }
 0x139   : > { %v505_v27 = vpop.f32.mrf.mxu0  ;;  %v838_v41 = vshll.u32 %v718_v21, 16 }
 0x13a   : > { %v1375_v35 = vrot.slane %v1373_v31, 5  ;;  %v1379_v38 = vrot.slane %v1377_v32, 4  ;;  %v837_v40 = vrot.slane %v835_v33, 7  ;;  %v506_v42 = vadd.f32 %v7170_v25, %v505_v27  ;;  %v680_v31 = vld [vmem:[#allocation2 + $0x74] sm:$0x1] }
 0x13b   : > { %v1385_v56 = vrot.slane %v1383_v36, 5  ;;  %v380_v36 = vld [vmem:[%s7081_s15 + $0xf0] sm:$0xff] }
 0x13c   : > { %v1380_v50 = vor.u32 %v1379_v38, %v1375_v35  ;;  %v840_v29 = vor.u32 %v838_v41, %v837_v40  ;;  %v842_v52 = vrot.slane %v837_v40, 4  ;;  %v567_v53 = vmax.f32 %v506_v42, 0.0  ;;  %2702 = vmatmul.bf16.gmra.mxu0 %v6486_v43  ;;  %v1110_v40 = vld [vmem:[#allocation2 + $0x5c] sm:$0x1] }
 0x13d   : > { %v1376_v54 = vsel %vm7157_vm7, %v1371_v48, %v1375_v35  ;;  %v6487_v35 = vld [vmem:[#allocation2 + $0x30] sm:$0xff]  ;;  %v681_v38 = vsel %vm7139_vm4, 0, %v680_v31  ;;  %v397_v43 = vpack.c.bf16 %v381_v37, %v380_v36  ;;  %v6488_v31 = vld [vmem:[#allocation2 + $0x3c] sm:$0xff] }
 0x13e   : > { %v1381_v55 = vrot.slane %v1380_v50, 4  ;;  %v841_v57 = vsel %vm7194_vm11, %v833_v46, %v840_v29  ;;  %v1104_v58 = vsel %vm7128_vm2, %v842_v52, %v1103_v47  ;;  %v719_v59 = vpack.c.bf16 %v567_v53, %v567_v53  ;;  %v1188_v60 = vld [vmem:[#allocation2 + $0x48] sm:$0xf]  ;;  %682 = vst [vmem:[#allocation2 + $0x74] sm:$0x1] %v681_v38 }
 0x13f   : > { %1102 = vst [vmem:[#allocation2 + $0x4c] sm:$0xf] %v841_v57  ;;  %v1388_v62 = vshrl.u32 %v1188_v60, 16  ;;  %v1391_v63 = vshll.u32 %v1188_v60, 16  ;;  %v1654_v51 = vunpack.c.l.b16 %v1376_v54  ;;  %549 = vmatmul.bf16.gmra.mxu3 %v397_v43  ;;  %v627_v60 = vld [vmem:[#allocation2 + $0x78] sm:$0x1] }
 0x140   : > { %v1386_v61 = vsel %vm7157_vm7, %v1381_v55, %v1385_v56  ;;  %1105 = vst [vmem:[#allocation2 + $0x50] sm:$0x1] %v1104_v58  ;;  %v844_v1 = vshrl.u32 %v719_v59, 16  ;;  %v847_v5 = vshll.u32 %v719_v59, 16  ;;  %v628_v0 = vsel %vm7128_vm2, 0, %v627_v60 }
 0x141   : > { %v1655_v2 = vunpack.c.l.b16 %v1386_v61  ;;  %v507_v30 = vpop.f32.mrf.mxu0  ;;  %v1390_v10 = vrot.slane %v1388_v62, 4  ;;  %v1393_v11 = vrot.slane %v1391_v63, 5  ;;  %629 = vst [vmem:[#allocation2 + $0x78] sm:$0x1] %v628_v0 }
 0x142   : > { %v846_v4 = vrot.slane %v844_v1, 7  ;;  %v508_v6 = vadd.f32 %v7170_v25, %v507_v30 }
 0x143   : > { %v1681_v8 = vpack.c.b16 %v1655_v2, %v1654_v51  ;;  %v1394_v18 = vor.u32 %v1393_v11, %v1390_v10 }
 0x144   : > { %v849_v13 = vor.u32 %v847_v5, %v846_v4  ;;  %v568_v14 = vmax.f32 %v508_v6, 0.0  ;;  %v850_v45 = vrot.slane %v846_v4, 4  ;;  %v1113_v4 = vld [vmem:[#allocation2 + $0x60] sm:$0xf] }
 0x145   : > { %1789 = vmatmul.bf16.gmra.mxu1 %v1681_v8  ;;  %v1395_v41 = vrot.slane %v1394_v18, 4 }
 0x146   : > { %v1107_v15 = vsel %vm7179_vm9, %v849_v13, %v1106_v9  ;;  %v720_v16 = vpack.c.bf16 %v568_v14, %v568_v14  ;;  %v6450_v17 = vld [vmem:[#allocation2 + $0x48] sm:$0xff] }
 0x147   : > { %v1189_v34 = vld [vmem:[#allocation2 + $0x4c] sm:$0xf]  ;;  %1108 = vst [vmem:[#allocation2 + $0x54] sm:$0xf] %v1107_v15  ;;  %v1230_v23 = vld [vmem:[#allocation2 + $0x50] sm:$0x1]  ;;  %2027 = vmatmul.bf16.gmra.mxu2 %v6450_v17 }
 0x148   : > { %v1397_v19 = vshll.u32 %v1189_v34, 16  ;;  %v1401_v20 = vshrl.u32 %v1189_v34, 16  ;;  %v852_v21 = vshrl.u32 %v720_v16, 16  ;;  %v1407_v28 = vshll.u32 %v1230_v23, 16  ;;  %v7779_v39 = vld [vmem:[#allocation2 + $0x50] sm:$0x1] }
 0x149   : > { %v510_v22 = vpop.f32.mrf.mxu0  ;;  %v855_v33 = vshll.u32 %v720_v16, 16 }
 0x14a   : > { %v1399_v24 = vrot.slane %v1397_v19, 5  ;;  %v1403_v26 = vrot.slane %v1401_v20, 4  ;;  %v854_v32 = vrot.slane %v852_v21, 7  ;;  %v511_v27 = vadd.f32 %v7170_v25, %v510_v22  ;;  %v683_v22 = vld [vmem:[#allocation2 + $0x80] sm:$0x1] }
 0x14b   : > { %v1409_v52 = vrot.slane %v1407_v28, 5 }
 0x14c   : > { %v1404_v42 = vor.u32 %v1403_v26, %v1399_v24  ;;  %v857_v47 = vor.u32 %v855_v33, %v854_v32  ;;  %v859_v48 = vrot.slane %v854_v32, 4  ;;  %v569_v50 = vmax.f32 %v511_v27, 0.0  ;;  %2707 = vmatmul.bf16.gmra.mxu0 %v6487_v35  ;;  %v1117_v33 = vld [vmem:[#allocation2 + $0x68] sm:$0x1] }
 0x14d   : > { %v1400_v46 = vsel %vm7157_vm7, %v1395_v41, %v1399_v24  ;;  %v684_v32 = vsel %vm7139_vm4, 0, %v683_v22 }
 0x14e   : > { %v1405_v29 = vrot.slane %v1404_v42, 4  ;;  %v858_v53 = vsel %vm7194_vm11, %v850_v45, %v857_v47  ;;  %v1111_v54 = vsel %vm7128_vm2, %v859_v48, %v1110_v40  ;;  %v721_v55 = vpack.c.bf16 %v569_v50, %v569_v50  ;;  %v1190_v56 = vld [vmem:[#allocation2 + $0x54] sm:$0xf]  ;;  %685 = vst [vmem:[#allocation2 + $0x80] sm:$0x1] %v684_v32 }
 0x14f   : > { %1109 = vst [vmem:[#allocation2 + $0x58] sm:$0xf] %v858_v53  ;;  %v1412_v58 = vshrl.u32 %v1190_v56, 16  ;;  %v1415_v59 = vshll.u32 %v1190_v56, 16  ;;  %v1656_v62 = vunpack.c.l.b16 %v1400_v46  ;;  %v1998_v46 = vpop.f32.mrf.mxu2 }
 0x150   : > { %v1410_v57 = vsel %vm7157_vm7, %v1405_v29, %v1409_v52  ;;  %1112 = vst [vmem:[#allocation2 + $0x5c] sm:$0x1] %v1111_v54  ;;  %v861_v61 = vshrl.u32 %v721_v55, 16  ;;  %v864_v2 = vshll.u32 %v721_v55, 16  ;;  %v1765_v29 = vpop.f32.mrf.mxu1  ;;  %v630_v54 = vld [vmem:[#allocation2 + $0x84] sm:$0x1] }
 0x151   : > { %v1657_v63 = vunpack.c.l.b16 %v1410_v57  ;;  %v512_v1 = vpop.f32.mrf.mxu0  ;;  %v1414_v5 = vrot.slane %v1412_v58, 4  ;;  %v1417_v6 = vrot.slane %v1415_v59, 5  ;;  %v7331_v58 = vadd.f32 %v1998_v46, %v1765_v29  ;;  %v7352_v46 = vld [vmem:[#allocation2 + $0x10] sm:$0xf] }
 0x152   : > { %v863_v51 = vrot.slane %v861_v61, 7  ;;  %v513_v3 = vadd.f32 %v7170_v25, %v512_v1  ;;  %v631_v60 = vsel %vm7128_vm2, 0, %v630_v54 }
 0x153   : > { %v1682_v30 = vpack.c.b16 %v1657_v63, %v1656_v62  ;;  %v1418_v16 = vor.u32 %v1417_v6, %v1414_v5  ;;  %v7338_v63 = vld [vmem:[%s9157_s4] ss:$0 sm:$0xff]  ;;  %632 = vst [vmem:[#allocation2 + $0x84] sm:$0x1] %v631_v60 }
 0x154   : > { %v866_v8 = vor.u32 %v864_v2, %v863_v51  ;;  %v570_v9 = vmax.f32 %v513_v3, 0.0  ;;  %v867_v38 = vrot.slane %v863_v51, 4  ;;  %v1120_v51 = vld [vmem:[#allocation2 + $0x6c] sm:$0xf] }
 0x155   : > { %1794 = vmatmul.bf16.gmra.mxu1 %v1682_v30  ;;  %v1419_v27 = vrot.slane %v1418_v16, 4  ;;  %v6515_v16 = vld [vmem:[#allocation8 + $0x138] sm:$0xff] }
 0x156   : > { %v1114_v10 = vsel %vm7179_vm9, %v866_v8, %v1113_v4  ;;  %v722_v11 = vpack.c.bf16 %v570_v9, %v570_v9  ;;  %v6451_v13 = vld [vmem:[#allocation2 + $0x54] sm:$0xff]  ;;  %3366 = vmatpush.bf16.msrb.mxu1 %v6515_v16 }
 0x157   : > { %v1191_v14 = vld [vmem:[#allocation2 + $0x58] sm:$0xf]  ;;  %1115 = vst [vmem:[#allocation2 + $0x60] sm:$0xf] %v1114_v10  ;;  %v1231_v15 = vld [vmem:[#allocation2 + $0x5c] sm:$0x1]  ;;  %2032 = vmatmul.bf16.gmra.mxu2 %v6451_v13 }
 0x158   : > { %v1421_v17 = vshll.u32 %v1191_v14, 16  ;;  %v1425_v34 = vshrl.u32 %v1191_v14, 16  ;;  %v869_v23 = vshrl.u32 %v722_v11, 16  ;;  %v1431_v21 = vshll.u32 %v1231_v15, 16 }
 0x159   : > { %v515_v18 = vpop.f32.mrf.mxu0  ;;  %v872_v26 = vshll.u32 %v722_v11, 16 }
 0x15a   : > { %v1423_v19 = vrot.slane %v1421_v17, 5  ;;  %v1427_v20 = vrot.slane %v1425_v34, 4  ;;  %v871_v24 = vrot.slane %v869_v23, 7  ;;  %v516_v28 = vadd.f32 %v7170_v25, %v515_v18  ;;  %v686_v17 = vld [vmem:[#allocation2 + $0x8c] sm:$0x1] }
 0x15b   : > { %v1433_v43 = vrot.slane %v1431_v21, 5 }
 0x15c   : > { %v1428_v35 = vor.u32 %v1427_v20, %v1423_v19  ;;  %v874_v36 = vor.u32 %v872_v26, %v871_v24  ;;  %v876_v37 = vrot.slane %v871_v24, 4  ;;  %v571_v40 = vmax.f32 %v516_v28, 0.0  ;;  %2712 = vmatmul.bf16.gmra.mxu0 %v6488_v31  ;;  %v6489_v26 = vld [vmem:[#allocation2 + $0x48] sm:$0xff]  ;;  %v6523_v28 = vld [vmem:[#allocation8 + $0x178] sm:$0xff] }
 0x15d   : > { %v1424_v41 = vsel %vm7157_vm7, %v1419_v27, %v1423_v19  ;;  %v687_v20 = vsel %vm7139_vm4, 0, %v686_v17  ;;  %v1124_v31 = vld [vmem:[#allocation2 + $0x74] sm:$0x1]  ;;  %v2805_v27 = vld [vmem:[#allocation2 + $0xc] sm:$0xf]  ;;  %3792 = vmatpush.bf16.msrb.mxu2 %v6523_v28  ;;  %v7382_v28 = vpop.f32.mrf.mxu1 }
 0x15e   : > { %v1429_v42 = vrot.slane %v1428_v35, 4  ;;  %v875_v25 = vsel %vm7194_vm11, %v867_v38, %v874_v36  ;;  %v1118_v45 = vsel %vm7128_vm2, %v876_v37, %v1117_v33  ;;  %v723_v47 = vpack.c.bf16 %v571_v40, %v571_v40  ;;  %v1192_v48 = vld [vmem:[#allocation2 + $0x60] sm:$0xf]  ;;  %688 = vst [vmem:[#allocation2 + $0x8c] sm:$0x1] %v687_v20 }
 0x15f   : > { %1116 = vst [vmem:[#allocation2 + $0x64] sm:$0xf] %v875_v25  ;;  %v1436_v52 = vshrl.u32 %v1192_v48, 16  ;;  %v1439_v53 = vshll.u32 %v1192_v48, 16  ;;  %v1658_v56 = vunpack.c.l.b16 %v1424_v41  ;;  %v535_v48 = vpop.f32.mrf.mxu3  ;;  %v2854_v29 = vshrl.u32 %v2805_v27, 16 }
 0x160   : > { %v1434_v50 = vsel %vm7157_vm7, %v1429_v42, %v1433_v43  ;;  %1119 = vst [vmem:[#allocation2 + $0x68] sm:$0x1] %v1118_v45  ;;  %v878_v55 = vshrl.u32 %v723_v47, 16  ;;  %v881_v62 = vshll.u32 %v723_v47, 16 }
 0x161   : > { %v1659_v57 = vunpack.c.l.b16 %v1434_v50  ;;  %v517_v59 = vpop.f32.mrf.mxu0  ;;  %v1438_v2 = vrot.slane %v1436_v52, 4  ;;  %v1441_v3 = vrot.slane %v1439_v53, 5  ;;  %v6522_v50 = vld [vmem:[#allocation8 + $0x170] sm:$0xff]  ;;  %v7371_v17 = vrot.slane %v2854_v29, 4  ;;  %9188 = vst [vmem:[#allocation19_spill] sm:$0xff] %v7382_v28 }
 0x162   : > { %v880_v61 = vrot.slane %v878_v55, 7  ;;  %v518_v0 = vadd.f32 %v7338_v63, %v517_v59  ;;  %v633_v55 = vld [vmem:[#allocation2 + $0x90] sm:$0x1]  ;;  %3793 = vmatpush.bf16.msrb.mxu2 %v6522_v50 }
 0x163   : > { %v1683_v1 = vpack.c.b16 %v1659_v57, %v1658_v56  ;;  %v1442_v11 = vor.u32 %v1441_v3, %v1438_v2  ;;  %v634_v60 = vsel %vm7128_vm2, 0, %v633_v55  ;;  %v3553_v2 = vrot.slane %v7352_v46, 5  ;;  %v6514_v55 = vld [vmem:[#allocation8 + $0x130] sm:$0xff] }
 0x164   : > { %v883_v30 = vor.u32 %v881_v62, %v880_v61  ;;  %v572_v4 = vmax.f32 %v518_v0, 0.0  ;;  %v884_v35 = vrot.slane %v880_v61, 4  ;;  %v7358_v61 = vld [vmem:[#allocation2 + $0xc] sm:$0xe]  ;;  %v7360_v0 = vpop.f32.mrf.mxu2  ;;  %635 = vst [vmem:[#allocation2 + $0x90] sm:$0x1] %v634_v60  ;;  %3367 = vmatpush.bf16.msrb.mxu1 %v6514_v55 }
 0x165   : > { %1799 = vmatmul.bf16.gmra.mxu1 %v1683_v1  ;;  %v1443_v32 = vrot.slane %v1442_v11, 4  ;;  %9187 = vst [vmem:[#allocation18_spill] sm:$0xff] %v7360_v0  ;;  %v2857_v3 = vshll.u32 %v2805_v27, 16  ;;  %v536_v27 = vadd.f32 %v7338_v63, %v535_v48 }
 0x166   : > { %v1121_v5 = vsel %vm7179_vm9, %v883_v30, %v1120_v51  ;;  %v724_v6 = vpack.c.bf16 %v572_v4, %v572_v4  ;;  %v6452_v8 = vld [vmem:[#allocation2 + $0x60] sm:$0xff] }
 0x167   : > { %v1193_v9 = vld [vmem:[#allocation2 + $0x64] sm:$0xf]  ;;  %1122 = vst [vmem:[#allocation2 + $0x6c] sm:$0xf] %v1121_v5  ;;  %v1232_v10 = vld [vmem:[#allocation2 + $0x68] sm:$0x1]  ;;  %2037 = vmatmul.bf16.gmra.mxu2 %v6452_v8 }
 0x168   : > { %v1445_v13 = vshll.u32 %v1193_v9, 16  ;;  %v1449_v14 = vshrl.u32 %v1193_v9, 16  ;;  %v886_v15 = vshrl.u32 %v724_v6, 16  ;;  %v1455_v19 = vshll.u32 %v1232_v10, 16  ;;  %v6521_v8 = vld [vmem:[#allocation8 + $0x168] sm:$0xff] }
 0x169   : > { %v520_v34 = vpop.f32.mrf.mxu0  ;;  %v889_v22 = vshll.u32 %v724_v6, 16  ;;  %v7366_v9 = vld [vmem:[#allocation2 + $0x14] sm:$0x1]  ;;  %v1127_v10 = vld [vmem:[#allocation2 + $0x78] sm:$0xf]  ;;  %3794 = vmatpush.bf16.msrb.mxu2 %v6521_v8 }
 0x16a   : > { %v1447_v23 = vrot.slane %v1445_v13, 5  ;;  %v1451_v18 = vrot.slane %v1449_v14, 4  ;;  %v888_v21 = vrot.slane %v886_v15, 7  ;;  %v521_v24 = vadd.f32 %v7338_v63, %v520_v34  ;;  %v7797_v28 = vld [vmem:[#allocation2 + $0x68] sm:$0x1] }
 0x16b   : > { %v1457_v42 = vrot.slane %v1455_v19, 5  ;;  %v6174_v15 = vrot.slane %v7358_v61, 9  ;;  %v3556_v16 = vrot.slane %v7366_v9, 5  ;;  %v7373_v34 = vrot.slane %v2857_v3, 5 }
 0x16c   : > { %v1452_v33 = vor.u32 %v1451_v18, %v1447_v23  ;;  %v891_v38 = vor.u32 %v889_v22, %v888_v21  ;;  %v893_v36 = vrot.slane %v888_v21, 4  ;;  %v573_v37 = vmax.f32 %v521_v24, 0.0  ;;  %2717 = vmatmul.bf16.gmra.mxu0 %v6489_v26  ;;  %v537_v22 = vpop.f32.mrf.mxu3  ;;  %v6520_v24 = vld [vmem:[#allocation8 + $0x160] sm:$0xff] }
 0x16d   : > { %v1448_v40 = vsel %vm7157_vm7, %v1443_v32, %v1447_v23  ;;  %v7380_v26 = vrot.slane %v3553_v2, 4  ;;  %3795 = vmatpush.bf16.msrb.mxu2 %v6520_v24  ;;  %v6513_v24 = vld [vmem:[#allocation8 + $0x128] sm:$0xff] }
 0x16e   : > { %v1453_v41 = vrot.slane %v1452_v33, 4  ;;  %v892_v43 = vsel %vm7194_vm11, %v884_v35, %v891_v38  ;;  %v1125_v25 = vsel %vm7128_vm2, %v893_v36, %v1124_v31  ;;  %v725_v45 = vpack.c.bf16 %v573_v37, %v573_v37  ;;  %v1194_v47 = vld [vmem:[#allocation2 + $0x6c] sm:$0xf]  ;;  %v6490_v37 = vld [vmem:[#allocation2 + $0x54] sm:$0xff]  ;;  %3368 = vmatpush.bf16.msrb.mxu1 %v6513_v24 }
 0x16f   : > { %1123 = vst [vmem:[#allocation2 + $0x70] sm:$0xf] %v892_v43  ;;  %v1460_v53 = vshrl.u32 %v1194_v47, 16  ;;  %v1463_v54 = vshll.u32 %v1194_v47, 16  ;;  %v1660_v57 = vunpack.c.l.b16 %v1448_v40  ;;  %v538_v35 = vadd.f32 %v7338_v63, %v537_v22  ;;  %v636_v47 = vld [vmem:[#allocation2 + $0x9c] sm:$0x1] }
 0x170   : > { %v1458_v52 = vsel %vm7157_vm7, %v1453_v41, %v1457_v42  ;;  %1126 = vst [vmem:[#allocation2 + $0x74] sm:$0x1] %v1125_v25  ;;  %v895_v56 = vshrl.u32 %v725_v45, 16  ;;  %v898_v4 = vshll.u32 %v725_v45, 16  ;;  %v579_v45 = vmax.f32 %v536_v27, 0.0 }
 0x171   : > { %v1661_v59 = vunpack.c.l.b16 %v1458_v52  ;;  %v522_v62 = vpop.f32.mrf.mxu0  ;;  %v1462_v1 = vrot.slane %v1460_v53, 4  ;;  %v1465_v51 = vrot.slane %v1463_v54, 5  ;;  %v580_v50 = vmax.f32 %v538_v35, 0.0  ;;  %v689_v54 = vld [vmem:[#allocation2 + $0x98] sm:$0x1] }
 0x172   : > { %v7363_v30 = vrot.slane %v895_v56, 7  ;;  %v523_v5 = vadd.f32 %v7338_v63, %v522_v62  ;;  %v637_v48 = vsel %vm7128_vm2, 0, %v636_v47  ;;  %v1131_v56 = vld [vmem:[#allocation2 + $0x80] sm:$0x1]  ;;  %v731_v62 = vpack.c.bf16 %v579_v45, %v579_v45 }
 0x173   : > { %v1684_v6 = vpack.c.b16 %v1661_v59, %v1660_v57  ;;  %v1466_v14 = vor.u32 %v1465_v51, %v1462_v1  ;;  %638 = vst [vmem:[#allocation2 + $0x9c] sm:$0x1] %v637_v48  ;;  %v690_v1 = vsel %vm7139_vm4, 0, %v689_v54  ;;  %v6519_v51 = vld [vmem:[#allocation8 + $0x158] sm:$0xff]  ;;  %v6512_v48 = vld [vmem:[#allocation8 + $0x120] sm:$0xff] }
 0x174   : > { %v900_v11 = vor.u32 %v898_v4, %v7363_v30  ;;  %v574_v13 = vmax.f32 %v523_v5, 0.0  ;;  %v901_v23 = vrot.slane %v7363_v30, 4  ;;  %691 = vst [vmem:[#allocation2 + $0x98] sm:$0x1] %v690_v1  ;;  %v946_v8 = vshrl.u32 %v731_v62, 16  ;;  %3796 = vmatpush.bf16.msrb.mxu2 %v6519_v51  ;;  %v540_v22 = vpop.f32.mrf.mxu3  ;;  %v6517_v1 = vld [vmem:[#allocation8 + $0x148] sm:$0xff]  ;;  %3369 = vmatpush.bf16.msrb.mxu1 %v6512_v48 }
 0x175   : > { %1804 = vmatmul.bf16.gmra.mxu1 %v1684_v6  ;;  %v1467_v40 = vrot.slane %v1466_v14, 4  ;;  %v1134_v54 = vld [vmem:[#allocation2 + $0x84] sm:$0xf] }
 0x176   : > { %v1128_v18 = vsel %vm7179_vm9, %v900_v11, %v1127_v10  ;;  %v726_v19 = vpack.c.bf16 %v574_v13, %v574_v13  ;;  %v6453_v20 = vld [vmem:[#allocation2 + $0x6c] sm:$0xff]  ;;  %v949_v10 = vshll.u32 %v731_v62, 16  ;;  %v692_v11 = vld [vmem:[#allocation2 + $0xa4] sm:$0x1]  ;;  %v732_v13 = vpack.c.bf16 %v580_v50, %v580_v50  ;;  %v639_v62 = vld [vmem:[#allocation2 + $0xa8] sm:$0x1] }
 0x177   : > { %v1195_v21 = vld [vmem:[#allocation2 + $0x70] sm:$0xf]  ;;  %1129 = vst [vmem:[#allocation2 + $0x78] sm:$0xf] %v1128_v18  ;;  %v1233_v31 = vld [vmem:[#allocation2 + $0x74] sm:$0x1]  ;;  %2042 = vmatmul.bf16.gmra.mxu2 %v6453_v20 }
 0x178   : > { %v1469_v32 = vshll.u32 %v1195_v21, 16  ;;  %v1473_v33 = vshrl.u32 %v1195_v21, 16  ;;  %v903_v38 = vshrl.u32 %v726_v19, 16  ;;  %v906_v36 = vshll.u32 %v726_v19, 16 }
 0x179   : > { %v1479_v41 = vshll.u32 %v1233_v31, 16  ;;  %v525_v42 = vpop.f32.mrf.mxu0  ;;  %v693_v20 = vsel %vm7139_vm4, 0, %v692_v11  ;;  %v6518_v31 = vld [vmem:[#allocation8 + $0x150] sm:$0xff]  ;;  %v954_v27 = vshrl.u32 %v732_v13, 16  ;;  %v957_v35 = vshll.u32 %v732_v13, 16  ;;  %v6511_v11 = vld [vmem:[#allocation8 + $0x118] sm:$0xff] }
 0x17a   : > { %v1471_v43 = vrot.slane %v1469_v32, 5  ;;  %v1475_v25 = vrot.slane %v1473_v33, 4  ;;  %v905_v29 = vrot.slane %v903_v38, 7  ;;  %v526_v52 = vadd.f32 %v7338_v63, %v525_v42  ;;  %v2003_v57 = vpop.f32.mrf.mxu2  ;;  %694 = vst [vmem:[#allocation2 + $0xa4] sm:$0x1] %v693_v20  ;;  %3797 = vmatpush.bf16.msrb.mxu2 %v6518_v31  ;;  %v6516_v13 = vld [vmem:[#allocation8 + $0x140] sm:$0xff]  ;;  %3370 = vmatpush.bf16.msrb.mxu1 %v6511_v11 }
 0x17b   : > { %v1481_v53 = vrot.slane %v1479_v41, 5  ;;  %v948_v33 = vrot.slane %v946_v8, 7  ;;  %v541_v8 = vadd.f32 %v7338_v63, %v540_v22  ;;  %v640_v24 = vsel %vm7128_vm2, 0, %v639_v62 }
 0x17c   : > { %v1472_v59 = vsel %vm7157_vm7, %v1467_v40, %v1471_v43  ;;  %v1476_v60 = vor.u32 %v1475_v25, %v1471_v43  ;;  %v908_v3 = vor.u32 %v906_v36, %v905_v29  ;;  %v910_v30 = vrot.slane %v905_v29, 4  ;;  %2722 = vmatmul.bf16.gmra.mxu0 %v6490_v37  ;;  %v542_v31 = vpop.f32.mrf.mxu3  ;;  %641 = vst [vmem:[#allocation2 + $0xa8] sm:$0x1] %v640_v24 }
 0x17d   : > { %v575_v4 = vmax.f32 %v526_v52, 0.0  ;;  %v1662_v5 = vunpack.c.l.b16 %v1472_v59  ;;  %v951_v42 = vor.u32 %v949_v10, %v948_v33  ;;  %v952_v43 = vrot.slane %v948_v33, 4  ;;  %v695_v10 = vld [vmem:[#allocation2 + $0xb0] sm:$0x1] }
 0x17e   : > { %v1477_v6 = vrot.slane %v1476_v60, 4  ;;  %v909_v14 = vsel %vm7194_vm11, %v901_v23, %v908_v3  ;;  %v1132_v18 = vsel %vm7128_vm2, %v910_v30, %v1131_v56  ;;  %v1196_v21 = vld [vmem:[#allocation2 + $0x78] sm:$0xf]  ;;  %v956_v25 = vrot.slane %v954_v27, 7  ;;  %3798 = vmatpush.bf16.msrb.mxu2 %v6517_v1 }
 0x17f   : > { %v727_v19 = vpack.c.bf16 %v575_v4, %v575_v4  ;;  %1130 = vst [vmem:[#allocation2 + $0x7c] sm:$0xf] %v909_v14  ;;  %v1484_v37 = vshrl.u32 %v1196_v21, 16  ;;  %v1487_v45 = vshll.u32 %v1196_v21, 16  ;;  %v543_v27 = vadd.f32 %v7338_v63, %v542_v31 }
 0x180   : > { %v1482_v32 = vsel %vm7157_vm7, %v1477_v6, %v1481_v53  ;;  %1133 = vst [vmem:[#allocation2 + $0x80] sm:$0x1] %v1132_v18  ;;  %v1148_v53 = vld [vmem:[#allocation2 + $0x9c] sm:$0xf]  ;;  %v959_v59 = vor.u32 %v957_v35, %v956_v25  ;;  %v961_v6 = vrot.slane %v956_v25, 4 }
 0x181   : > { %v912_v23 = vshrl.u32 %v727_v19, 16  ;;  %v915_v38 = vshll.u32 %v727_v19, 16  ;;  %v1663_v36 = vunpack.c.l.b16 %v1482_v32  ;;  %v527_v40 = vpop.f32.mrf.mxu0  ;;  %v1149_v56 = vsel %vm7179_vm9, %v951_v42, %v1148_v53 }
 0x182   : > { %v1770_v41 = vpop.f32.mrf.mxu1  ;;  %v528_v50 = vadd.f32 %v7338_v63, %v527_v40  ;;  %v2005_v55 = vpop.f32.mrf.mxu2  ;;  %v1486_v60 = vrot.slane %v1484_v37, 4  ;;  %1150 = vst [vmem:[#allocation2 + $0x9c] sm:$0xf] %v1149_v56  ;;  %v1489_v30 = vrot.slane %v1487_v45, 5  ;;  %v696_v37 = vsel %vm7139_vm4, 0, %v695_v10  ;;  %3799 = vmatpush.bf16.msrb.mxu2 %v6516_v13 }
 0x183   : > { %v7401_v47 = vrot.slane %v912_v23, 7  ;;  %v7404_v29 = vadd.f32 %v2003_v57, %v1770_v41  ;;  %v1685_v52 = vpack.c.b16 %v1663_v36, %v1662_v5  ;;  %v2863_v57 = vshll.u32 %v7352_v46, 16  ;;  %v1138_v40 = vld [vmem:[#allocation2 + $0x8c] sm:$0x1]  ;;  %697 = vst [vmem:[#allocation2 + $0xb0] sm:$0x1] %v696_v37 }
 0x184   : > { %v576_v3 = vmax.f32 %v528_v50, 0.0  ;;  %v960_v5 = vsel %vm7194_vm11, %v952_v43, %v959_v59  ;;  %v1490_v21 = vor.u32 %v1489_v30, %v1486_v60  ;;  %v581_v50 = vmax.f32 %v541_v8, 0.0  ;;  %v6510_v59 = vld [vmem:[#allocation8 + $0x110] sm:$0xff]  ;;  %v642_v30 = vld [vmem:[#allocation2 + $0xb4] sm:$0x1] }
 0x185   : > { %v917_v51 = vor.u32 %v915_v38, %v7401_v47  ;;  %1809 = vmatmul.bf16.gmra.mxu1 %v1685_v52  ;;  %v918_v4 = vrot.slane %v7401_v47, 4  ;;  %1151 = vst [vmem:[#allocation2 + $0xa0] sm:$0xf] %v960_v5  ;;  %v1152_v38 = vld [vmem:[#allocation2 + $0xa4] sm:$0x1]  ;;  %v643_v31 = vsel %vm7128_vm2, 0, %v642_v30 }
 0x186   : > { %v728_v18 = vpack.c.bf16 %v576_v3, %v576_v3  ;;  %v6454_v19 = vld [vmem:[#allocation2 + $0x78] sm:$0xff]  ;;  %v1153_v43 = vsel %vm7128_vm2, %v961_v6, %v1152_v38  ;;  %v1491_v56 = vrot.slane %v1490_v21, 4  ;;  %v582_v3 = vmax.f32 %v543_v27, 0.0  ;;  %3371 = vmatpush.bf16.msrb.mxu1 %v6510_v59  ;;  %v1155_v38 = vld [vmem:[#allocation2 + $0xa8] sm:$0xf] }
 0x187   : > { %v1135_v14 = vsel %vm7179_vm9, %v917_v51, %v1134_v54  ;;  %v1197_v20 = vld [vmem:[#allocation2 + $0x7c] sm:$0xf]  ;;  %v1234_v32 = vld [vmem:[#allocation2 + $0x80] sm:$0x1]  ;;  %2047 = vmatmul.bf16.gmra.mxu2 %v6454_v19  ;;  %1154 = vst [vmem:[#allocation2 + $0xa4] sm:$0x1] %v1153_v43  ;;  %v733_v51 = vpack.c.bf16 %v581_v50, %v581_v50 }
 0x188   : > { %1136 = vst [vmem:[#allocation2 + $0x84] sm:$0xf] %v1135_v14  ;;  %v1493_v22 = vshll.u32 %v1197_v20, 16  ;;  %v1497_v33 = vshrl.u32 %v1197_v20, 16  ;;  %v920_v35 = vshrl.u32 %v728_v18, 16  ;;  %v923_v23 = vshll.u32 %v728_v18, 16 }
 0x189   : > { %v1503_v36 = vshll.u32 %v1234_v32, 16  ;;  %v530_v41 = vpop.f32.mrf.mxu0  ;;  %v6491_v54 = vld [vmem:[#allocation2 + $0x60] sm:$0xff]  ;;  %v963_v11 = vshrl.u32 %v733_v51, 16  ;;  %v966_v13 = vshll.u32 %v733_v51, 16  ;;  %v734_v14 = vpack.c.bf16 %v582_v3, %v582_v3  ;;  %644 = vst [vmem:[#allocation2 + $0xb4] sm:$0x1] %v643_v31 }
 0x18a   : > { %v1772_v42 = vpop.f32.mrf.mxu1  ;;  %v1495_v25 = vrot.slane %v1493_v22, 5  ;;  %v1499_v45 = vrot.slane %v1497_v33, 4  ;;  %v922_v52 = vrot.slane %v920_v35, 7  ;;  %v531_v53 = vadd.f32 %v7338_v63, %v530_v41  ;;  %v2008_v60 = vpop.f32.mrf.mxu2  ;;  %v6509_v18 = vld [vmem:[#allocation8 + $0x108] sm:$0xff]  ;;  %v698_v59 = vld [vmem:[#allocation2 + $0xbc] sm:$0x1] }
 0x18b   : > { %v7424_v48 = vadd.f32 %v2005_v55, %v1772_v42  ;;  %v1505_v1 = vrot.slane %v1503_v36, 5  ;;  %v965_v22 = vrot.slane %v963_v11, 7  ;;  %v971_v33 = vshrl.u32 %v734_v14, 16  ;;  %v545_v36 = vpop.f32.mrf.mxu3  ;;  %3372 = vmatpush.bf16.msrb.mxu1 %v6509_v18 }
 0x18c   : > { %v1500_v62 = vor.u32 %v1499_v45, %v1495_v25  ;;  %v925_v5 = vor.u32 %v923_v23, %v922_v52  ;;  %v927_v6 = vrot.slane %v922_v52, 4  ;;  %v577_v8 = vmax.f32 %v531_v53, 0.0  ;;  %2727 = vmatmul.bf16.gmra.mxu0 %v6491_v54  ;;  %v1159_v54 = vld [vmem:[#allocation2 + $0xb0] sm:$0x1] }
 0x18d   : > { %v1496_v10 = vsel %vm7157_vm7, %v1491_v56, %v1495_v25  ;;  %v974_v27 = vshll.u32 %v734_v14, 16  ;;  %v968_v41 = vor.u32 %v966_v13, %v965_v22  ;;  %v969_v42 = vrot.slane %v965_v22, 4  ;;  %v6508_v56 = vld [vmem:[#allocation8 + $0x100] sm:$0xff] }
 0x18e   : > { %v1501_v55 = vrot.slane %v1500_v62, 4  ;;  %v926_v19 = vsel %vm7194_vm11, %v918_v4, %v925_v5  ;;  %v1139_v20 = vsel %vm7128_vm2, %v927_v6, %v1138_v40  ;;  %v729_v21 = vpack.c.bf16 %v577_v8, %v577_v8  ;;  %v1141_v62 = vld [vmem:[#allocation2 + $0x90] sm:$0xf] }
 0x18f   : > { %v1198_v24 = vld [vmem:[#allocation2 + $0x84] sm:$0xf]  ;;  %1137 = vst [vmem:[#allocation2 + $0x88] sm:$0xf] %v926_v19  ;;  %v1664_v23 = vunpack.c.l.b16 %v1496_v10  ;;  %v973_v43 = vrot.slane %v971_v33, 7  ;;  %v1156_v51 = vsel %vm7179_vm9, %v968_v41, %v1155_v38  ;;  %v2867_v5 = vshrl.u32 %v7352_v46, 16  ;;  %3373 = vmatpush.bf16.msrb.mxu1 %v6508_v56 }
 0x190   : > { %v1506_v32 = vsel %vm7157_vm7, %v1501_v55, %v1505_v1  ;;  %1140 = vst [vmem:[#allocation2 + $0x8c] sm:$0x1] %v1139_v20  ;;  %v929_v47 = vshrl.u32 %v729_v21, 16  ;;  %v932_v35 = vshll.u32 %v729_v21, 16  ;;  %v1508_v25 = vshrl.u32 %v1198_v24, 16 }
 0x191   : > { %v1665_v4 = vunpack.c.l.b16 %v1506_v32  ;;  %v532_v37 = vpop.f32.mrf.mxu0  ;;  %v976_v3 = vor.u32 %v974_v27, %v973_v43  ;;  %v978_v30 = vrot.slane %v973_v43, 4  ;;  %1157 = vst [vmem:[#allocation2 + $0xa8] sm:$0xf] %v1156_v51  ;;  %v1511_v10 = vshll.u32 %v1198_v24, 16  ;;  %v6492_v43 = vld [vmem:[#allocation2 + $0x6c] sm:$0xff] }
 0x192   : > { %v1775_v40 = vpop.f32.mrf.mxu1  ;;  %v7438_v45 = vrot.slane %v929_v47, 7  ;;  %v533_v50 = vadd.f32 %v7338_v63, %v532_v37  ;;  %v2010_v1 = vpop.f32.mrf.mxu2  ;;  %v546_v14 = vadd.f32 %v7338_v63, %v545_v36  ;;  %v699_v18 = vsel %vm7139_vm4, 0, %v698_v59 }
 0x193   : > { %v7441_v52 = vadd.f32 %v2008_v60, %v1775_v40  ;;  %v1686_v53 = vpack.c.b16 %v1665_v4, %v1664_v23  ;;  %v1510_v60 = vrot.slane %v1508_v25, 4  ;;  %v977_v11 = vsel %vm7194_vm11, %v969_v42, %v976_v3  ;;  %v547_v38 = vpop.f32.mrf.mxu3  ;;  %700 = vst [vmem:[#allocation2 + $0xbc] sm:$0x1] %v699_v18 }
 0x194   : > { %v934_v6 = vor.u32 %v932_v35, %v7438_v45  ;;  %v578_v8 = vmax.f32 %v533_v50, 0.0  ;;  %v1160_v13 = vsel %vm7128_vm2, %v978_v30, %v1159_v54  ;;  %1158 = vst [vmem:[#allocation2 + $0xac] sm:$0xf] %v977_v11  ;;  %v1513_v31 = vrot.slane %v1511_v10, 5  ;;  %v1145_v50 = vld [vmem:[#allocation2 + $0x98] sm:$0x1] }
 0x195   : > { %1814 = vmatmul.bf16.gmra.mxu1 %v1686_v53  ;;  %v7468_v27 = vsel %vm7449_vm14, %v6174_v15, %v3553_v2  ;;  %v7475_v47 = vsel %vm7449_vm14, %v7380_v26, %v3556_v16  ;;  %1161 = vst [vmem:[#allocation2 + $0xb0] sm:$0x1] %v1160_v13  ;;  %v7479_v61 = vrot.slane %v2863_v57, 5  ;;  %v583_v40 = vmax.f32 %v546_v14, 0.0 }
 0x196   : > { %v1142_v19 = vsel %vm7179_vm9, %v934_v6, %v1141_v62  ;;  %v730_v20 = vpack.c.bf16 %v578_v8, %v578_v8  ;;  %v6455_v21 = vld [vmem:[#allocation2 + $0x84] sm:$0xff]  ;;  %v1514_v23 = vor.u32 %v1513_v31, %v1510_v60  ;;  %v548_v41 = vadd.f32 %v7338_v63, %v547_v38  ;;  %v7502_v38 = vld [vmem:[#allocation2 + $0x1c] sm:$0xf] }
 0x197   : > { %v1199_v24 = vld [vmem:[#allocation2 + $0x88] sm:$0xf]  ;;  %1143 = vst [vmem:[#allocation2 + $0x90] sm:$0xf] %v1142_v19  ;;  %v1235_v32 = vld [vmem:[#allocation2 + $0x8c] sm:$0x1]  ;;  %2052 = vmatmul.bf16.gmra.mxu2 %v6455_v21  ;;  %v735_v54 = vpack.c.bf16 %v583_v40, %v583_v40 }
 0x198   : > { %v1517_v22 = vshll.u32 %v1199_v24, 16  ;;  %v1521_v33 = vshrl.u32 %v1199_v24, 16  ;;  %v937_v35 = vshrl.u32 %v730_v20, 16  ;;  %v1527_v4 = vshll.u32 %v1235_v32, 16  ;;  %v1162_v21 = vld [vmem:[#allocation2 + $0xb4] sm:$0xf] }
 0x199   : > { %v7481_v2 = vpop.f32.mrf.mxu0  ;;  %v940_v26 = vshll.u32 %v730_v20, 16  ;;  %v2869_v25 = vrot.slane %v2867_v5, 4  ;;  %v1515_v46 = vrot.slane %v1514_v23, 4  ;;  %v584_v56 = vmax.f32 %v548_v41, 0.0 }
 0x19a   : > { %v1777_v36 = vpop.f32.mrf.mxu1  ;;  %9191 = vst [vmem:[#allocation20_spill] sm:$0xff] %v7481_v2  ;;  %v1519_v15 = vrot.slane %v1517_v22, 5  ;;  %v1523_v37 = vrot.slane %v1521_v33, 4  ;;  %v939_v16 = vrot.slane %v937_v35, 7  ;;  %v2013_v53 = vpop.f32.mrf.mxu2  ;;  %v935_v59 = vrot.slane %v7438_v45, 4 }
 0x19b   : > { %v7484_v42 = vadd.f32 %v2010_v1, %v1777_v36  ;;  %v1529_v3 = vrot.slane %v1527_v4, 5  ;;  %v980_v30 = vshrl.u32 %v735_v54, 16  ;;  %v983_v6 = vshll.u32 %v735_v54, 16  ;;  %v4231_v2 = vld [vmem:[#allocation2 + $0x24] sm:$0xf] }
 0x19c   : > { %v1524_v57 = vor.u32 %v1523_v37, %v1519_v15  ;;  %v942_v62 = vor.u32 %v940_v26, %v939_v16  ;;  %v944_v51 = vrot.slane %v939_v16, 4  ;;  %2732 = vmatmul.bf16.gmra.mxu0 %v6492_v43  ;;  %v1520_v63 = vsel %vm7157_vm7, %v1515_v46, %v1519_v15 }
 0x19d   : > { %v736_v60 = vpack.c.bf16 %v584_v56, %v584_v56  ;;  %v2870_v45 = vor.u32 %v2869_v25, %v7479_v61  ;;  %v982_v13 = vrot.slane %v980_v30, 7  ;;  %v1666_v19 = vunpack.c.l.b16 %v1520_v63 }
 0x19e   : > { %v1525_v1 = vrot.slane %v1524_v57, 4  ;;  %v943_v5 = vsel %vm7194_vm11, %v935_v59, %v942_v62  ;;  %v1146_v8 = vsel %vm7128_vm2, %v944_v51, %v1145_v50  ;;  %v1200_v10 = vld [vmem:[#allocation2 + $0x90] sm:$0xf]  ;;  %v3681_v33 = vunpack.c.l.b16 %v7475_v47  ;;  %v1166_v47 = vld [vmem:[#allocation2 + $0xbc] sm:$0x1] }
 0x19f   : > { %1144 = vst [vmem:[#allocation2 + $0x94] sm:$0xf] %v943_v5  ;;  %v1532_v14 = vshrl.u32 %v1200_v10, 16  ;;  %v1535_v18 = vshll.u32 %v1200_v10, 16  ;;  %v988_v24 = vshrl.u32 %v736_v60, 16  ;;  %v991_v31 = vshll.u32 %v736_v60, 16 }
 0x1a0   : > { %v1530_v11 = vsel %vm7157_vm7, %v1525_v1, %v1529_v3  ;;  %1147 = vst [vmem:[#allocation2 + $0x98] sm:$0x1] %v1146_v8  ;;  %v985_v35 = vor.u32 %v983_v6, %v982_v13  ;;  %v2860_v23 = vor.u32 %v7373_v34, %v7371_v17  ;;  %v2873_v4 = vshll.u32 %v7366_v9, 16  ;;  %v2808_v50 = vld [vmem:[#allocation2 + $0x18] sm:$0xf] }
 0x1a1   : > { %v1667_v20 = vunpack.c.l.b16 %v1530_v11  ;;  %v7496_v22 = vpop.f32.mrf.mxu0  ;;  %v986_v37 = vrot.slane %v982_v13, 4  ;;  %v990_v40 = vrot.slane %v988_v24, 7  ;;  %v3680_v16 = vunpack.c.l.b16 %v7468_v27  ;;  %v1202_v3 = vld [vmem:[#allocation2 + $0x9c] sm:$0xf]  ;;  %v3488_v8 = vld [vmem:[#allocation2 + $0x18] sm:$0xe] }
 0x1a2   : > { %v1780_v32 = vpop.f32.mrf.mxu1  ;;  %9192 = vst [vmem:[#allocation21_spill] sm:$0xff] %v7496_v22  ;;  %v2015_v41 = vpop.f32.mrf.mxu2  ;;  %v1163_v26 = vsel %vm7179_vm9, %v985_v35, %v1162_v21  ;;  %v1534_v43 = vrot.slane %v1532_v14, 4  ;;  %v1537_v25 = vrot.slane %v1535_v18, 5  ;;  %v2871_v34 = vrot.slane %v2870_v45, 4  ;;  %v1203_v45 = vld [vmem:[#allocation2 + $0xa0] sm:$0xf] }
 0x1a3   : > { %v7504_v36 = vadd.f32 %v2013_v53, %v1780_v32  ;;  %v1687_v15 = vpack.c.b16 %v1667_v20, %v1666_v19  ;;  %1164 = vst [vmem:[#allocation2 + $0xb4] sm:$0xf] %v1163_v26  ;;  %v993_v9 = vor.u32 %v991_v31, %v990_v40  ;;  %v995_v17 = vrot.slane %v990_v40, 4  ;;  %v2810_v24 = vld [vmem:[#allocation2 + $0x20] sm:$0x1] }
 0x1a4   : > { %v2887_v53 = vshll.u32 %v7502_v38, 16  ;;  %v3712_v46 = vpack.c.b16 %v3681_v33, %v3680_v16  ;;  %v2861_v57 = vrot.slane %v2860_v23, 4  ;;  %v2875_v54 = vrot.slane %v2873_v4, 5  ;;  %v6493_v33 = vld [vmem:[#allocation2 + $0x78] sm:$0xff] }
 0x1a5   : > { %1819 = vmatmul.bf16.gmra.mxu1 %v1687_v15  ;;  %v2891_v56 = vshrl.u32 %v7502_v38, 16  ;;  %v994_v27 = vsel %vm7194_vm11, %v986_v37, %v993_v9  ;;  %v1167_v59 = vsel %vm7128_vm2, %v995_v17, %v1166_v47  ;;  %v3560_v51 = vrot.slane %v7502_v38, 5  ;;  %v4228_v22 = vld [vmem:[#allocation2 + $0x18] sm:$0xf] }
 0x1a6   : > { %v1201_v62 = vld [vmem:[#allocation2 + $0x94] sm:$0xf]  ;;  %v2878_v63 = vshrl.u32 %v2808_v50, 16  ;;  %1165 = vst [vmem:[#allocation2 + $0xb8] sm:$0xf] %v994_v27  ;;  %v1538_v30 = vor.u32 %v1537_v25, %v1534_v43  ;;  %v2866_v60 = vsel %vm7157_vm7, %v2861_v57, %v7479_v61  ;;  %v2876_v10 = vsel %vm7157_vm7, %v2871_v34, %v2875_v54 }
 0x1a7   : > { %v1236_v1 = vld [vmem:[#allocation2 + $0x98] sm:$0x1]  ;;  %v1541_v6 = vshll.u32 %v1201_v62, 16  ;;  %v1545_v5 = vshrl.u32 %v1201_v62, 16  ;;  %3800 = vmatmul.bf16.vlgmr.msrb.gmra.mxu2 %v3712_v46  ;;  %1168 = vst [vmem:[#allocation2 + $0xbc] sm:$0x1] %v1167_v59  ;;  %v3255_v17 = vunpack.c.l.b16 %v2876_v10 }
 0x1a8   : > { %v2881_v11 = vshll.u32 %v2808_v50, 16  ;;  %v7521_v13 = vrot.slane %v2887_v53, 5  ;;  %v1551_v21 = vshll.u32 %v1236_v1, 16  ;;  %v2893_v31 = vrot.slane %v2891_v56, 4 }
 0x1a9   : > { %v7523_v18 = vpop.f32.mrf.mxu0  ;;  %v1543_v19 = vrot.slane %v1541_v6, 5  ;;  %v1547_v20 = vrot.slane %v1545_v5, 4  ;;  %v3562_v35 = vrot.slane %v3560_v51, 4  ;;  %v1556_v61 = vshrl.u32 %v1202_v3, 16 }
 0x1aa   : > { %v1782_v14 = vpop.f32.mrf.mxu1  ;;  %9193 = vst [vmem:[#allocation22_spill] sm:$0xff] %v7523_v18  ;;  %v1559_v23 = vshll.u32 %v1202_v3, 16  ;;  %v2018_v4 = vpop.f32.mrf.mxu2  ;;  %v1539_v38 = vrot.slane %v1538_v30, 4  ;;  %v1565_v37 = vshll.u32 %v1203_v45, 16  ;;  %v1569_v40 = vshrl.u32 %v1203_v45, 16 }
 0x1ab   : > { %v7525_v32 = vadd.f32 %v2015_v41, %v1782_v14  ;;  %v1548_v15 = vor.u32 %v1547_v20, %v1543_v19  ;;  %v6175_v16 = vrot.slane %v3488_v8, 9  ;;  %v3563_v26 = vrot.slane %v2810_v24, 5  ;;  %v2811_v20 = vld [vmem:[#allocation2 + $0x24] sm:$0xf] }
 0x1ac   : > { %2737 = vmatmul.bf16.gmra.mxu0 %v6493_v33  ;;  %v2880_v47 = vrot.slane %v2878_v63, 4  ;;  %v2883_v43 = vrot.slane %v2881_v11, 5  ;;  %v1544_v25 = vsel %vm7157_vm7, %v1539_v38, %v1543_v19  ;;  %v1553_v41 = vrot.slane %v1551_v21, 5  ;;  %v1237_v63 = vld [vmem:[#allocation2 + $0xa4] sm:$0x1] }
 0x1ad   : > { %v1549_v50 = vrot.slane %v1548_v15, 4  ;;  %v2894_v9 = vor.u32 %v2893_v31, %v7521_v13  ;;  %v3564_v34 = vsel %vm7449_vm14, %v3562_v35, %v3563_v26  ;;  %v1558_v53 = vrot.slane %v1556_v61, 4  ;;  %v2812_v19 = vld [vmem:[#allocation2 + $0x28] sm:$0xf] }
 0x1ae   : > { %v2897_v46 = vshll.u32 %v2810_v24, 16  ;;  %v1561_v54 = vrot.slane %v1559_v23, 5  ;;  %v7534_v56 = vrot.slane %v1565_v37, 5  ;;  %v1571_v27 = vrot.slane %v1569_v40, 4  ;;  %v1204_v15 = vld [vmem:[#allocation2 + $0xa8] sm:$0xf] }
 0x1af   : > { %v1554_v57 = vsel %vm7157_vm7, %v1549_v50, %v1553_v41  ;;  %v1668_v59 = vunpack.c.l.b16 %v1544_v25  ;;  %v3254_v3 = vunpack.c.l.b16 %v2866_v60  ;;  %v3561_v6 = vsel %vm7449_vm14, %v6175_v16, %v3560_v51  ;;  %v1205_v37 = vld [vmem:[#allocation2 + $0xac] sm:$0xf] }
 0x1b0   : > { %v1669_v62 = vunpack.c.l.b16 %v1554_v57  ;;  %v2884_v5 = vor.u32 %v2883_v43, %v2880_v47  ;;  %v2895_v8 = vrot.slane %v2894_v9, 4  ;;  %v3683_v14 = vunpack.c.l.b16 %v3564_v34  ;;  %v3489_v9 = vld [vmem:[#allocation2 + $0x24] sm:$0xe] }
 0x1b1   : > { %v7536_v30 = vpop.f32.mrf.mxu0  ;;  %v3286_v11 = vpack.c.b16 %v3255_v17, %v3254_v3  ;;  %v1562_v24 = vor.u32 %v1561_v54, %v1558_v53  ;;  %v1572_v60 = vor.u32 %v1571_v27, %v7534_v56  ;;  %v1575_v31 = vshll.u32 %v1237_v63, 16  ;;  %v7550_v53 = vld [vmem:[#allocation2 + $0x2c] sm:$0x1] }
 0x1b2   : > { %v1785_v1 = vpop.f32.mrf.mxu1  ;;  %9194 = vst [vmem:[#allocation23_spill] sm:$0xff] %v7536_v30  ;;  %v1688_v45 = vpack.c.b16 %v1669_v62, %v1668_v59  ;;  %v2020_v21 = vpop.f32.mrf.mxu2  ;;  %v2899_v33 = vrot.slane %v2897_v46, 5  ;;  %v3682_v35 = vunpack.c.l.b16 %v3561_v6  ;;  %v2885_v61 = vrot.slane %v2884_v5, 4  ;;  %v6494_v62 = vld [vmem:[#allocation2 + $0x84] sm:$0xff] }
 0x1b3   : > { %v7540_v10 = vadd.f32 %v2018_v4, %v1785_v1  ;;  %v3567_v23 = vrot.slane %v2812_v19, 5  ;;  %v2902_v4 = vshrl.u32 %v2811_v20, 16  ;;  %v2905_v40 = vshll.u32 %v2811_v20, 16  ;;  %v2814_v20 = vld [vmem:[#allocation2 + $0x30] sm:$0xf] }
 0x1b4   : > { %1824 = vmatmul.bf16.vlgmr.msrb.gmra.mxu3 %v1688_v45  ;;  %v2900_v51 = vsel %vm7157_vm7, %v2895_v8, %v2899_v33  ;;  %v3713_v38 = vpack.c.b16 %v3683_v14, %v3682_v35  ;;  %v2911_v16 = vshll.u32 %v2812_v19, 16  ;;  %v1563_v26 = vrot.slane %v1562_v24, 4  ;;  %v2815_v33 = vld [vmem:[#allocation2 + $0x34] sm:$0xf] }
 0x1b5   : > { %3374 = vmatmul.bf16.vlgmr.msrb.gmra.mxu1 %v3286_v11  ;;  %v1573_v47 = vrot.slane %v1572_v60, 4  ;;  %v1577_v43 = vrot.slane %v1575_v31, 5  ;;  %v2915_v25 = vshrl.u32 %v2812_v19, 16  ;;  %v2890_v50 = vsel %vm7157_vm7, %v2885_v61, %v7521_v13 }
 0x1b6   : > { %v3257_v41 = vunpack.c.l.b16 %v2900_v51  ;;  %v1580_v46 = vshrl.u32 %v1204_v15, 16  ;;  %v1583_v57 = vshll.u32 %v1204_v15, 16  ;;  %v1589_v54 = vshll.u32 %v1205_v37, 16  ;;  %v1238_v51 = vld [vmem:[#allocation2 + $0xb0] sm:$0x1] }
 0x1b7   : > { %3805 = vmatmul.bf16.gmra.mxu2 %v3713_v38  ;;  %v1593_v27 = vshrl.u32 %v1205_v37, 16  ;;  %v3569_v3 = vrot.slane %v3567_v23, 4  ;;  %v2904_v63 = vrot.slane %v2902_v4, 4  ;;  %v2907_v1 = vrot.slane %v2905_v40, 5  ;;  %v3490_v40 = vld [vmem:[#allocation2 + $0x30] sm:$0xe] }
 0x1b8   : > { %v1568_v13 = vsel %vm7157_vm7, %v1563_v26, %v7534_v56  ;;  %v1578_v5 = vsel %vm7157_vm7, %v1573_v47, %v1577_v43  ;;  %v7559_v8 = vrot.slane %v2911_v16, 5  ;;  %v2917_v45 = vrot.slane %v2915_v25, 4 }
 0x1b9   : > { %v7548_v34 = vpop.f32.mrf.mxu0  ;;  %v3256_v11 = vunpack.c.l.b16 %v2890_v50  ;;  %v6176_v14 = vrot.slane %v3489_v9, 9  ;;  %v3570_v19 = vrot.slane %v7550_v53, 5  ;;  %v1585_v24 = vrot.slane %v1583_v57, 5 }
 0x1ba   : > { %v1787_v17 = vpop.f32.mrf.mxu1  ;;  %9195 = vst [vmem:[#allocation24_spill] sm:$0xff] %v7548_v34  ;;  %v2023_v6 = vpop.f32.mrf.mxu2  ;;  %v7562_v60 = vrot.slane %v1589_v54, 5  ;;  %v1595_v31 = vrot.slane %v1593_v27, 4  ;;  %v1670_v35 = vunpack.c.l.b16 %v1568_v13  ;;  %v1671_v56 = vunpack.c.l.b16 %v1578_v5  ;;  %v2816_v13 = vld [vmem:[#allocation2 + $0x38] sm:$0x1] }
 0x1bb   : > { %v7552_v59 = vadd.f32 %v2020_v21, %v1787_v17  ;;  %v1582_v21 = vrot.slane %v1580_v46, 4  ;;  %v3287_v61 = vpack.c.b16 %v3257_v41, %v3256_v11  ;;  %v3568_v4 = vsel %vm7449_vm14, %v6176_v14, %v3567_v23 }
 0x1bc   : > { %2742 = vmatmul.bf16.gmra.mxu0 %v6494_v62  ;;  %v3571_v38 = vsel %vm7449_vm14, %v3569_v3, %v3570_v19  ;;  %v2908_v15 = vor.u32 %v2907_v1, %v2904_v63  ;;  %v2918_v37 = vor.u32 %v2917_v45, %v7559_v8  ;;  %v3574_v16 = vrot.slane %v2815_v33, 5 }
 0x1bd   : > { %9196 = vst [vmem:[#allocation25_spill] sm:$0xff] %v7552_v59  ;;  %v2926_v26 = vshrl.u32 %v2814_v20, 16  ;;  %v2935_v47 = vshll.u32 %v2815_v33, 16  ;;  %v2939_v43 = vshrl.u32 %v2815_v33, 16  ;;  %v1586_v9 = vor.u32 %v1585_v24, %v1582_v21 }
 0x1be   : > { %v1596_v41 = vor.u32 %v1595_v31, %v7562_v60  ;;  %v1599_v17 = vshll.u32 %v1238_v51, 16  ;;  %v2929_v46 = vshll.u32 %v2814_v20, 16  ;;  %v1689_v57 = vpack.c.b16 %v1671_v56, %v1670_v35  ;;  %v1206_v35 = vld [vmem:[#allocation2 + $0xb4] sm:$0xf]  ;;  %v1207_v51 = vld [vmem:[#allocation2 + $0xb8] sm:$0xf] }
 0x1bf   : > { %v3685_v54 = vunpack.c.l.b16 %v3571_v38  ;;  %v2921_v27 = vshll.u32 %v7550_v53, 16  ;;  %v3684_v3 = vunpack.c.l.b16 %v3568_v4  ;;  %v2909_v63 = vrot.slane %v2908_v15, 4 }
 0x1c0   : > { %v2919_v1 = vrot.slane %v2918_v37, 4  ;;  %v6177_v5 = vrot.slane %v3490_v40, 9  ;;  %v3576_v45 = vrot.slane %v3574_v16, 4  ;;  %v2928_v11 = vrot.slane %v2926_v26, 4 }
 0x1c1   : > { %v7569_v50 = vpop.f32.mrf.mxu0  ;;  %v7575_v14 = vrot.slane %v2935_v47, 5  ;;  %v2941_v19 = vrot.slane %v2939_v43, 4  ;;  %v1587_v20 = vrot.slane %v1586_v9, 4  ;;  %v1601_v21 = vrot.slane %v1599_v17, 5 }
 0x1c2   : > { %v1790_v25 = vpop.f32.mrf.mxu1  ;;  %9197 = vst [vmem:[#allocation26_spill] sm:$0xff] %v7569_v50  ;;  %v2025_v62 = vpop.f32.mrf.mxu2  ;;  %v2931_v24 = vrot.slane %v2929_v46, 5  ;;  %v3714_v31 = vpack.c.b16 %v3685_v54, %v3684_v3  ;;  %v2923_v33 = vrot.slane %v2921_v27, 5  ;;  %v3577_v53 = vrot.slane %v2816_v13, 5  ;;  %v645_v54 = vld [vmem:[#allocation2 + $0xc0] sm:$0x1] }
 0x1c3   : > { %v7572_v23 = vadd.f32 %v2023_v6, %v1790_v25  ;;  %v1597_v6 = vrot.slane %v1596_v41, 4  ;;  %v2914_v56 = vsel %vm7157_vm7, %v2909_v63, %v7559_v8  ;;  %v2942_v15 = vor.u32 %v2941_v19, %v7575_v14  ;;  %v7598_v25 = vld [vmem:[#allocation2 + $0x40] sm:$0xf]  ;;  %v6495_v41 = vld [vmem:[#allocation2 + $0x90] sm:$0xff] }
 0x1c4   : > { %1829 = vmatmul.bf16.gmra.mxu3 %v1689_v57  ;;  %v2924_v4 = vsel %vm7157_vm7, %v2919_v1, %v2923_v33  ;;  %v7588_v38 = vsel %vm7449_vm14, %v3576_v45, %v3577_v53  ;;  %v2945_v37 = vshll.u32 %v2816_v13, 16  ;;  %v1592_v8 = vsel %vm7157_vm7, %v1587_v20, %v7562_v60  ;;  %v7602_v1 = vld [vmem:[#allocation2 + $0x3c] sm:$0xe]  ;;  %v7608_v45 = vld [vmem:[#allocation2 + $0x44] sm:$0x1] }
 0x1c5   : > { %9198 = vst [vmem:[#allocation27_spill] sm:$0xff] %v7572_v23  ;;  %3379 = vmatmul.bf16.gmra.mxu1 %v3287_v61  ;;  %v7582_v61 = vsel %vm7449_vm14, %v6177_v5, %v3574_v16  ;;  %v1602_v16 = vsel %vm7157_vm7, %v1597_v6, %v1601_v21  ;;  %v1604_v47 = vshrl.u32 %v1206_v35, 16  ;;  %v2932_v43 = vor.u32 %v2931_v24, %v2928_v11  ;;  %v7611_v24 = vld [vmem:[#allocation2 + $0x3c] sm:$0xf] }
 0x1c6   : > { %v1607_v17 = vshll.u32 %v1206_v35, 16  ;;  %v1613_v46 = vshll.u32 %v1207_v51, 16  ;;  %v1617_v57 = vshrl.u32 %v1207_v51, 16  ;;  %v3258_v3 = vunpack.c.l.b16 %v2914_v56  ;;  %v1239_v51 = vld [vmem:[#allocation2 + $0xbc] sm:$0x1] }
 0x1c7   : > { %3810 = vmatmul.bf16.gmra.mxu2 %v3714_v31  ;;  %v3259_v63 = vunpack.c.l.b16 %v2924_v4  ;;  %v646_v60 = vsel %vm7128_vm2, 0, %v645_v54  ;;  %v3686_v13 = vunpack.c.l.b16 %v7582_v61  ;;  %v3687_v5 = vunpack.c.l.b16 %v7588_v38  ;;  %v7613_v31 = vld [vmem:[#allocation2 + $0x1c] sm:$0xf] }
 0x1c8   : > { %v9161_v11 = vrot.slane %v7598_v25, 5  ;;  %647 = vst [vmem:[#allocation2 + $0xc0] sm:$0x1] %v646_v60  ;;  %v1672_v19 = vunpack.c.l.b16 %v1592_v8  ;;  %v1673_v20 = vunpack.c.l.b16 %v1602_v16  ;;  %v2933_v6 = vrot.slane %v2932_v43, 4  ;;  %v550_v8 = vpop.f32.mrf.mxu3  ;;  %v701_v16 = vld [vmem:[#allocation2 + $0xc8] sm:$0x1] }
 0x1c9   : > { %v7591_v26 = vpop.f32.mrf.mxu0  ;;  %v2947_v21 = vrot.slane %v2945_v37, 5  ;;  %v1606_v33 = vrot.slane %v1604_v47, 4  ;;  %v1609_v53 = vrot.slane %v1607_v17, 5  ;;  %v7615_v35 = vrot.slane %v1613_v46, 5  ;;  %v4910_v47 = vld [vmem:[#allocation2 + $0x18] sm:$0xe] }
 0x1ca   : > { %v1792_v40 = vpop.f32.mrf.mxu1  ;;  %9199 = vst [vmem:[#allocation28_spill] sm:$0xff] %v7591_v26  ;;  %v2028_v27 = vpop.f32.mrf.mxu2  ;;  %v1619_v56 = vrot.slane %v1617_v57, 4  ;;  %v3288_v61 = vpack.c.b16 %v3259_v63, %v3258_v3  ;;  %v2938_v4 = vsel %vm7157_vm7, %v2933_v6, %v7575_v14  ;;  %v4976_v43 = vrot.slane %v7613_v31, 5  ;;  %v6685_v46 = vld [vmem:[%s9157_s4] ss:$0 sm:$0xff] }
 0x1cb   : > { %v7600_v9 = vadd.f32 %v2025_v62, %v1792_v40  ;;  %v2943_v62 = vrot.slane %v2942_v15, 4  ;;  %v7626_v40 = vrot.slane %v9161_v11, 4  ;;  %v1690_v14 = vpack.c.b16 %v1673_v20, %v1672_v19  ;;  %v7637_v63 = vld [vmem:[#allocation2 + $0x20] sm:$0x1]  ;;  %v7642_v15 = vld [vmem:[#allocation2 + $0x28] sm:$0xf] }
 0x1cc   : > { %2747 = vmatmul.bf16.gmra.mxu0 %v6495_v41  ;;  %v551_v57 = vadd.f32 %v6685_v46, %v550_v8  ;;  %v2959_v3 = vshll.u32 %v7598_v25, 16  ;;  %v1620_v6 = vor.u32 %v1619_v56, %v7615_v35  ;;  %v702_v8 = vsel %vm7139_vm4, 0, %v701_v16  ;;  %v4911_v56 = vld [vmem:[#allocation2 + $0x24] sm:$0xe] }
 0x1cd   : > { %9200 = vst [vmem:[#allocation29_spill] sm:$0xff] %v7600_v9  ;;  %v2948_v37 = vsel %vm7157_vm7, %v2943_v62, %v2947_v21  ;;  %v1610_v62 = vor.u32 %v1609_v53, %v1606_v33  ;;  %v1623_v21 = vshll.u32 %v1239_v51, 16  ;;  %v6350_v38 = vrot.slane %v4910_v47, 9  ;;  %v6483_v33 = vld [vmem:[#allocation8 + $0xb8] sm:$0xff] }
 0x1ce   : > { %v585_v20 = vmax.f32 %v551_v57, 0.0  ;;  %v4978_v54 = vrot.slane %v4976_v43, 4  ;;  %v3715_v11 = vpack.c.b16 %v3687_v5, %v3686_v13  ;;  %703 = vst [vmem:[#allocation2 + $0xc8] sm:$0x1] %v702_v8  ;;  %v4979_v53 = vrot.slane %v7637_v63, 5  ;;  %2370 = vmatpush.bf16.msrb.mxu3 %v6483_v33 }
 0x1cf   : > { %v7652_v57 = vld [vmem:[#allocation2 + $0x2c] sm:$0x1]  ;;  %v4977_v16 = vsel %vm7449_vm14, %v6350_v38, %v4976_v43  ;;  %v1611_v13 = vrot.slane %v1610_v62, 4  ;;  %v1621_v5 = vrot.slane %v1620_v6, 4  ;;  %v4912_v47 = vld [vmem:[#allocation2 + $0x30] sm:$0xe] }
 0x1d0   : > { %v737_v51 = vpack.c.bf16 %v585_v20, %v585_v20  ;;  %v7659_v20 = vld [vmem:[#allocation2 + $0x34] sm:$0xf]  ;;  %v6351_v26 = vrot.slane %v4911_v56, 9  ;;  %v552_v50 = vpop.f32.mrf.mxu3  ;;  %v7661_v34 = vrot.slane %v2959_v3, 5  ;;  %v5103_v38 = vunpack.c.l.b16 %v4977_v16  ;;  %v1169_v56 = vld [vmem:[#allocation2 + $0xc0] sm:$0xf] }
 0x1d1   : > { %v7630_v17 = vpop.f32.mrf.mxu0  ;;  %v4986_v62 = vrot.slane %v7652_v57, 5  ;;  %v553_v33 = vadd.f32 %v6685_v46, %v552_v50  ;;  %v7672_v3 = vld [vmem:[#allocation2 + $0x38] sm:$0x1]  ;;  %v9207_v49 = vrot.slane %v7608_v45, 5 }
 0x1d2   : > { %v1795_v41 = vpop.f32.mrf.mxu1  ;;  %9201 = vst [vmem:[#allocation30_spill] sm:$0xff] %v7630_v17  ;;  %v2030_v19 = vpop.f32.mrf.mxu2  ;;  %v7646_v17 = vunpack.c.l.b16 %v2938_v4  ;;  %v1625_v4 = vrot.slane %v1623_v21, 5  ;;  %v1000_v8 = vshll.u32 %v737_v51, 16 }
 0x1d3   : > { %v7639_v60 = vadd.f32 %v2028_v27, %v1795_v41  ;;  %v7648_v27 = vunpack.c.l.b16 %v2948_v37  ;;  %v2963_v41 = vshrl.u32 %v7598_v25, 16  ;;  %v4980_v37 = vsel %vm7449_vm14, %v4978_v54, %v4979_v53 }
 0x1d4   : > { %1834 = vmatmul.bf16.gmra.mxu3 %v1690_v14  ;;  %v997_v14 = vshrl.u32 %v737_v51, 16  ;;  %v5104_v44 = vunpack.c.l.b16 %v4980_v37  ;;  %v6352_v53 = vrot.slane %v4912_v47, 9  ;;  %v1626_v46 = vsel %vm7157_vm7, %v1621_v5, %v1625_v4  ;;  %v6482_v47 = vld [vmem:[#allocation8 + $0xb0] sm:$0xff] }
 0x1d5   : > { %9202 = vst [vmem:[#allocation31_spill] sm:$0xff] %v7639_v60  ;;  %3384 = vmatmul.bf16.gmra.mxu1 %v3288_v61  ;;  %v4983_v61 = vrot.slane %v7642_v15, 5  ;;  %2371 = vmatpush.bf16.msrb.mxu3 %v6482_v47  ;;  %v1675_v4 = vunpack.c.l.b16 %v1626_v46  ;;  %v9209_v47 = vshll.u32 %v7611_v24, 16 }
 0x1d6   : > { %v7664_v21 = vrot.slane %v997_v14, 7  ;;  %v7674_v16 = vpack.c.b16 %v5104_v44, %v5103_v38  ;;  %v4990_v14 = vrot.slane %v7659_v20, 5  ;;  %v2965_v44 = vrot.slane %v2963_v41, 4  ;;  %v6555_v38 = vld [vmem:[#allocation8 + $0x1f8] sm:$0xff] }
 0x1d7   : > { %3815 = vmatmul.bf16.gmra.mxu2 %v3715_v11  ;;  %v4985_v43 = vrot.slane %v4983_v61, 4  ;;  %v4984_v54 = vsel %vm7449_vm14, %v6351_v26, %v4983_v61  ;;  %v6496_v11 = vld [vmem:[#allocation2 + $0x9c] sm:$0xff]  ;;  %v1616_v26 = vsel %vm7157_vm7, %v1611_v13, %v7615_v35  ;;  %v586_v61 = vmax.f32 %v553_v33, 0.0  ;;  %4789 = vmatpush.bf16.msra.mxu0 %v6555_v38 }
 0x1d8   : > { %v4992_v35 = vrot.slane %v4990_v14, 4  ;;  %v4993_v13 = vrot.slane %v7672_v3, 5  ;;  %v1674_v5 = vunpack.c.l.b16 %v1616_v26  ;;  %v9206_v41 = vrot.slane %v7602_v1, 9 }
 0x1d9   : > { %v7670_v37 = vpop.f32.mrf.mxu0  ;;  %v4987_v30 = vsel %vm7449_vm14, %v4985_v43, %v4986_v62  ;;  %v4991_v43 = vsel %vm7449_vm14, %v6352_v53, %v4990_v14  ;;  %v738_v18 = vpack.c.bf16 %v586_v61, %v586_v61  ;;  %v3289_v1 = vpack.c.b16 %v7648_v27, %v7646_v17  ;;  %v6554_v17 = vld [vmem:[#allocation8 + $0x1f0] sm:$0xff] }
 0x1da   : > { %v1797_v6 = vpop.f32.mrf.mxu1  ;;  %9204 = vst [vmem:[#allocation33_spill] sm:$0xff] %v7670_v37  ;;  %v2033_v50 = vpop.f32.mrf.mxu2  ;;  %v5106_v37 = vunpack.c.l.b16 %v4987_v30  ;;  %v5107_v26 = vunpack.c.l.b16 %v4991_v43 }
 0x1db   : > { %v7668_v51 = vadd.f32 %v2030_v19, %v1797_v6  ;;  %v1002_v19 = vor.u32 %v1000_v8, %v7664_v21  ;;  %v5105_v6 = vunpack.c.l.b16 %v4984_v54  ;;  %v9205_v8 = vrot.slane %v7598_v25, 5  ;;  %4790 = vmatpush.bf16.msra.mxu0 %v6554_v17 }
 0x1dc   : > { %2752 = vmatmul.bf16.gmra.mxu0 %v6496_v11  ;;  %v3585_v54 = vsel %vm7449_vm14, %v7626_v40, %v9207_v49  ;;  %v1005_v53 = vshrl.u32 %v738_v18, 16  ;;  %v1008_v11 = vshll.u32 %v738_v18, 16  ;;  %v4994_v25 = vsel %vm7449_vm14, %v4992_v35, %v4993_v13  ;;  %v1173_v35 = vld [vmem:[#allocation2 + $0xc8] sm:$0x1]  ;;  %v2821_v49 = vld [vmem:[#allocation2 + $0x4c] sm:$0xf] }
 0x1dd   : > { %9203 = vst [vmem:[#allocation32_spill] sm:$0xff] %v7668_v51  ;;  %v1170_v62 = vsel %vm7179_vm9, %v1002_v19, %v1169_v56  ;;  %v3582_v30 = vsel %vm7449_vm14, %v9206_v41, %v9205_v8  ;;  %v7696_v33 = vpack.c.b16 %v5106_v37, %v5105_v6  ;;  %v9208_v56 = vshrl.u32 %v7611_v24, 16 }
 0x1de   : > { %1171 = vst [vmem:[#allocation2 + $0xc0] sm:$0xf] %v1170_v62  ;;  %v5108_v37 = vunpack.c.l.b16 %v4994_v25  ;;  %v1003_v19 = vrot.slane %v7664_v21, 4  ;;  %v1007_v61 = vrot.slane %v1005_v53, 7  ;;  %v2955_v40 = vrot.slane %v9209_v47, 5  ;;  %v6553_v53 = vld [vmem:[#allocation8 + $0x1e8] sm:$0xff] }
 0x1df   : > { %v2952_v14 = vrot.slane %v9208_v56, 4  ;;  %v2966_v18 = vor.u32 %v2965_v44, %v7661_v34  ;;  %v1691_v6 = vpack.c.b16 %v1675_v4, %v1674_v5  ;;  %v3689_v62 = vunpack.c.l.b16 %v3585_v54  ;;  %v6481_v44 = vld [vmem:[#allocation8 + $0xa8] sm:$0xff]  ;;  %v4913_v56 = vld [vmem:[#allocation2 + $0x3c] sm:$0xe]  ;;  %4791 = vmatpush.bf16.msra.mxu0 %v6553_v53 }
 0x1e0   : > { %v7715_v27 = vpack.c.b16 %v5108_v37, %v5107_v26  ;;  %v1010_v43 = vor.u32 %v1008_v11, %v1007_v61  ;;  %v1012_v8 = vrot.slane %v1007_v61, 4  ;;  %v2969_v41 = vshll.u32 %v7608_v45, 16  ;;  %2372 = vmatpush.bf16.msrb.mxu3 %v6481_v44  ;;  %v6497_v61 = vld [vmem:[#allocation2 + $0xa8] sm:$0xff] }
 0x1e1   : > { %v7718_v21 = vpop.f32.mrf.mxu0  ;;  %v3688_v24 = vunpack.c.l.b16 %v3582_v30  ;;  %v2956_v4 = vor.u32 %v2955_v40, %v2952_v14  ;;  %v2967_v54 = vrot.slane %v2966_v18, 4  ;;  %v3588_v25 = vrot.slane %v2821_v49, 5  ;;  %v3492_v30 = vld [vmem:[#allocation2 + $0x48] sm:$0xe]  ;;  %v7728_v14 = vld [vmem:[#allocation2 + $0x50] sm:$0x1] }
 0x1e2   : > { %v1800_v46 = vpop.f32.mrf.mxu1  ;;  %v2035_v13 = vpop.f32.mrf.mxu2  ;;  %9211 = vst [vmem:[#allocation35_spill] sm:$0xff] %v7718_v21  ;;  %v1174_v5 = vsel %vm7128_vm2, %v1012_v8, %v1173_v35  ;;  %v2971_v45 = vrot.slane %v2969_v41, 5  ;;  %v2983_v47 = vshll.u32 %v2821_v49, 16  ;;  %v2987_v40 = vshrl.u32 %v2821_v49, 16  ;;  %v6552_v18 = vld [vmem:[#allocation8 + $0x1e0] sm:$0xff] }
 0x1e3   : > { %v7713_v38 = vadd.f32 %v2033_v50, %v1800_v46  ;;  %v1011_v50 = vsel %vm7194_vm11, %v1003_v19, %v1010_v43  ;;  %v3716_v11 = vpack.c.b16 %v3689_v62, %v3688_v24  ;;  %1175 = vst [vmem:[#allocation2 + $0xc8] sm:$0x1] %v1174_v5  ;;  %v2957_v26 = vrot.slane %v2956_v4, 4  ;;  %v7730_v46 = vld [vmem:[#allocation2 + $0x44] sm:$0x1]  ;;  %v6480_v43 = vld [vmem:[#allocation8 + $0xa0] sm:$0xff]  ;;  %4792 = vmatpush.bf16.msra.mxu0 %v6552_v18 }
 0x1e4   : > { %1839 = vmatmul.bf16.gmra.mxu3 %v1691_v6  ;;  %1172 = vst [vmem:[#allocation2 + $0xc4] sm:$0xf] %v1011_v50  ;;  %v2972_v37 = vsel %vm7157_vm7, %v2967_v54, %v2971_v45  ;;  %v3590_v17 = vrot.slane %v3588_v25, 4  ;;  %v6353_v8 = vrot.slane %v4913_v56, 9  ;;  %v2820_v41 = vld [vmem:[#allocation2 + $0x48] sm:$0xf] }
 0x1e5   : > { %9210 = vst [vmem:[#allocation34_spill] sm:$0xff] %v7713_v38  ;;  %3389 = vmatmul.bf16.gmra.mxu1 %v3289_v1  ;;  %v7724_v1 = vld [vmem:[#allocation2 + $0x40] sm:$0xf]  ;;  %v2962_v35 = vsel %vm7157_vm7, %v2957_v26, %v7661_v34  ;;  %v3263_v44 = vunpack.c.l.b16 %v2972_v37  ;;  %v6179_v50 = vrot.slane %v3492_v30, 9  ;;  %v3591_v49 = vrot.slane %v7728_v14, 5  ;;  %2373 = vmatpush.bf16.msrb.mxu3 %v6480_v43  ;;  %v6551_v5 = vld [vmem:[#allocation8 + $0x1d8] sm:$0xff] }
 0x1e6   : > { %v4997_v6 = vrot.slane %v7724_v1, 5  ;;  %v3262_v34 = vunpack.c.l.b16 %v2962_v35  ;;  %v7744_v53 = vrot.slane %v2983_v47, 5  ;;  %v2974_v56 = vshrl.u32 %v2820_v41, 16  ;;  %v6456_v47 = vld [vmem:[#allocation2 + $0x90] sm:$0xff] }
 0x1e7   : > { %3820 = vmatmul.bf16.gmra.mxu2 %v3716_v11  ;;  %v2989_v11 = vrot.slane %v2987_v40, 4  ;;  %v3592_v30 = vsel %vm7449_vm14, %v3590_v17, %v3591_v49  ;;  %4793 = vmatpush.bf16.msra.mxu0 %v6551_v5  ;;  %v2824_v49 = vld [vmem:[#allocation2 + $0x58] sm:$0xf] }
 0x1e8   : > { %v4999_v24 = vrot.slane %v4997_v6, 4  ;;  %v4998_v4 = vsel %vm7449_vm14, %v6353_v8, %v4997_v6  ;;  %v3290_v18 = vpack.c.b16 %v3263_v44, %v3262_v34  ;;  %v3589_v6 = vsel %vm7449_vm14, %v6179_v50, %v3588_v25  ;;  %v6550_v8 = vld [vmem:[#allocation8 + $0x1d0] sm:$0xff]  ;;  %v6479_v25 = vld [vmem:[#allocation8 + $0x98] sm:$0xff] }
 0x1e9   : > { %v7742_v54 = vpop.f32.mrf.mxu0  ;;  %v5109_v37 = vunpack.c.l.b16 %v4998_v4  ;;  %v3691_v40 = vunpack.c.l.b16 %v3592_v30  ;;  %v2990_v43 = vor.u32 %v2989_v11, %v7744_v53  ;;  %v3690_v44 = vunpack.c.l.b16 %v3589_v6  ;;  %2374 = vmatpush.bf16.msrb.mxu3 %v6479_v25  ;;  %v2823_v11 = vld [vmem:[#allocation2 + $0x54] sm:$0xf]  ;;  %v7762_v6 = vld [vmem:[#allocation2 + $0x4c] sm:$0xf] }
 0x1ea   : > { %v1802_v7 = vpop.f32.mrf.mxu1  ;;  %v2038_v62 = vpop.f32.mrf.mxu2  ;;  %9213 = vst [vmem:[#allocation37_spill] sm:$0xff] %v7742_v54  ;;  %v2993_v4 = vshll.u32 %v7728_v14, 16  ;;  %v3595_v34 = vrot.slane %v2824_v49, 5  ;;  %v3011_v14 = vshrl.u32 %v2824_v49, 16  ;;  %v6478_v25 = vld [vmem:[#allocation8 + $0x90] sm:$0xff] }
 0x1eb   : > { %v7732_v19 = vadd.f32 %v2035_v13, %v1802_v7  ;;  %v5000_v13 = vrot.slane %v7730_v46, 5  ;;  %v2977_v7 = vshll.u32 %v2820_v41, 16  ;;  %4794 = vmatpush.bf16.msra.mxu0 %v6550_v8  ;;  %v3717_v50 = vpack.c.b16 %v3691_v40, %v3690_v44  ;;  %v6498_v40 = vld [vmem:[#allocation2 + $0xb4] sm:$0xff] }
 0x1ec   : > { %2757 = vmatmul.bf16.gmra.mxu0 %v6497_v61  ;;  %v2991_v5 = vrot.slane %v2990_v43, 4  ;;  %v3597_v8 = vrot.slane %v3595_v34, 4 }
 0x1ed   : > { %9212 = vst [vmem:[#allocation36_spill] sm:$0xff] %v7732_v19  ;;  %v5001_v45 = vsel %vm7449_vm14, %v4999_v24, %v5000_v13  ;;  %v2976_v13 = vrot.slane %v2974_v56, 4  ;;  %v2979_v41 = vrot.slane %v2977_v7, 5  ;;  %v2995_v56 = vrot.slane %v2993_v4, 5  ;;  %v7760_v7 = vld [vmem:[#allocation2 + $0x5c] sm:$0x1]  ;;  %2375 = vmatpush.bf16.msrb.mxu3 %v6478_v25 }
 0x1ee   : > { %v5110_v26 = vunpack.c.l.b16 %v5001_v45 }
 0x1ef   : > { %v2980_v45 = vor.u32 %v2979_v41, %v2976_v13  ;;  %v2996_v43 = vsel %vm7157_vm7, %v2991_v5, %v2995_v56  ;;  %v3001_v13 = vshll.u32 %v2823_v11, 16  ;;  %v6548_v41 = vld [vmem:[#allocation8 + $0x1c0] sm:$0xff]  ;;  %v3013_v5 = vrot.slane %v3011_v14, 4 }
 0x1f0   : > { %v7755_v24 = vpack.c.b16 %v5110_v26, %v5109_v37  ;;  %v3493_v26 = vld [vmem:[#allocation2 + $0x54] sm:$0xe] }
 0x1f1   : > { %v7758_v30 = vpop.f32.mrf.mxu0  ;;  %v2981_v4 = vrot.slane %v2980_v45, 4 }
 0x1f2   : > { %v1805_v61 = vpop.f32.mrf.mxu1  ;;  %v2040_v17 = vpop.f32.mrf.mxu2  ;;  %9215 = vst [vmem:[#allocation39_spill] sm:$0xff] %v7758_v30  ;;  %v3598_v30 = vrot.slane %v7760_v7, 5 }
 0x1f3   : > { %v7752_v35 = vadd.f32 %v2038_v62, %v1805_v61  ;;  %v6549_v62 = vld [vmem:[#allocation8 + $0x1c8] sm:$0xff]  ;;  %v2998_v61 = vshrl.u32 %v2823_v11, 16 }
 0x1f4   : > { %2057 = vmatmul.bf16.vlgmr.msra.gmra.mxu3 %v6456_v47  ;;  %4795 = vmatpush.bf16.msra.mxu0 %v6549_v62  ;;  %v3265_v62 = vunpack.c.l.b16 %v2996_v43  ;;  %v3599_v45 = vsel %vm7449_vm14, %v3597_v8, %v3598_v30  ;;  %v5007_v8 = vrot.slane %v7779_v39, 5 }
 0x1f5   : > { %9214 = vst [vmem:[#allocation38_spill] sm:$0xff] %v7752_v35  ;;  %3394 = vmatmul.bf16.gmra.mxu1 %v3290_v18  ;;  %v3007_v18 = vshll.u32 %v2824_v49, 16  ;;  %v5004_v49 = vrot.slane %v7762_v6, 5  ;;  %v3000_v56 = vrot.slane %v2998_v61, 4  ;;  %v7786_v61 = vld [vmem:[#allocation2 + $0x64] sm:$0xf] }
 0x1f7   : > { %3825 = vmatmul.bf16.gmra.mxu2 %v3717_v50  ;;  %v6180_v50 = vrot.slane %v3493_v26, 9  ;;  %v3003_v26 = vrot.slane %v3001_v13, 5  ;;  %v5006_v21 = vrot.slane %v5004_v49, 4 }
 0x1f8   : > { %4796 = vmatpush.bf16.msra.mxu0 %v6548_v41 }
 0x1f9   : > { %v3596_v11 = vsel %vm7449_vm14, %v6180_v50, %v3595_v34  ;;  %v6457_v34 = vld [vmem:[#allocation2 + $0x9c] sm:$0xff]  ;;  %v3004_v30 = vor.u32 %v3003_v26, %v3000_v56 }
 0x1fa   : > { %v1807_v37 = vpop.f32.mrf.mxu1  ;;  %v2043_v44 = vpop.f32.mrf.mxu2  ;;  %v3692_v43 = vunpack.c.l.b16 %v3596_v11  ;;  %v4286_v11 = vshll.u32 %v7613_v31, 16  ;;  %v3494_v26 = vld [vmem:[#allocation2 + $0x60] sm:$0xe] }
 0x1fb   : > { %v7764_v47 = vadd.f32 %v2040_v17, %v1807_v37  ;;  %v2986_v17 = vsel %vm7157_vm7, %v2981_v4, %v7744_v53  ;;  %v7773_v37 = vrot.slane %v3007_v18, 5  ;;  %v3693_v18 = vunpack.c.l.b16 %v3599_v45  ;;  %v7782_v4 = vpop.f32.mrf.mxu0 }
 0x1fc   : > { %2762 = vmatmul.bf16.gmra.mxu0 %v6498_v40  ;;  %v4914_v40 = vld [vmem:[#allocation2 + $0x48] sm:$0xe]  ;;  %v3264_v54 = vunpack.c.l.b16 %v2986_v17  ;;  %9217 = vst [vmem:[#allocation41_spill] sm:$0xff] %v7782_v4  ;;  %v3017_v17 = vshll.u32 %v7760_v7, 16  ;;  %v3005_v7 = vrot.slane %v3004_v30, 4 }
 0x1fd   : > { %9216 = vst [vmem:[#allocation40_spill] sm:$0xff] %v7764_v47  ;;  %v3014_v14 = vor.u32 %v3013_v5, %v7773_v37  ;;  %v6354_v41 = vrot.slane %v4914_v40, 9  ;;  %v4290_v5 = vshrl.u32 %v7613_v31, 16  ;;  %v3602_v40 = vrot.slane %v7786_v61, 5 }
 0x1fe   : > { %v3291_v50 = vpack.c.b16 %v3265_v62, %v3264_v54  ;;  %v5008_v54 = vsel %vm7449_vm14, %v5006_v21, %v5007_v8  ;;  %v3718_v62 = vpack.c.b16 %v3693_v18, %v3692_v43  ;;  %v3019_v31 = vrot.slane %v3017_v17, 5  ;;  %v6499_v43 = vld [vmem:[#allocation2 + $0xc0] sm:$0xff] }
 0x1ff   : > { %v5005_v45 = vsel %vm7449_vm14, %v6354_v41, %v5004_v49  ;;  %v3015_v56 = vrot.slane %v3014_v14, 4  ;;  %v5112_v0 = vunpack.c.l.b16 %v5008_v54  ;;  %v4280_v49 = vshll.u32 %v4228_v22, 16  ;;  %v2826_v54 = vld [vmem:[#allocation2 + $0x60] sm:$0xf] }
 0x200   : > { %v5111_v4 = vunpack.c.l.b16 %v5005_v45  ;;  %v7799_v41 = vrot.slane %v4286_v11, 5  ;;  %v6181_v18 = vrot.slane %v3494_v26, 9  ;;  %v3010_v8 = vsel %vm7157_vm7, %v3005_v7, %v7773_v37 }
 0x201   : > { %v3604_v17 = vrot.slane %v3602_v40, 4  ;;  %v3605_v45 = vrot.slane %v7797_v28, 5  ;;  %v3031_v37 = vshll.u32 %v7786_v61, 16  ;;  %v3035_v7 = vshrl.u32 %v7786_v61, 16 }
 0x202   : > { %v1810_v53 = vpop.f32.mrf.mxu1  ;;  %v2045_v13 = vpop.f32.mrf.mxu2  ;;  %v7804_v14 = vpack.c.b16 %v5112_v0, %v5111_v4  ;;  %v6476_v0 = vld [vmem:[#allocation8 + $0x80] sm:$0xff] }
 0x203   : > { %v7784_v25 = vadd.f32 %v2043_v44, %v1810_v53  ;;  %v6477_v44 = vld [vmem:[#allocation8 + $0x88] sm:$0xff]  ;;  %v4277_v53 = vshrl.u32 %v4228_v22, 16  ;;  %v3020_v22 = vsel %vm7157_vm7, %v3015_v56, %v3019_v31  ;;  %v6687_v56 = vld [vmem:[#allocation2 + $0x8] sm:$0x1] }
 0x204   : > { %2062 = vmatmul.bf16.gmra.mxu3 %v6457_v34  ;;  %v4292_v34 = vrot.slane %v4290_v5, 4  ;;  %v3603_v5 = vsel %vm7449_vm14, %v6181_v18, %v3602_v40  ;;  %v2134_v31 = vrot.slane %v6687_v56, 5  ;;  %v3267_v40 = vunpack.c.l.b16 %v3020_v22 }
 0x205   : > { %9218 = vst [vmem:[#allocation42_spill] sm:$0xff] %v7784_v25  ;;  %3399 = vmatmul.bf16.gmra.mxu1 %v3291_v50  ;;  %2376 = vmatpush.bf16.msrb.mxu3 %v6477_v44  ;;  %v7801_v50 = vld [vmem:[#allocation2 + $0x4] sm:$0xf]  ;;  %v4279_v44 = vrot.slane %v4277_v53, 4  ;;  %v3606_v53 = vsel %vm7449_vm14, %v3604_v17, %v3605_v45  ;;  %v3025_v18 = vshll.u32 %v2826_v54, 16  ;;  %v3694_v61 = vunpack.c.l.b16 %v3603_v5 }
 0x206   : > { %v9164_v21 = vrot.slane %v7801_v50, 5  ;;  %v4293_v26 = vor.u32 %v4292_v34, %v7799_v41  ;;  %v3022_v34 = vshrl.u32 %v2826_v54, 16  ;;  %v3037_v56 = vrot.slane %v3035_v7, 4  ;;  %v2078_v45 = vld [vmem:[#allocation2] sm:$0xe] }
 0x207   : > { %3830 = vmatmul.bf16.gmra.mxu2 %v3718_v62  ;;  %v4282_v62 = vrot.slane %v4280_v49, 5  ;;  %v4296_v49 = vshll.u32 %v7637_v63, 16  ;;  %v4304_v22 = vshll.u32 %v4231_v2, 16  ;;  %v3027_v17 = vrot.slane %v3025_v18, 5 }
 0x208   : > { %v4294_v47 = vrot.slane %v4293_v26, 4  ;;  %v3024_v38 = vrot.slane %v3022_v34, 4  ;;  %v4310_v5 = vshll.u32 %v7642_v15, 16 }
 0x209   : > { %2377 = vmatpush.bf16.msrb.mxu3 %v6476_v0  ;;  %v4283_v25 = vor.u32 %v4282_v62, %v4279_v44  ;;  %v4298_v19 = vrot.slane %v4296_v49, 5  ;;  %v4314_v44 = vshrl.u32 %v7642_v15, 16  ;;  %v5998_v62 = vrot.slane %v2078_v45, 9  ;;  %v7850_v49 = vld [vmem:[#allocation2 + $0x58] sm:$0xf] }
 0x20a   : > { %v1812_v30 = vpop.f32.mrf.mxu1  ;;  %v2048_v4 = vpop.f32.mrf.mxu2  ;;  %v7854_v18 = vrot.slane %v4304_v22, 5 }
 0x20b   : > { %v7811_v11 = vadd.f32 %v2045_v13, %v1812_v30  ;;  %v2133_v13 = vrot.slane %v9164_v21, 4  ;;  %v7821_v30 = vpop.f32.mrf.mxu0  ;;  %v7826_v21 = vrot.slane %v3031_v37, 5 }
 0x20c   : > { %9220 = vst [vmem:[#allocation44_spill] sm:$0xff] %v7821_v30  ;;  %2767 = vmatmul.bf16.gmra.mxu0 %v6499_v43  ;;  %v3695_v30 = vunpack.c.l.b16 %v3606_v53  ;;  %v4301_v43 = vshrl.u32 %v4231_v2, 16  ;;  %v4299_v2 = vsel %vm7157_vm7, %v4294_v47, %v4298_v19  ;;  %v3028_v47 = vor.u32 %v3027_v17, %v3024_v38 }
 0x20d   : > { %9219 = vst [vmem:[#allocation43_spill] sm:$0xff] %v7811_v11  ;;  %v3266_v11 = vunpack.c.l.b16 %v3010_v8  ;;  %v2135_v63 = vsel %vm7449_vm14, %v2133_v13, %v2134_v31  ;;  %v6458_v8 = vld [vmem:[#allocation2 + $0xa8] sm:$0xff]  ;;  %v3038_v26 = vor.u32 %v3037_v56, %v7826_v21  ;;  %v4320_v13 = vshll.u32 %v7652_v57, 16  ;;  %v7858_v56 = vld [vmem:[#allocation2 + $0x30] sm:$0xf] }
 0x20e   : > { %v2259_v37 = vunpack.c.l.b16 %v2135_v63  ;;  %v3719_v7 = vpack.c.b16 %v3695_v30, %v3694_v61  ;;  %v9222_v31 = vrot.slane %v7801_v50, 5  ;;  %v4678_v57 = vunpack.c.l.b16 %v4299_v2 }
 0x20f   : > { %v3292_v35 = vpack.c.b16 %v3267_v40, %v3266_v11  ;;  %v4284_v11 = vrot.slane %v4283_v25, 4  ;;  %v7837_v40 = vld [vmem:[#allocation2 + $0x70] sm:$0xf]  ;;  %v7856_v50 = vrot.slane %v4310_v5, 5  ;;  %v4316_v61 = vrot.slane %v4314_v44, 4 }
 0x210   : > { %v2132_v15 = vsel %vm7449_vm14, %v5998_v62, %v9222_v31  ;;  %v6547_v25 = vld [vmem:[#allocation8 + $0x1b8] sm:$0xff]  ;;  %v3029_v45 = vrot.slane %v3028_v47, 4  ;;  %v7864_v22 = vrot.slane %v4320_v13, 5  ;;  %v3495_v31 = vld [vmem:[#allocation2 + $0x6c] sm:$0xe] }
 0x211   : > { %v4289_v19 = vsel %vm7157_vm7, %v4284_v11, %v7799_v41  ;;  %v2258_v30 = vunpack.c.l.b16 %v2132_v15  ;;  %4107 = vmatpush.bf16.msra.mxu3 %v6547_v25  ;;  %v3609_v41 = vrot.slane %v7837_v40, 5  ;;  %v4915_v5 = vld [vmem:[#allocation2 + $0x54] sm:$0xe]  ;;  %v7869_v11 = vld [vmem:[#allocation2 + $0x74] sm:$0x1]  ;;  %v3055_v25 = vshll.u32 %v7837_v40, 16 }
 0x212   : > { %v1815_v0 = vpop.f32.mrf.mxu1  ;;  %v2050_v53 = vpop.f32.mrf.mxu2  ;;  %v6563_v47 = vld [vmem:[#allocation8 + $0x238] sm:$0xff] }
 0x213   : > { %v7830_v54 = vadd.f32 %v2048_v4, %v1815_v0  ;;  %v7839_v4 = vrot.slane %v4301_v43, 4  ;;  %v7852_v34 = vpop.f32.mrf.mxu0  ;;  %v3039_v43 = vrot.slane %v3038_v26, 4  ;;  %v7861_v38 = vpack.c.b16 %v2259_v37, %v2258_v30  ;;  %v2829_v37 = vld [vmem:[#allocation2 + $0x6c] sm:$0xf]  ;;  %5215 = vmatpush.bf16.msra.mxu1 %v6563_v47 }
 0x214   : > { %2067 = vmatmul.bf16.gmra.mxu3 %v6458_v8  ;;  %9223 = vst [vmem:[#allocation46_spill] sm:$0xff] %v7852_v34  ;;  %v5011_v0 = vrot.slane %v7850_v49, 5  ;;  %v4317_v26 = vor.u32 %v4316_v61, %v7856_v50  ;;  %v3611_v15 = vrot.slane %v3609_v41, 4  ;;  %v3049_v61 = vshll.u32 %v2829_v37, 16  ;;  %v7892_v8 = vld [vmem:[#allocation2 + $0x64] sm:$0xf] }
 0x215   : > { %9221 = vst [vmem:[#allocation45_spill] sm:$0xff] %v7830_v54  ;;  %3404 = vmatmul.bf16.gmra.mxu1 %v3292_v35  ;;  %v3041_v35 = vshll.u32 %v7797_v28, 16  ;;  %v4677_v28 = vunpack.c.l.b16 %v4289_v19  ;;  %v4307_v2 = vor.u32 %v7854_v18, %v7839_v4  ;;  %v3034_v19 = vsel %vm7157_vm7, %v3029_v45, %v7826_v21 }
 0x216   : > { %v4328_v4 = vshll.u32 %v7858_v56, 16  ;;  %v5013_v30 = vrot.slane %v5011_v0, 4  ;;  %v3046_v18 = vshrl.u32 %v2829_v37, 16  ;;  %v7890_v45 = vrot.slane %v3055_v25, 5 }
 0x217   : > { %3835 = vmatmul.bf16.gmra.mxu2 %v3719_v7  ;;  %v3043_v63 = vrot.slane %v3041_v35, 5  ;;  %v4709_v62 = vpack.c.b16 %v4678_v57, %v4677_v28  ;;  %v7874_v7 = vld [vmem:[#allocation2 + $0x5c] sm:$0x1]  ;;  %v6355_v35 = vrot.slane %v4915_v5, 9  ;;  %v3612_v57 = vrot.slane %v7869_v11, 5 }
 0x218   : > { %v3048_v25 = vrot.slane %v3046_v18, 4  ;;  %v7911_v18 = vld [vmem:[#allocation2 + $0x7c] sm:$0xf] }
 0x219   : > { %v3044_v13 = vsel %vm7157_vm7, %v3039_v43, %v3043_v63  ;;  %v5014_v43 = vrot.slane %v7874_v7, 5  ;;  %v4318_v63 = vrot.slane %v4317_v26, 4  ;;  %v3613_v21 = vsel %vm7449_vm14, %v3611_v15, %v3612_v57 }
 0x21a   : > { %v1817_v17 = vpop.f32.mrf.mxu1  ;;  %v3269_v28 = vunpack.c.l.b16 %v3044_v13  ;;  %v3268_v13 = vunpack.c.l.b16 %v3034_v19  ;;  %v4334_v26 = vshll.u32 %v7659_v20, 16  ;;  %v4308_v19 = vrot.slane %v4307_v2, 4 }
 0x21b   : > { %v7867_v44 = vadd.f32 %v2050_v53, %v1817_v17  ;;  %v3059_v53 = vshrl.u32 %v7837_v40, 16  ;;  %v6182_v17 = vrot.slane %v3495_v31, 9  ;;  %v5012_v40 = vsel %vm7449_vm14, %v6355_v35, %v5011_v0  ;;  %v7896_v34 = vpop.f32.mrf.mxu0 }
 0x21c   : > { %4797 = vmatmul.bf16.vlgmr.msra.gmra.mxu0 %v4709_v62  ;;  %v2053_v62 = vpop.f32.mrf.mxu2  ;;  %v5015_v37 = vsel %vm7449_vm14, %v5013_v30, %v5014_v43  ;;  %9225 = vst [vmem:[#allocation48_spill] sm:$0xff] %v7896_v34  ;;  %v4338_v31 = vshrl.u32 %v7659_v20, 16  ;;  %v3051_v35 = vrot.slane %v3049_v61, 5  ;;  %v3293_v54 = vpack.c.b16 %v3269_v28, %v3268_v13 }
 0x21d   : > { %9224 = vst [vmem:[#allocation47_spill] sm:$0xff] %v7867_v44  ;;  %v3061_v5 = vrot.slane %v3059_v53, 4  ;;  %v5114_v0 = vunpack.c.l.b16 %v5015_v37  ;;  %v3610_v15 = vsel %vm7449_vm14, %v6182_v17, %v3609_v41  ;;  %v5113_v53 = vunpack.c.l.b16 %v5012_v40  ;;  %v6459_v44 = vld [vmem:[#allocation2 + $0xb4] sm:$0xff]  ;;  %v7915_v17 = vld [vmem:[#allocation2 + $0x68] sm:$0x1] }
 0x21e   : > { %v3697_v30 = vunpack.c.l.b16 %v3613_v21  ;;  %v5018_v43 = vrot.slane %v7892_v8, 5  ;;  %v4323_v20 = vsel %vm7157_vm7, %v4318_v63, %v7864_v22  ;;  %v3696_v41 = vunpack.c.l.b16 %v3610_v15  ;;  %v6688_v15 = vld [vmem:[#allocation2 + $0x10] sm:$0xf] }
 0x21f   : > { %v3062_v37 = vor.u32 %v3061_v5, %v7890_v45  ;;  %v7909_v34 = vpack.c.b16 %v5114_v0, %v5113_v53  ;;  %v7913_v61 = vrot.slane %v4334_v26, 5  ;;  %v4340_v28 = vrot.slane %v4338_v31, 4  ;;  %v2079_v31 = vld [vmem:[#allocation2 + $0xc] sm:$0xe] }
 0x220   : > { %v4313_v2 = vsel %vm7157_vm7, %v4308_v19, %v7856_v50  ;;  %v3065_v22 = vshll.u32 %v7869_v11, 16  ;;  %v9228_v63 = vshrl.u32 %v7858_v56, 16  ;;  %v3052_v21 = vor.u32 %v3051_v35, %v3048_v25  ;;  %v4916_v25 = vld [vmem:[#allocation2 + $0x60] sm:$0xe] }
 0x221   : > { %9227 = vst [vmem:[#allocation50_spill] sm:$0xff] %v7909_v34  ;;  %v5020_v5 = vrot.slane %v5018_v43, 4  ;;  %v3063_v13 = vrot.slane %v3062_v37, 4  ;;  %v3616_v26 = vrot.slane %v7911_v18, 5  ;;  %v5021_v0 = vrot.slane %v7915_v17, 5 }
 0x222   : > { %v1820_v47 = vpop.f32.mrf.mxu1  ;;  %v4327_v40 = vrot.slane %v9228_v63, 4  ;;  %v4341_v50 = vor.u32 %v4340_v28, %v7913_v61  ;;  %v4344_v11 = vshll.u32 %v7672_v3, 16  ;;  %v2138_v56 = vrot.slane %v6688_v15, 5  ;;  %v7933_v63 = vld [vmem:[#allocation2 + $0x80] sm:$0x1] }
 0x223   : > { %v7902_v57 = vadd.f32 %v2053_v62, %v1820_v47  ;;  %v4330_v62 = vrot.slane %v4328_v4, 5  ;;  %v4679_v47 = vunpack.c.l.b16 %v4313_v2  ;;  %v5022_v35 = vsel %vm7449_vm14, %v5020_v5, %v5021_v0  ;;  %v2832_v15 = vld [vmem:[#allocation2 + $0x78] sm:$0xf] }
 0x224   : > { %2072 = vmatmul.bf16.gmra.mxu3 %v6459_v44  ;;  %v3720_v44 = vpack.c.b16 %v3697_v30, %v3696_v41  ;;  %v2055_v53 = vpop.f32.mrf.mxu2  ;;  %v3067_v30 = vrot.slane %v3065_v22, 5  ;;  %v3053_v2 = vrot.slane %v3052_v21, 4  ;;  %v5999_v28 = vrot.slane %v2079_v31, 9 }
 0x225   : > { %9226 = vst [vmem:[#allocation49_spill] sm:$0xff] %v7902_v57  ;;  %3409 = vmatmul.bf16.gmra.mxu1 %v3293_v54  ;;  %v4680_v54 = vunpack.c.l.b16 %v4323_v20  ;;  %v4331_v19 = vor.u32 %v4330_v62, %v4327_v40  ;;  %v7929_v20 = vpop.f32.mrf.mxu0  ;;  %v3079_v22 = vshll.u32 %v7911_v18, 16  ;;  %v3083_v40 = vshrl.u32 %v7911_v18, 16  ;;  %v3496_v62 = vld [vmem:[#allocation2 + $0x78] sm:$0xe] }
 0x226   : > { %9229 = vst [vmem:[#allocation51_spill] sm:$0xff] %v7929_v20  ;;  %v3068_v3 = vsel %vm7157_vm7, %v3063_v13, %v3067_v30  ;;  %v4342_v5 = vrot.slane %v4341_v50, 4  ;;  %v4346_v0 = vrot.slane %v4344_v11, 5  ;;  %v3619_v21 = vrot.slane %v7933_v63, 5  ;;  %v6689_v13 = vld [vmem:[#allocation2 + $0x14] sm:$0x1] }
 0x227   : > { %3840 = vmatmul.bf16.gmra.mxu2 %v3720_v44  ;;  %v4710_v41 = vpack.c.b16 %v4680_v54, %v4679_v47  ;;  %v3618_v44 = vrot.slane %v3616_v26, 4  ;;  %v3058_v54 = vsel %vm7157_vm7, %v3053_v2, %v7890_v45  ;;  %v4332_v31 = vrot.slane %v4331_v19, 4 }
 0x228   : > { %v2141_v47 = vrot.slane %v6689_v13, 5  ;;  %v3271_v30 = vunpack.c.l.b16 %v3068_v3  ;;  %v3070_v20 = vshrl.u32 %v2832_v15, 16  ;;  %v7947_v11 = vrot.slane %v3079_v22, 5 }
 0x229   : > { %v3620_v50 = vsel %vm7449_vm14, %v3618_v44, %v3619_v21  ;;  %v3270_v57 = vunpack.c.l.b16 %v3058_v54  ;;  %v4347_v45 = vsel %vm7157_vm7, %v4342_v5, %v4346_v0  ;;  %v5116_v2 = vunpack.c.l.b16 %v5022_v35 }
 0x22a   : > { %v1822_v4 = vpop.f32.mrf.mxu1  ;;  %v4362_v44 = vshrl.u32 %v7724_v1, 16  ;;  %v3072_v54 = vrot.slane %v3070_v20, 4  ;;  %v4337_v5 = vsel %vm7157_vm7, %v4332_v31, %v7913_v61  ;;  %v2139_v35 = vsel %vm7449_vm14, %v5999_v28, %v2138_v56  ;;  %v6546_v61 = vld [vmem:[#allocation8 + $0x1b0] sm:$0xff] }
 0x22b   : > { %v7931_v37 = vadd.f32 %v2055_v53, %v1822_v4  ;;  %v2140_v53 = vrot.slane %v2138_v56, 4  ;;  %v6356_v4 = vrot.slane %v4916_v25, 9  ;;  %v3085_v25 = vrot.slane %v3083_v40, 4  ;;  %4108 = vmatpush.bf16.msra.mxu3 %v6546_v61  ;;  %v7986_v61 = vld [vmem:[#allocation2 + $0x8c] sm:$0x1] }
 0x22c   : > { %4802 = vmatmul.bf16.gmra.mxu0 %v4710_v41  ;;  %v6183_v41 = vrot.slane %v3496_v62, 9  ;;  %v4358_v62 = vshll.u32 %v7724_v1, 16  ;;  %v3294_v40 = vpack.c.b16 %v3271_v30, %v3270_v57  ;;  %v4682_v31 = vunpack.c.l.b16 %v4347_v45 }
 0x22d   : > { %9230 = vst [vmem:[#allocation52_spill] sm:$0xff] %v7931_v37  ;;  %v3073_v37 = vshll.u32 %v2832_v15, 16  ;;  %v5019_v18 = vsel %vm7449_vm14, %v6356_v4, %v5018_v43  ;;  %v2142_v19 = vsel %vm7449_vm14, %v2140_v53, %v2141_v47  ;;  %v4237_v15 = vld [vmem:[#allocation2 + $0x3c] sm:$0xf]  ;;  %v3699_v4 = vunpack.c.l.b16 %v3620_v50  ;;  %v7969_v13 = vpop.f32.mrf.mxu0  ;;  %v2080_v47 = vld [vmem:[#allocation2 + $0x18] sm:$0xe] }
 0x22e   : > { %v3617_v43 = vsel %vm7449_vm14, %v6183_v41, %v3616_v26  ;;  %v5115_v22 = vunpack.c.l.b16 %v5019_v18  ;;  %v3086_v0 = vor.u32 %v3085_v25, %v7947_v11  ;;  %v7965_v26 = vld [vmem:[#allocation2 + $0x88] sm:$0xf]  ;;  %9233 = vst [vmem:[#allocation55_spill] sm:$0xff] %v7969_v13  ;;  %v2261_v57 = vunpack.c.l.b16 %v2142_v19  ;;  %v6690_v25 = vld [vmem:[#allocation2 + $0x1c] sm:$0xf] }
 0x22f   : > { %v3075_v21 = vrot.slane %v3073_v37, 5  ;;  %v3698_v1 = vunpack.c.l.b16 %v3617_v43  ;;  %v4349_v20 = vshrl.u32 %v4237_v15, 16  ;;  %v4352_v37 = vshll.u32 %v4237_v15, 16  ;;  %v6562_v13 = vld [vmem:[#allocation8 + $0x230] sm:$0xff] }
 0x230   : > { %v7967_v53 = vpack.c.b16 %v5116_v2, %v5115_v22  ;;  %v3089_v56 = vshll.u32 %v7933_v63, 16  ;;  %v7973_v28 = vrot.slane %v4358_v62, 5  ;;  %v4364_v30 = vrot.slane %v4362_v44, 4  ;;  %v7979_v62 = vld [vmem:[#allocation2 + $0x20] sm:$0x1]  ;;  %5216 = vmatpush.bf16.msra.mxu1 %v6562_v13 }
 0x231   : > { %v3721_v18 = vpack.c.b16 %v3699_v4, %v3698_v1  ;;  %v3076_v41 = vor.u32 %v3075_v21, %v3072_v54  ;;  %v3623_v50 = vrot.slane %v7965_v26, 5  ;;  %v2145_v2 = vrot.slane %v6690_v25, 5  ;;  %v7982_v4 = vld [vmem:[#allocation2 + $0x70] sm:$0xf]  ;;  %v4240_v25 = vld [vmem:[#allocation2 + $0x48] sm:$0xf] }
 0x232   : > { %v7953_v3 = vpop.f32.mrf.mxu1  ;;  %9232 = vst [vmem:[#allocation54_spill] sm:$0xff] %v7967_v53  ;;  %v4681_v19 = vunpack.c.l.b16 %v4337_v5  ;;  %v2260_v43 = vunpack.c.l.b16 %v2139_v35  ;;  %v3087_v15 = vrot.slane %v3086_v0, 4  ;;  %v6000_v22 = vrot.slane %v2080_v47, 9  ;;  %v7989_v35 = vld [vmem:[#allocation2 + $0x28] sm:$0xf] }
 0x233   : > { %9231 = vst [vmem:[#allocation53_spill] sm:$0xff] %v7953_v3  ;;  %v4351_v45 = vrot.slane %v4349_v20, 4  ;;  %v4368_v63 = vshll.u32 %v7730_v46, 16  ;;  %v3091_v1 = vrot.slane %v3089_v56, 5  ;;  %v4365_v5 = vor.u32 %v4364_v30, %v7973_v28  ;;  %v2835_v56 = vld [vmem:[#allocation2 + $0x84] sm:$0xf] }
 0x234   : > { %2378 = vmatmul.bf16.vlgmr.msrb.gmra.mxu3 %v7861_v38  ;;  %v2291_v21 = vpack.c.b16 %v2261_v57, %v2260_v43  ;;  %v4711_v20 = vpack.c.b16 %v4682_v31, %v4681_v19  ;;  %v3077_v46 = vrot.slane %v3076_v41, 4  ;;  %v3625_v47 = vrot.slane %v3623_v50, 4 }
 0x235   : > { %3414 = vmatmul.bf16.gmra.mxu1 %v3294_v40  ;;  %v4354_v40 = vrot.slane %v4352_v37, 5  ;;  %v3497_v37 = vld [vmem:[#allocation2 + $0x84] sm:$0xe]  ;;  %v3092_v57 = vsel %vm7157_vm7, %v3087_v15, %v3091_v1  ;;  %v3103_v43 = vshll.u32 %v7965_v26, 16  ;;  %v3107_v30 = vshrl.u32 %v7965_v26, 16  ;;  %v8005_v3 = vpop.f32.mrf.mxu0 }
 0x236   : > { %v3626_v31 = vrot.slane %v7986_v61, 5  ;;  %v4370_v19 = vrot.slane %v4368_v63, 5  ;;  %v2147_v0 = vrot.slane %v2145_v2, 4  ;;  %v4373_v15 = vshrl.u32 %v4240_v25, 16  ;;  %9235 = vst [vmem:[#allocation57_spill] sm:$0xff] %v8005_v3 }
 0x237   : > { %v7976_v38 = vpop.f32.mrf.mxu3  ;;  %3845 = vmatmul.bf16.gmra.mxu2 %v3721_v18  ;;  %v7994_v18 = vsel %vm7449_vm14, %v6000_v22, %v2145_v2  ;;  %v4355_v41 = vor.u32 %v4354_v40, %v4351_v45  ;;  %v3082_v22 = vsel %vm7157_vm7, %v3077_v46, %v7947_v11  ;;  %v4376_v1 = vshll.u32 %v4240_v25, 16  ;;  %v8009_v45 = vld [vmem:[#allocation2 + $0x74] sm:$0x1] }
 0x238   : > { %v3273_v51 = vunpack.c.l.b16 %v3092_v57  ;;  %v6184_v26 = vrot.slane %v3497_v37, 9  ;;  %v3094_v44 = vshrl.u32 %v2835_v56, 16  ;;  %v3097_v40 = vshll.u32 %v2835_v56, 16 }
 0x239   : > { %v8013_v63 = vrot.slane %v3103_v43, 5  ;;  %v3109_v11 = vrot.slane %v3107_v30, 4  ;;  %v3272_v25 = vunpack.c.l.b16 %v3082_v22  ;;  %v4382_v57 = vshll.u32 %v7762_v6, 16  ;;  %v2081_v30 = vld [vmem:[#allocation2 + $0x24] sm:$0xe] }
 0x23a   : > { %v7984_v54 = vpop.f32.mrf.mxu1  ;;  %v4386_v37 = vshrl.u32 %v7762_v6, 16  ;;  %v3624_v3 = vsel %vm7449_vm14, %v6184_v26, %v3623_v50  ;;  %v4356_v56 = vrot.slane %v4355_v41, 4  ;;  %v4375_v53 = vrot.slane %v4373_v15, 4  ;;  %v8033_v41 = vld [vmem:[#allocation2 + $0x94] sm:$0xf] }
 0x23b   : > { %9234 = vst [vmem:[#allocation56_spill] sm:$0xff] %v7984_v54  ;;  %v4366_v54 = vrot.slane %v4365_v5, 4  ;;  %v9236_v5 = vrot.slane %v7982_v4, 5  ;;  %v3295_v22 = vpack.c.b16 %v3273_v51, %v3272_v25  ;;  %v4378_v9 = vrot.slane %v4376_v1, 5  ;;  %v4917_v25 = vld [vmem:[#allocation2 + $0x6c] sm:$0xe] }
 0x23c   : > { %4807 = vmatmul.bf16.gmra.mxu0 %v4711_v20  ;;  %v3627_v20 = vsel %vm7449_vm14, %v3625_v47, %v3626_v31  ;;  %v9237_v47 = vrot.slane %v7989_v35, 5  ;;  %v3096_v6 = vrot.slane %v3094_v44, 4  ;;  %v3099_v23 = vrot.slane %v3097_v40, 5 }
 0x23d   : > { %v5027_v46 = vrot.slane %v9236_v5, 4  ;;  %v4371_v43 = vsel %vm7157_vm7, %v4366_v54, %v4370_v19  ;;  %v5028_v5 = vrot.slane %v8009_v45, 5  ;;  %v3701_v60 = vunpack.c.l.b16 %v3627_v20 }
 0x23e   : > { %v2154_v31 = vrot.slane %v9237_v47, 4  ;;  %v3110_v47 = vor.u32 %v3109_v11, %v8013_v63  ;;  %v3700_v50 = vunpack.c.l.b16 %v3624_v3  ;;  %v8035_v54 = vrot.slane %v4382_v57, 5 }
 0x23f   : > { %v8011_v2 = vpop.f32.mrf.mxu3  ;;  %v4388_v19 = vrot.slane %v4386_v37, 4  ;;  %v6001_v51 = vrot.slane %v2081_v30, 9  ;;  %v4361_v44 = vsel %vm7157_vm7, %v4356_v56, %v7973_v28  ;;  %v9239_v15 = vrot.slane %v7979_v62, 5 }
 0x240   : > { %v3113_v26 = vshll.u32 %v7986_v61, 16  ;;  %v3722_v3 = vpack.c.b16 %v3701_v60, %v3700_v50  ;;  %v4684_v40 = vunpack.c.l.b16 %v4371_v43  ;;  %v2262_v11 = vunpack.c.l.b16 %v7994_v18 }
 0x241   : > { %v2149_v1 = vsel %vm7449_vm14, %v2147_v0, %v9239_v15  ;;  %v3100_v37 = vor.u32 %v3099_v23, %v3096_v6  ;;  %v3111_v30 = vrot.slane %v3110_v47, 4  ;;  %v3630_v28 = vrot.slane %v8033_v41, 5  ;;  %v8053_v0 = vpop.f32.mrf.mxu0 }
 0x242   : > { %v8021_v13 = vpop.f32.mrf.mxu1  ;;  %9240 = vst [vmem:[#allocation59_spill] sm:$0xff] %v8053_v0  ;;  %v4683_v61 = vunpack.c.l.b16 %v4361_v44  ;;  %v2263_v60 = vunpack.c.l.b16 %v2149_v1  ;;  %v4389_v56 = vor.u32 %v4388_v19, %v8035_v54  ;;  %v3115_v18 = vrot.slane %v3113_v26, 5  ;;  %v4243_v1 = vld [vmem:[#allocation2 + $0x54] sm:$0xf] }
 0x243   : > { %9238 = vst [vmem:[#allocation58_spill] sm:$0xff] %v8021_v13  ;;  %v8031_v13 = vsel %vm7449_vm14, %v5027_v46, %v5028_v5  ;;  %v4379_v46 = vor.u32 %v4378_v9, %v4375_v53  ;;  %v4392_v9 = vshll.u32 %v7779_v39, 16  ;;  %v3127_v23 = vshll.u32 %v8033_v41, 16  ;;  %v2842_v39 = vld [vmem:[#allocation2 + $0xa0] sm:$0xf] }
 0x244   : > { %2383 = vmatmul.bf16.gmra.mxu3 %v2291_v21  ;;  %v6693_v21 = vld [vmem:[#allocation2 + $0x2c] sm:$0x1]  ;;  %v3131_v43 = vshrl.u32 %v8033_v41, 16  ;;  %v6357_v5 = vrot.slane %v4917_v25, 9  ;;  %v9242_v47 = vrot.slane %v7989_v35, 5  ;;  %v3101_v19 = vrot.slane %v3100_v37, 4 }
 0x245   : > { %3419 = vmatmul.bf16.gmra.mxu1 %v3295_v22  ;;  %v2155_v20 = vrot.slane %v6693_v21, 5  ;;  %v4712_v22 = vpack.c.b16 %v4684_v40, %v4683_v61  ;;  %v4380_v6 = vrot.slane %v4379_v46, 4  ;;  %v3116_v44 = vsel %vm7157_vm7, %v3111_v30, %v3115_v18  ;;  %v3498_v35 = vld [vmem:[#allocation2 + $0x90] sm:$0xe] }
 0x246   : > { %v8067_v50 = vsel %vm7449_vm14, %v6001_v51, %v9242_v47  ;;  %v3632_v15 = vrot.slane %v3630_v28, 4  ;;  %v9243_v41 = vrot.slane %v7982_v4, 5  ;;  %v2292_v21 = vpack.c.b16 %v2263_v60, %v2262_v11  ;;  %v2838_v51 = vld [vmem:[#allocation2 + $0x90] sm:$0xf] }
 0x247   : > { %v8046_v57 = vpop.f32.mrf.mxu3  ;;  %v8051_v62 = vsel %vm7449_vm14, %v2154_v31, %v2155_v20  ;;  %3850 = vmatmul.bf16.gmra.mxu2 %v3722_v3  ;;  %v8061_v31 = vld [vmem:[#allocation2 + $0x98] sm:$0x1]  ;;  %v4390_v20 = vrot.slane %v4389_v56, 4  ;;  %v4394_v3 = vrot.slane %v4392_v9, 5  ;;  %v5118_v40 = vunpack.c.l.b16 %v8031_v13 }
 0x248   : > { %v5026_v26 = vsel %vm7449_vm14, %v6357_v5, %v9243_v41  ;;  %v3106_v46 = vsel %vm7157_vm7, %v3101_v19, %v8013_v63  ;;  %v3633_v25 = vrot.slane %v8061_v31, 5  ;;  %v8081_v37 = vrot.slane %v3127_v23, 5 }
 0x249   : > { %v3133_v30 = vrot.slane %v3131_v43, 4  ;;  %v3275_v61 = vunpack.c.l.b16 %v3116_v44  ;;  %v4397_v18 = vshrl.u32 %v4243_v1, 16  ;;  %v4400_v5 = vshll.u32 %v4243_v1, 16 }
 0x24a   : > { %v8057_v53 = vpop.f32.mrf.mxu1  ;;  %v6185_v60 = vrot.slane %v3498_v35, 9  ;;  %v3634_v56 = vsel %vm7449_vm14, %v3632_v15, %v3633_v25  ;;  %v3118_v13 = vshrl.u32 %v2838_v51, 16  ;;  %v3121_v9 = vshll.u32 %v2838_v51, 16  ;;  %v6694_v15 = vld [vmem:[#allocation2 + $0x34] sm:$0xf]  ;;  %v8098_v35 = vpop.f32.mrf.mxu2 }
 0x24b   : > { %9241 = vst [vmem:[#allocation60_spill] sm:$0xff] %v8057_v53  ;;  %v3274_v47 = vunpack.c.l.b16 %v3106_v46  ;;  %v4406_v63 = vshll.u32 %v7850_v49, 16  ;;  %v4410_v19 = vshrl.u32 %v7850_v49, 16  ;;  %v4395_v1 = vsel %vm7157_vm7, %v4390_v20, %v4394_v3  ;;  %v8100_v51 = vpop.f32.mrf.mxu0  ;;  %v2082_v3 = vld [vmem:[#allocation2 + $0x30] sm:$0xe] }
 0x24c   : > { %4812 = vmatmul.bf16.gmra.mxu0 %v4712_v22  ;;  %v5117_v22 = vunpack.c.l.b16 %v5026_v26  ;;  %v3631_v44 = vsel %vm7449_vm14, %v6185_v60, %v3630_v28  ;;  %v3134_v41 = vor.u32 %v3133_v30, %v8081_v37  ;;  %v2159_v26 = vrot.slane %v6694_v15, 5  ;;  %9246 = vst [vmem:[#allocation63_spill] sm:$0xff] %v8098_v35 }
 0x24d   : > { %9247 = vst [vmem:[#allocation64_spill] sm:$0xff] %v8100_v51  ;;  %v3296_v46 = vpack.c.b16 %v3275_v61, %v3274_v47  ;;  %v3703_v49 = vunpack.c.l.b16 %v3634_v56  ;;  %v4399_v25 = vrot.slane %v4397_v18, 4  ;;  %v3123_v28 = vrot.slane %v3121_v9, 5  ;;  %v6545_v56 = vld [vmem:[#allocation8 + $0x1a8] sm:$0xff] }
 0x24e   : > { %v8089_v23 = vpack.c.b16 %v5118_v40, %v5117_v22  ;;  %v4385_v40 = vsel %vm7157_vm7, %v4380_v6, %v8035_v54  ;;  %v3120_v22 = vrot.slane %v3118_v13, 4  ;;  %v3137_v60 = vshll.u32 %v8061_v31, 16  ;;  %v8109_v13 = vld [vmem:[#allocation2 + $0xa4] sm:$0x1]  ;;  %v3499_v31 = vld [vmem:[#allocation2 + $0x9c] sm:$0xe]  ;;  %4109 = vmatpush.bf16.msra.mxu3 %v6545_v56 }
 0x24f   : > { %v8083_v11 = vpop.f32.mrf.mxu3  ;;  %v4402_v20 = vrot.slane %v4400_v5, 5  ;;  %v3702_v30 = vunpack.c.l.b16 %v3631_v44  ;;  %v4686_v15 = vunpack.c.l.b16 %v4395_v1  ;;  %v8106_v0 = vrot.slane %v4406_v63, 5 }
 0x250   : > { %9244 = vst [vmem:[#allocation61_spill] sm:$0xff] %v8089_v23  ;;  %v4412_v61 = vrot.slane %v4410_v19, 4  ;;  %v2264_v47 = vunpack.c.l.b16 %v8067_v50  ;;  %v3135_v51 = vrot.slane %v3134_v41, 4  ;;  %v3637_v54 = vrot.slane %v2842_v39, 5 }
 0x251   : > { %v3723_v6 = vpack.c.b16 %v3703_v49, %v3702_v30  ;;  %v4685_v18 = vunpack.c.l.b16 %v4385_v40  ;;  %v6002_v5 = vrot.slane %v2082_v3, 9  ;;  %v9248_v9 = vunpack.c.l.b16 %v8051_v62  ;;  %v6695_v40 = vld [vmem:[#allocation2 + $0x38] sm:$0x1] }
 0x252   : > { %v8091_v43 = vpop.f32.mrf.mxu1  ;;  %v3124_v63 = vor.u32 %v3123_v28, %v3120_v22  ;;  %v3139_v19 = vrot.slane %v3137_v60, 5  ;;  %v4403_v1 = vor.u32 %v4402_v20, %v4399_v25  ;;  %v4413_v41 = vor.u32 %v4412_v61, %v8106_v0 }
 0x253   : > { %9245 = vst [vmem:[#allocation62_spill] sm:$0xff] %v8091_v43  ;;  %v8115_v44 = vpack.c.b16 %v9248_v9, %v2264_v47  ;;  %v4713_v50 = vpack.c.b16 %v4686_v15, %v4685_v18  ;;  %v2161_v49 = vrot.slane %v2159_v26, 4  ;;  %v2162_v30 = vrot.slane %v6695_v40, 5  ;;  %v8126_v18 = vpop.f32.mrf.mxu2  ;;  %v8128_v9 = vpop.f32.mrf.mxu0 }
 0x254   : > { %2388 = vmatmul.bf16.gmra.mxu3 %v2292_v21  ;;  %v3140_v3 = vsel %vm7157_vm7, %v3135_v51, %v3139_v19  ;;  %v6186_v56 = vrot.slane %v3499_v31, 9  ;;  %v3639_v62 = vrot.slane %v3637_v54, 4  ;;  %v3640_v47 = vrot.slane %v8109_v13, 5  ;;  %9250 = vst [vmem:[#allocation66_spill] sm:$0xff] %v8126_v18  ;;  %v4246_v19 = vld [vmem:[#allocation2 + $0x60] sm:$0xf] }
 0x255   : > { %3424 = vmatmul.bf16.gmra.mxu1 %v3296_v46  ;;  %v2841_v46 = vld [vmem:[#allocation2 + $0x9c] sm:$0xf]  ;;  %v3151_v25 = vshll.u32 %v2842_v39, 16  ;;  %v3155_v60 = vshrl.u32 %v2842_v39, 16  ;;  %v3125_v20 = vrot.slane %v3124_v63, 4  ;;  %v4404_v15 = vrot.slane %v4403_v1, 4 }
 0x256   : > { %v3142_v22 = vshrl.u32 %v2841_v46, 16  ;;  %v3145_v28 = vshll.u32 %v2841_v46, 16  ;;  %v4416_v61 = vshll.u32 %v7874_v7, 16  ;;  %9251 = vst [vmem:[#allocation67_spill] sm:$0xff] %v8128_v9  ;;  %v4414_v51 = vrot.slane %v4413_v41, 4  ;;  %v6561_v63 = vld [vmem:[#allocation8 + $0x228] sm:$0xff] }
 0x257   : > { %v8111_v21 = vpop.f32.mrf.mxu3  ;;  %3855 = vmatmul.bf16.gmra.mxu2 %v3723_v6  ;;  %v2160_v6 = vsel %vm7449_vm14, %v6002_v5, %v2159_v26  ;;  %v2163_v31 = vsel %vm7449_vm14, %v2161_v49, %v2162_v30  ;;  %v4430_v46 = vshll.u32 %v7892_v8, 16  ;;  %v4434_v39 = vshrl.u32 %v7892_v8, 16  ;;  %5217 = vmatpush.bf16.msra.mxu1 %v6561_v63  ;;  %v8143_v30 = vld [vmem:[#allocation2 + $0x7c] sm:$0xf] }
 0x258   : > { %v3130_v7 = vsel %vm7157_vm7, %v3125_v20, %v8081_v37  ;;  %v3277_v26 = vunpack.c.l.b16 %v3140_v3  ;;  %v3638_v5 = vsel %vm7449_vm14, %v6186_v56, %v3637_v54  ;;  %v3641_v1 = vsel %vm7449_vm14, %v3639_v62, %v3640_v47 }
 0x259   : > { %v3147_v41 = vrot.slane %v3145_v28, 5  ;;  %v8141_v49 = vrot.slane %v3151_v25, 5  ;;  %v3157_v40 = vrot.slane %v3155_v60, 4  ;;  %v4409_v37 = vsel %vm7157_vm7, %v4404_v15, %v8106_v0 }
 0x25a   : > { %v8118_v43 = vpop.f32.mrf.mxu1  ;;  %v4418_v3 = vrot.slane %v4416_v61, 5  ;;  %v2267_v20 = vunpack.c.l.b16 %v2163_v31  ;;  %v4421_v54 = vshrl.u32 %v4246_v19, 16  ;;  %v3276_v56 = vunpack.c.l.b16 %v3130_v7 }
 0x25b   : > { %9249 = vst [vmem:[#allocation65_spill] sm:$0xff] %v8118_v43  ;;  %v4424_v9 = vshll.u32 %v4246_v19, 16  ;;  %v8150_v62 = vrot.slane %v4430_v46, 5  ;;  %v4436_v47 = vrot.slane %v4434_v39, 4  ;;  %v3704_v28 = vunpack.c.l.b16 %v3638_v5  ;;  %v6696_v19 = vld [vmem:[#allocation2 + $0x40] sm:$0xf] }
 0x25c   : > { %4817 = vmatmul.bf16.gmra.mxu0 %v4713_v50  ;;  %v3144_v50 = vrot.slane %v3142_v22, 4  ;;  %v3705_v25 = vunpack.c.l.b16 %v3641_v1  ;;  %v4419_v60 = vsel %vm7157_vm7, %v4414_v51, %v4418_v3  ;;  %v9165_v63 = vrot.slane %v8143_v30, 5  ;;  %v2083_v1 = vld [vmem:[#allocation2 + $0x3c] sm:$0xe] }
 0x25d   : > { %v3297_v43 = vpack.c.b16 %v3277_v26, %v3276_v56  ;;  %v3158_v0 = vor.u32 %v3157_v40, %v8141_v49  ;;  %v3161_v15 = vshll.u32 %v8109_v13, 16  ;;  %v2266_v61 = vunpack.c.l.b16 %v2160_v6  ;;  %v8162_v26 = vld [vmem:[#allocation2 + $0x80] sm:$0x1]  ;;  %v2845_v13 = vld [vmem:[#allocation2 + $0xac] sm:$0xf] }
 0x25e   : > { %v3148_v53 = vor.u32 %v3147_v41, %v3144_v50  ;;  %v4423_v31 = vrot.slane %v4421_v54, 4  ;;  %v2166_v46 = vrot.slane %v6696_v19, 5  ;;  %v4688_v39 = vunpack.c.l.b16 %v4419_v60  ;;  %v4249_v6 = vld [vmem:[#allocation2 + $0x6c] sm:$0xf] }
 0x25f   : > { %v8145_v8 = vpop.f32.mrf.mxu3  ;;  %v4426_v7 = vrot.slane %v4424_v9, 5  ;;  %v4437_v5 = vor.u32 %v4436_v47, %v8150_v62  ;;  %v4440_v51 = vshll.u32 %v7915_v17, 16  ;;  %v3724_v50 = vpack.c.b16 %v3705_v25, %v3704_v28  ;;  %v3500_v17 = vld [vmem:[#allocation2 + $0xa8] sm:$0xe]  ;;  %v8174_v28 = vld [vmem:[#allocation2 + $0xb0] sm:$0x1] }
 0x260   : > { %v4687_v41 = vunpack.c.l.b16 %v4409_v37  ;;  %v8164_v40 = vpack.c.b16 %v2267_v20, %v2266_v61  ;;  %v5034_v3 = vrot.slane %v9165_v63, 4  ;;  %v3149_v9 = vrot.slane %v3148_v53, 4  ;;  %v6697_v25 = vld [vmem:[#allocation2 + $0x44] sm:$0x1]  ;;  %v2844_v53 = vld [vmem:[#allocation2 + $0xa8] sm:$0xf] }
 0x261   : > { %v3159_v54 = vrot.slane %v3158_v0, 4  ;;  %v3163_v56 = vrot.slane %v3161_v15, 5  ;;  %v3644_v47 = vrot.slane %v2845_v13, 5  ;;  %v6003_v37 = vrot.slane %v2083_v1, 9 }
 0x262   : > { %v8152_v22 = vpop.f32.mrf.mxu1  ;;  %v2168_v20 = vrot.slane %v2166_v46, 4  ;;  %v2169_v61 = vrot.slane %v6697_v25, 5  ;;  %v5035_v19 = vrot.slane %v8162_v26, 5  ;;  %v4714_v63 = vpack.c.b16 %v4688_v39, %v4687_v41 }
 0x263   : > { %9252 = vst [vmem:[#allocation68_spill] sm:$0xff] %v8152_v22  ;;  %v4427_v22 = vor.u32 %v4426_v7, %v4423_v31  ;;  %v6187_v15 = vrot.slane %v3500_v17, 9  ;;  %v4445_v18 = vshrl.u32 %v4249_v6, 16  ;;  %v4448_v35 = vshll.u32 %v4249_v6, 16 }
 0x264   : > { %2393 = vmatmul.bf16.gmra.mxu3 %v8115_v44  ;;  %v8168_v44 = vpop.f32.mrf.mxu2  ;;  %v8181_v23 = vsel %vm7449_vm14, %v5034_v3, %v5035_v19  ;;  %v3154_v1 = vsel %vm7157_vm7, %v3149_v9, %v8141_v49  ;;  %v3164_v39 = vsel %vm7157_vm7, %v3159_v54, %v3163_v56  ;;  %v3646_v31 = vrot.slane %v3644_v47, 4  ;;  %v2084_v19 = vld [vmem:[#allocation2 + $0x48] sm:$0xe] }
 0x265   : > { %3429 = vmatmul.bf16.gmra.mxu1 %v3297_v43  ;;  %9253 = vst [vmem:[#allocation69_spill] sm:$0xff] %v8168_v44  ;;  %v8170_v43 = vpop.f32.mrf.mxu0  ;;  %v4438_v44 = vrot.slane %v4437_v5, 4  ;;  %v3647_v7 = vrot.slane %v8174_v28, 5  ;;  %v3166_v5 = vshrl.u32 %v2844_v53, 16  ;;  %v3179_v41 = vshrl.u32 %v2845_v13, 16 }
 0x266   : > { %9254 = vst [vmem:[#allocation70_spill] sm:$0xff] %v8170_v43  ;;  %v4442_v43 = vrot.slane %v4440_v51, 5  ;;  %v3169_v51 = vshll.u32 %v2844_v53, 16  ;;  %v4428_v6 = vrot.slane %v4427_v22, 4  ;;  %v2167_v17 = vsel %vm7449_vm14, %v6003_v37, %v2166_v46 }
 0x267   : > { %v8172_v60 = vpop.f32.mrf.mxu3  ;;  %3860 = vmatmul.bf16.gmra.mxu2 %v3724_v50  ;;  %v3175_v50 = vshll.u32 %v2845_v13, 16  ;;  %v2170_v49 = vsel %vm7449_vm14, %v2168_v20, %v2169_v61  ;;  %v4447_v9 = vrot.slane %v4445_v18, 4  ;;  %v4450_v54 = vrot.slane %v4448_v35, 5 }
 0x268   : > { %v4443_v3 = vsel %vm7157_vm7, %v4438_v44, %v4442_v43  ;;  %v4454_v56 = vshll.u32 %v7982_v4, 16  ;;  %v4458_v25 = vshrl.u32 %v7982_v4, 16  ;;  %v3278_v53 = vunpack.c.l.b16 %v3154_v1 }
 0x269   : > { %v3279_v13 = vunpack.c.l.b16 %v3164_v39  ;;  %v3645_v22 = vsel %vm7449_vm14, %v6187_v15, %v3644_v47  ;;  %v3168_v46 = vrot.slane %v3166_v5, 4  ;;  %v3171_v43 = vrot.slane %v3169_v51, 5 }
 0x26a   : > { %v8177_v0 = vpop.f32.mrf.mxu1  ;;  %v8203_v37 = vrot.slane %v3175_v50, 5  ;;  %v3181_v35 = vrot.slane %v3179_v41, 4  ;;  %v4433_v4 = vsel %vm7157_vm7, %v4428_v6, %v8150_v62  ;;  %v2268_v61 = vunpack.c.l.b16 %v2167_v17 }
 0x26b   : > { %9255 = vst [vmem:[#allocation71_spill] sm:$0xff] %v8177_v0  ;;  %v2269_v47 = vunpack.c.l.b16 %v2170_v49  ;;  %v6004_v15 = vrot.slane %v2084_v19, 9  ;;  %v4690_v1 = vunpack.c.l.b16 %v4443_v3  ;;  %v4451_v39 = vor.u32 %v4450_v54, %v4447_v9  ;;  %v6699_v3 = vld [vmem:[#allocation2 + $0x50] sm:$0x1]  ;;  %v6544_v49 = vld [vmem:[#allocation8 + $0x1a0] sm:$0xff] }
 0x26c   : > { %4822 = vmatmul.bf16.gmra.mxu0 %v4714_v63  ;;  %v3648_v63 = vsel %vm7449_vm14, %v3646_v31, %v3647_v7  ;;  %v8205_v18 = vpop.f32.mrf.mxu2  ;;  %v8212_v31 = vrot.slane %v4454_v56, 5  ;;  %v6698_v7 = vld [vmem:[#allocation2 + $0x4c] sm:$0xf]  ;;  %v3298_v50 = vpack.c.b16 %v3279_v13, %v3278_v53  ;;  %v3706_v41 = vunpack.c.l.b16 %v3645_v22  ;;  %v2848_v54 = vld [vmem:[#allocation2 + $0xb8] sm:$0xf]  ;;  %4110 = vmatpush.bf16.msra.mxu3 %v6544_v49 }
 0x26d   : > { %9256 = vst [vmem:[#allocation72_spill] sm:$0xff] %v8205_v18  ;;  %v8207_v20 = vpop.f32.mrf.mxu0  ;;  %v2173_v5 = vrot.slane %v6698_v7, 5  ;;  %v3707_v0 = vunpack.c.l.b16 %v3648_v63  ;;  %v4460_v18 = vrot.slane %v4458_v25, 4  ;;  %v3172_v34 = vor.u32 %v3171_v43, %v3168_v46  ;;  %v2847_v13 = vld [vmem:[#allocation2 + $0xb4] sm:$0xf] }
 0x26e   : > { %9257 = vst [vmem:[#allocation73_spill] sm:$0xff] %v8207_v20  ;;  %v4689_v20 = vunpack.c.l.b16 %v4433_v4  ;;  %v3182_v59 = vor.u32 %v3181_v35, %v8203_v37  ;;  %v3185_v62 = vshll.u32 %v8174_v28, 16  ;;  %v8219_v6 = vpack.c.b16 %v2269_v47, %v2268_v61  ;;  %v3501_v4 = vld [vmem:[#allocation2 + $0xb4] sm:$0xe] }
 0x26f   : > { %v8201_v44 = vpop.f32.mrf.mxu3  ;;  %v2176_v17 = vrot.slane %v6699_v3, 5  ;;  %v8221_v56 = vrot.slane %v4451_v39, 4  ;;  %v8225_v25 = vsel %vm7449_vm14, %v6004_v15, %v2173_v5  ;;  %v2175_v19 = vrot.slane %v2173_v5, 4 }
 0x270   : > { %v4715_v9 = vpack.c.b16 %v4690_v1, %v4689_v20  ;;  %v3725_v53 = vpack.c.b16 %v3707_v0, %v3706_v41  ;;  %v4461_v28 = vor.u32 %v4460_v18, %v8212_v31  ;;  %v4478_v22 = vshll.u32 %v8143_v30, 16  ;;  %v8233_v0 = vld [vmem:[#allocation2 + $0xbc] sm:$0x1] }
 0x271   : > { %v4482_v63 = vshrl.u32 %v8143_v30, 16  ;;  %v3173_v43 = vrot.slane %v3172_v34, 4  ;;  %v3183_v35 = vrot.slane %v3182_v59, 4  ;;  %v3187_v20 = vrot.slane %v3185_v62, 5 }
 0x272   : > { %v8214_v51 = vpop.f32.mrf.mxu1  ;;  %v3651_v61 = vrot.slane %v2848_v54, 5  ;;  %v4464_v18 = vshll.u32 %v8009_v45, 16  ;;  %v3199_v15 = vshll.u32 %v2848_v54, 16  ;;  %v3203_v1 = vshrl.u32 %v2848_v54, 16 }
 0x273   : > { %9258 = vst [vmem:[#allocation74_spill] sm:$0xff] %v8214_v51  ;;  %v3190_v39 = vshrl.u32 %v2847_v13, 16  ;;  %v3193_v7 = vshll.u32 %v2847_v13, 16  ;;  %v6188_v34 = vrot.slane %v3501_v4, 9  ;;  %v4462_v62 = vrot.slane %v4461_v28, 4 }
 0x274   : > { %2398 = vmatmul.bf16.gmra.mxu3 %v8164_v40  ;;  %v4252_v40 = vld [vmem:[#allocation2 + $0x78] sm:$0xf]  ;;  %v8236_v41 = vpop.f32.mrf.mxu2  ;;  %v8240_v3 = vrot.slane %v4478_v22, 5  ;;  %v3178_v49 = vsel %vm7157_vm7, %v3173_v43, %v8203_v37  ;;  %v3188_v45 = vsel %vm7157_vm7, %v3183_v35, %v3187_v20  ;;  %v3653_v54 = vrot.slane %v3651_v61, 4 }
 0x275   : > { %3434 = vmatmul.bf16.gmra.mxu1 %v3298_v50  ;;  %v4469_v5 = vshrl.u32 %v4252_v40, 16  ;;  %v4472_v50 = vshll.u32 %v4252_v40, 16  ;;  %9259 = vst [vmem:[#allocation75_spill] sm:$0xff] %v8236_v41  ;;  %v8238_v59 = vpop.f32.mrf.mxu0  ;;  %v2177_v40 = vsel %vm7449_vm14, %v2175_v19, %v2176_v17  ;;  %v2270_v28 = vunpack.c.l.b16 %v8225_v25  ;;  %v6556_v41 = vld [vmem:[#allocation8 + $0x200] sm:$0xff] }
 0x276   : > { %9260 = vst [vmem:[#allocation76_spill] sm:$0xff] %v8238_v59  ;;  %v8253_v22 = vrot.slane %v3199_v15, 5  ;;  %v4457_v37 = vsel %vm7157_vm7, %v8221_v56, %v8212_v31  ;;  %v4466_v43 = vrot.slane %v4464_v18, 5  ;;  %v3192_v35 = vrot.slane %v3190_v39, 4  ;;  %v4918_v56 = vld [vmem:[#allocation2 + $0x78] sm:$0xe] }
 0x277   : > { %v2058_v46 = vpop.f32.mrf.mxu3  ;;  %3865 = vmatmul.bf16.gmra.mxu2 %v3725_v53  ;;  %v3654_v53 = vrot.slane %v8233_v0, 5  ;;  %v3195_v20 = vrot.slane %v3193_v7, 5  ;;  %v3280_v4 = vunpack.c.l.b16 %v3178_v49  ;;  %v3281_v59 = vunpack.c.l.b16 %v3188_v45  ;;  %v8271_v7 = vld [vmem:[#allocation2 + $0xc4] sm:$0xf]  ;;  %v8275_v49 = vld [vmem:[#allocation2 + $0x58] sm:$0xf] }
 0x278   : > { %v8231_v47 = vadd.f32 %v2058_v46, %v7976_v38  ;;  %v4484_v38 = vrot.slane %v4482_v63, 4  ;;  %v3205_v63 = vrot.slane %v3203_v1, 4  ;;  %v6560_v46 = vld [vmem:[#allocation8 + $0x220] sm:$0xff]  ;;  %v3652_v25 = vsel %vm7449_vm14, %v6188_v34, %v3651_v61 }
 0x279   : > { %5218 = vmatpush.bf16.msra.mxu1 %v6560_v46  ;;  %v3655_v19 = vsel %vm7449_vm14, %v3653_v54, %v3654_v53  ;;  %v4467_v15 = vsel %vm7157_vm7, %v4462_v62, %v4466_v43  ;;  %v3209_v39 = vshll.u32 %v8233_v0, 16  ;;  %v4488_v61 = vshll.u32 %v8162_v26, 16  ;;  %v8278_v54 = vld [vmem:[#allocation2 + $0xc8] sm:$0x1]  ;;  %v3502_v53 = vld [vmem:[#allocation2 + $0xc0] sm:$0xe] }
 0x27a   : > { %v8248_v13 = vpop.f32.mrf.mxu1  ;;  %v4485_v31 = vor.u32 %v4484_v38, %v8240_v3  ;;  %v3206_v1 = vor.u32 %v3205_v63, %v8253_v22  ;;  %v3658_v34 = vrot.slane %v8271_v7, 5  ;;  %v9166_v62 = vrot.slane %v8275_v49, 5 }
 0x27b   : > { %9261 = vst [vmem:[#allocation77_spill] sm:$0xff] %v8248_v13  ;;  %v4474_v13 = vrot.slane %v4472_v50, 5  ;;  %v3196_v50 = vor.u32 %v3195_v20, %v3192_v35  ;;  %v3299_v38 = vpack.c.b16 %v3281_v59, %v3280_v4  ;;  %v3708_v45 = vunpack.c.l.b16 %v3652_v25  ;;  %v6559_v4 = vld [vmem:[#allocation8 + $0x218] sm:$0xff] }
 0x27c   : > { %4827 = vmatmul.bf16.gmra.mxu0 %v4715_v9  ;;  %v4471_v9 = vrot.slane %v4469_v5, 4  ;;  %v2271_v5 = vunpack.c.l.b16 %v2177_v40  ;;  %v6358_v63 = vrot.slane %v4918_v56, 9  ;;  %v4691_v0 = vunpack.c.l.b16 %v4457_v37  ;;  %v8282_v26 = vpop.f32.mrf.mxu2 }
 0x27d   : > { %v4692_v46 = vunpack.c.l.b16 %v4467_v15  ;;  %9262 = vst [vmem:[#allocation78_spill] sm:$0xff] %v8282_v26  ;;  %v8284_v40 = vpop.f32.mrf.mxu0  ;;  %v3207_v35 = vrot.slane %v3206_v1, 4  ;;  %v3211_v59 = vrot.slane %v3209_v39, 5  ;;  %v8287_v20 = vrot.slane %v4488_v61, 5  ;;  %5219 = vmatpush.bf16.msra.mxu1 %v6559_v4  ;;  %v6558_v4 = vld [vmem:[#allocation8 + $0x210] sm:$0xff] }
 0x27e   : > { %v4475_v43 = vor.u32 %v4474_v13, %v4471_v9  ;;  %9263 = vst [vmem:[#allocation79_spill] sm:$0xff] %v8284_v40  ;;  %v9264_v25 = vrot.slane %v8143_v30, 5  ;;  %v3197_v13 = vrot.slane %v3196_v50, 4  ;;  %v6189_v9 = vrot.slane %v3502_v53, 9  ;;  %v6557_v50 = vld [vmem:[#allocation8 + $0x208] sm:$0xff] }
 0x27f   : > { %v2060_v17 = vpop.f32.mrf.mxu3  ;;  %v3661_v15 = vrot.slane %v8278_v54, 5  ;;  %v8298_v1 = vpack.c.b16 %v2271_v5, %v2270_v28  ;;  %v5120_v39 = vunpack.c.l.b16 %v8181_v23  ;;  %v4716_v30 = vpack.c.b16 %v4692_v46, %v4691_v0 }
 0x280   : > { %v8267_v18 = vadd.f32 %v2060_v17, %v8011_v2  ;;  %v3709_v2 = vunpack.c.l.b16 %v3655_v19  ;;  %v8280_v17 = vrot.slane %v4485_v31, 4  ;;  %v5033_v37 = vsel %vm7449_vm14, %v6358_v63, %v9264_v25  ;;  %v8294_v31 = vld [vmem:[#allocation2 + $0x88] sm:$0xf]  ;;  %v2850_v63 = vld [vmem:[#allocation2 + $0xc0] sm:$0xf] }
 0x281   : > { %v3660_v19 = vrot.slane %v3658_v34, 4  ;;  %v8309_v53 = vrot.slane %v9166_v62, 4  ;;  %v3212_v23 = vsel %vm7157_vm7, %v3207_v35, %v3211_v59  ;;  %v3202_v0 = vsel %vm7157_vm7, %v3197_v13, %v8253_v22  ;;  %v8329_v35 = vld [vmem:[#allocation2 + $0x8c] sm:$0x1]  ;;  %v8331_v59 = vld [vmem:[#allocation2 + $0x94] sm:$0xf]  ;;  %5220 = vmatpush.bf16.msra.mxu1 %v6558_v4 }
 0x282   : > { %v8296_v56 = vpop.f32.mrf.mxu1  ;;  %v8322_v46 = vsel %vm7449_vm14, %v6189_v9, %v3658_v34  ;;  %v3214_v25 = vshrl.u32 %v2850_v63, 16  ;;  %v4920_v13 = vld [vmem:[#allocation2 + $0x90] sm:$0xe]  ;;  %v3283_v34 = vunpack.c.l.b16 %v3212_v23  ;;  %v4921_v4 = vld [vmem:[#allocation2 + $0x9c] sm:$0xe] }
 0x283   : > { %9265 = vst [vmem:[#allocation80_spill] sm:$0xff] %v8296_v56  ;;  %v3710_v62 = vunpack.c.l.b16 %v8322_v46  ;;  %v8352_v56 = vld [vmem:[#allocation2 + $0xa4] sm:$0x1] }
 0x284   : > { %2403 = vmatmul.bf16.gmra.mxu3 %v8219_v6  ;;  %v3726_v6 = vpack.c.b16 %v3709_v2, %v3708_v45  ;;  %v5119_v45 = vunpack.c.l.b16 %v5033_v37  ;;  %v4919_v2 = vld [vmem:[#allocation2 + $0x84] sm:$0xe]  ;;  %v3217_v37 = vshll.u32 %v2850_v63, 16  ;;  %v8340_v63 = vld [vmem:[#allocation2 + $0x98] sm:$0x1]  ;;  %v8346_v9 = vpop.f32.mrf.mxu2 }
 0x285   : > { %3439 = vmatmul.bf16.gmra.mxu1 %v3299_v38  ;;  %v8301_v38 = vrot.slane %v4475_v43, 4  ;;  %v3223_v43 = vshll.u32 %v8271_v7, 16  ;;  %9267 = vst [vmem:[#allocation82_spill] sm:$0xff] %v8346_v9  ;;  %v5049_v9 = vrot.slane %v8340_v63, 5 }
 0x286   : > { %v8334_v22 = vpack.c.b16 %v5120_v39, %v5119_v45  ;;  %v5042_v45 = vrot.slane %v8329_v35, 5  ;;  %v3219_v46 = vrot.slane %v3217_v37, 5  ;;  %5221 = vmatpush.bf16.msra.mxu1 %v6557_v50 }
 0x287   : > { %v2063_v61 = vpop.f32.mrf.mxu3  ;;  %3870 = vmatmul.bf16.gmra.mxu2 %v3726_v6  ;;  %v3227_v6 = vshrl.u32 %v8271_v7, 16  ;;  %v5046_v7 = vrot.slane %v8331_v59, 5 }
 0x288   : > { %v8312_v28 = vadd.f32 %v2063_v61, %v8046_v57  ;;  %v8326_v57 = vsel %vm7449_vm14, %v3660_v19, %v3661_v15  ;;  %v6359_v19 = vrot.slane %v4919_v2, 9  ;;  %v5039_v15 = vrot.slane %v8294_v31, 5 }
 0x289   : > { %v3282_v61 = vunpack.c.l.b16 %v3202_v0  ;;  %v3711_v5 = vunpack.c.l.b16 %v8326_v57  ;;  %v6360_v2 = vrot.slane %v4920_v13, 9  ;;  %v3216_v0 = vrot.slane %v3214_v25, 4 }
 0x28a   : > { %9266 = vst [vmem:[#allocation81_spill] sm:$0xff] %v8312_v28  ;;  %v5040_v39 = vsel %vm7449_vm14, %v6359_v19, %v5039_v15  ;;  %v5041_v23 = vrot.slane %v5039_v15, 4  ;;  %v8350_v57 = vrot.slane %v3223_v43, 5  ;;  %v3229_v40 = vrot.slane %v3227_v6, 4  ;;  %v8359_v26 = vpop.f32.mrf.mxu1  ;;  %v8364_v43 = vld [vmem:[#allocation2 + $0xa0] sm:$0xf]  ;;  %5222 = vmatpush.bf16.msra.mxu1 %v6556_v41 }
 0x28b   : > { %v5047_v13 = vsel %vm7449_vm14, %v6360_v2, %v5046_v7  ;;  %v5048_v15 = vrot.slane %v5046_v7, 4  ;;  %9269 = vst [vmem:[#allocation84_spill] sm:$0xff] %v8359_v26  ;;  %v5121_v37 = vunpack.c.l.b16 %v5040_v39  ;;  %v3300_v50 = vpack.c.b16 %v3283_v34, %v3282_v61  ;;  %v4255_v26 = vld [vmem:[#allocation2 + $0x84] sm:$0xf] }
 0x28c   : > { %4832 = vmatmul.bf16.gmra.mxu0 %v4716_v30  ;;  %v8348_v30 = vpop.f32.mrf.mxu0  ;;  %v5043_v19 = vsel %vm7449_vm14, %v5041_v23, %v5042_v45  ;;  %v5053_v45 = vrot.slane %v8364_v43, 5  ;;  %v5056_v7 = vrot.slane %v8352_v56, 5  ;;  %v3233_v2 = vshll.u32 %v8278_v54, 16 }
 0x28d   : > { %9268 = vst [vmem:[#allocation83_spill] sm:$0xff] %v8348_v30  ;;  %v5122_v6 = vunpack.c.l.b16 %v5043_v19  ;;  %v6361_v30 = vrot.slane %v4921_v4, 9  ;;  %v5050_v23 = vsel %vm7449_vm14, %v5048_v15, %v5049_v9  ;;  %v3230_v39 = vor.u32 %v3229_v40, %v8350_v57  ;;  %v6701_v9 = vld [vmem:[#allocation2 + $0x5c] sm:$0x1]  ;;  %v6543_v19 = vld [vmem:[#allocation8 + $0x198] sm:$0xff] }
 0x28e   : > { %v5055_v61 = vrot.slane %v5053_v45, 4  ;;  %v4481_v54 = vsel %vm7157_vm7, %v8301_v38, %v8240_v3  ;;  %v2183_v4 = vrot.slane %v6701_v9, 5  ;;  %v9271_v41 = vsel %vm7157_vm7, %v8280_v17, %v8287_v20  ;;  %4111 = vmatpush.bf16.msra.mxu3 %v6543_v19  ;;  %v4922_v19 = vld [vmem:[#allocation2 + $0xa8] sm:$0xe] }
 0x28f   : > { %v2065_v51 = vpop.f32.mrf.mxu3  ;;  %v8371_v28 = vpack.c.b16 %v5122_v6, %v5121_v37  ;;  %v5054_v34 = vsel %vm7449_vm14, %v6361_v30, %v5053_v45  ;;  %v4694_v40 = vunpack.c.l.b16 %v9271_v41  ;;  %v2085_v30 = vld [vmem:[#allocation2 + $0x54] sm:$0xe]  ;;  %v3727_v37 = vpack.c.b16 %v3711_v5, %v3710_v62  ;;  %v8398_v45 = vld [vmem:[#allocation2 + $0xb0] sm:$0x1]  ;;  %v8401_v62 = vpop.f32.mrf.mxu2 }
 0x290   : > { %v8362_v25 = vadd.f32 %v2065_v51, %v8083_v11  ;;  %v5123_v11 = vunpack.c.l.b16 %v5047_v13  ;;  %v5124_v51 = vunpack.c.l.b16 %v5050_v23  ;;  %v5057_v15 = vsel %vm7449_vm14, %v5055_v61, %v5056_v7  ;;  %v8396_v23 = vld [vmem:[#allocation2 + $0xac] sm:$0xf] }
 0x291   : > { %v9272_v3 = vshll.u32 %v8294_v31, 16  ;;  %v9273_v6 = vshrl.u32 %v8294_v31, 16  ;;  %v5126_v17 = vunpack.c.l.b16 %v5057_v15  ;;  %v5060_v7 = vrot.slane %v8396_v23, 5 }
 0x292   : > { %9270 = vst [vmem:[#allocation85_spill] sm:$0xff] %v8362_v25  ;;  %v3220_v25 = vor.u32 %v3219_v46, %v3216_v0  ;;  %v8381_v13 = vpack.c.b16 %v5124_v51, %v5123_v11  ;;  %v5125_v0 = vunpack.c.l.b16 %v5054_v34  ;;  %v4496_v46 = vshll.u32 %v4255_v26, 16  ;;  %v8414_v15 = vpop.f32.mrf.mxu1 }
 0x293   : > { %v8392_v38 = vrot.slane %v9272_v3, 5  ;;  %v3235_v51 = vrot.slane %v3233_v2, 5  ;;  %v4693_v31 = vunpack.c.l.b16 %v4481_v54  ;;  %v6005_v61 = vrot.slane %v2085_v30, 9 }
 0x294   : > { %2408 = vmatmul.bf16.gmra.mxu3 %v8298_v1  ;;  %v4493_v1 = vshrl.u32 %v4255_v26, 16  ;;  %v3221_v11 = vrot.slane %v3220_v25, 4  ;;  %v3231_v26 = vrot.slane %v3230_v39, 4  ;;  %v8403_v5 = vpop.f32.mrf.mxu0  ;;  %v8408_v9 = vpack.c.b16 %v5126_v17, %v5125_v0 }
 0x295   : > { %3444 = vmatmul.bf16.gmra.mxu1 %v3300_v50  ;;  %v4508_v50 = vrot.slane %v9273_v6, 4  ;;  %9274 = vst [vmem:[#allocation86_spill] sm:$0xff] %v8403_v5  ;;  %v2184_v25 = vsel %vm7449_vm14, %v8309_v53, %v2183_v4  ;;  %v6362_v2 = vrot.slane %v4922_v19, 9  ;;  %v5062_v39 = vrot.slane %v5060_v7, 4  ;;  %v9292_v5 = vld [vmem:[#allocation54_spill] sm:$0xff] }
 0x296   : > { %v5063_v41 = vrot.slane %v8398_v45, 5  ;;  %v4717_v3 = vpack.c.b16 %v4694_v40, %v4693_v31  ;;  %v4495_v6 = vrot.slane %v4493_v1, 4  ;;  %v3226_v54 = vsel %vm7157_vm7, %v3221_v11, %v8350_v57 }
 0x297   : > { %v2068_v20 = vpop.f32.mrf.mxu3  ;;  %3875 = vmatmul.bf16.gmra.mxu2 %v3727_v37  ;;  %v4509_v37 = vor.u32 %v4508_v50, %v8392_v38  ;;  %v3236_v0 = vsel %vm7157_vm7, %v3231_v26, %v3235_v51  ;;  %v5061_v53 = vsel %vm7449_vm14, %v6362_v2, %v5060_v7  ;;  %v9275_v1 = vrot.slane %v8275_v49, 5 }
 0x298   : > { %v8406_v34 = vadd.f32 %v2068_v20, %v8111_v21  ;;  %v4498_v21 = vrot.slane %v4496_v46, 5  ;;  %v5064_v4 = vsel %vm7449_vm14, %v5062_v39, %v5063_v41  ;;  %v5127_v30 = vunpack.c.l.b16 %v5061_v53 }
 0x299   : > { %v5128_v40 = vunpack.c.l.b16 %v5064_v4  ;;  %v2181_v46 = vsel %vm7449_vm14, %v6005_v61, %v9275_v1  ;;  %v4512_v50 = vshll.u32 %v8329_v35, 16  ;;  %v2273_v57 = vunpack.c.l.b16 %v2184_v25  ;;  %v6702_v61 = vld [vmem:[#allocation2 + $0x64] sm:$0xf] }
 0x29a   : > { %v3284_v17 = vunpack.c.l.b16 %v3226_v54  ;;  %v3285_v20 = vunpack.c.l.b16 %v3236_v0  ;;  %v4499_v51 = vor.u32 %v4498_v21, %v4495_v6  ;;  %v4510_v7 = vrot.slane %v4509_v37, 4  ;;  %v4258_v54 = vld [vmem:[#allocation2 + $0x90] sm:$0xf]  ;;  %v8442_v21 = vpop.f32.mrf.mxu1 }
 0x29b   : > { %v8431_v11 = vpack.c.b16 %v5128_v40, %v5127_v30  ;;  %v2272_v19 = vunpack.c.l.b16 %v2181_v46  ;;  %v4514_v2 = vrot.slane %v4512_v50, 5  ;;  %v4526_v0 = vshll.u32 %v8331_v59, 16  ;;  %v8447_v30 = vld [vmem:[#allocation2 + $0xb8] sm:$0xf]  ;;  %v8449_v40 = vld [vmem:[#allocation2 + $0xbc] sm:$0x1] }
 0x29c   : > { %4837 = vmatmul.bf16.gmra.mxu0 %v4717_v3  ;;  %v8436_v39 = vpop.f32.mrf.mxu0  ;;  %v3301_v41 = vpack.c.b16 %v3285_v20, %v3284_v17  ;;  %v2187_v3 = vrot.slane %v6702_v61, 5  ;;  %v4500_v35 = vrot.slane %v4499_v51, 4  ;;  %v4530_v6 = vshrl.u32 %v8331_v59, 16  ;;  %v2086_v46 = vld [vmem:[#allocation2 + $0x60] sm:$0xe] }
 0x29d   : > { %9276 = vst [vmem:[#allocation87_spill] sm:$0xff] %v8436_v39  ;;  %v2297_v49 = vpack.c.b16 %v2273_v57, %v2272_v19  ;;  %v4515_v25 = vsel %vm7157_vm7, %v4510_v7, %v4514_v2  ;;  %v4517_v53 = vshrl.u32 %v4258_v54, 16  ;;  %v4520_v4 = vshll.u32 %v4258_v54, 16  ;;  %v4923_v51 = vld [vmem:[#allocation2 + $0xb4] sm:$0xe] }
 0x29e   : > { %v4696_v37 = vunpack.c.l.b16 %v4515_v25  ;;  %v2189_v50 = vrot.slane %v2187_v3, 4  ;;  %v4528_v57 = vrot.slane %v4526_v0, 5  ;;  %v4532_v59 = vrot.slane %v4530_v6, 4 }
 0x29f   : > { %v2070_v26 = vpop.f32.mrf.mxu3  ;;  %v5067_v17 = vrot.slane %v8447_v30, 5  ;;  %v6363_v19 = vrot.slane %v4923_v51, 9  ;;  %v6006_v61 = vrot.slane %v2086_v46, 9  ;;  %v4522_v25 = vrot.slane %v4520_v4, 5 }
 0x2a0   : > { %v8434_v31 = vadd.f32 %v2070_v26, %v8145_v8  ;;  %v4505_v8 = vsel %vm7157_vm7, %v4500_v35, %v8392_v38  ;;  %v6703_v38 = vld [vmem:[#allocation2 + $0x68] sm:$0x1]  ;;  %v4519_v35 = vrot.slane %v4517_v53, 4  ;;  %v4533_v0 = vor.u32 %v4532_v59, %v4528_v57 }
 0x2a1   : > { %v4695_v26 = vunpack.c.l.b16 %v4505_v8  ;;  %v2190_v7 = vrot.slane %v6703_v38, 5  ;;  %v5069_v2 = vrot.slane %v5067_v17, 4  ;;  %v4536_v53 = vshll.u32 %v8340_v63, 16 }
 0x2a2   : > { %v8467_v4 = vpop.f32.mrf.mxu1 }
 0x2a3   : > { %v2191_v54 = vsel %vm7449_vm14, %v2189_v50, %v2190_v7  ;;  %v4523_v50 = vor.u32 %v4522_v25, %v4519_v35  ;;  %v4261_v7 = vld [vmem:[#allocation2 + $0x9c] sm:$0xf]  ;;  %v4550_v25 = vshll.u32 %v8364_v43, 16 }
 0x2a4   : > { %2413 = vmatmul.bf16.gmra.mxu3 %v2297_v49  ;;  %v5070_v49 = vrot.slane %v8449_v40, 5  ;;  %v8462_v8 = vpop.f32.mrf.mxu0  ;;  %v2275_v46 = vunpack.c.l.b16 %v2191_v54  ;;  %v4541_v63 = vshrl.u32 %v4261_v7, 16  ;;  %v4544_v35 = vshll.u32 %v4261_v7, 16 }
 0x2a5   : > { %3449 = vmatmul.bf16.gmra.mxu1 %v3301_v41  ;;  %v4718_v41 = vpack.c.b16 %v4696_v37, %v4695_v26  ;;  %9277 = vst [vmem:[#allocation88_spill] sm:$0xff] %v8462_v8  ;;  %v2188_v37 = vsel %vm7449_vm14, %v6006_v61, %v2187_v3  ;;  %v4534_v26 = vrot.slane %v4533_v0, 4  ;;  %v6704_v3 = vld [vmem:[#allocation2 + $0x70] sm:$0xf] }
 0x2a6   : > { %v5071_v6 = vsel %vm7449_vm14, %v5069_v2, %v5070_v49  ;;  %v2274_v2 = vunpack.c.l.b16 %v2188_v37  ;;  %v4538_v49 = vrot.slane %v4536_v53, 5  ;;  %v2194_v61 = vrot.slane %v6704_v3, 5  ;;  %v2087_v53 = vld [vmem:[#allocation2 + $0x6c] sm:$0xe] }
 0x2a7   : > { %v2073_v1 = vpop.f32.mrf.mxu3  ;;  %v5130_v38 = vunpack.c.l.b16 %v5071_v6  ;;  %v4554_v6 = vshrl.u32 %v8364_v43, 16 }
 0x2a8   : > { %v8453_v20 = vadd.f32 %v2073_v1, %v8172_v60  ;;  %v5068_v60 = vsel %vm7449_vm14, %v6363_v19, %v5067_v17  ;;  %v6571_v1 = vld [vmem:[#allocation9 + $0x38] sm:$0xff]  ;;  %v4539_v54 = vsel %vm7157_vm7, %v4534_v26, %v4538_v49 }
 0x2a9   : > { %v5129_v51 = vunpack.c.l.b16 %v5068_v60  ;;  %5488 = vmatpush.bf16.msra.mxu2 %v6571_v1  ;;  %v4524_v60 = vrot.slane %v4523_v50, 4  ;;  %v4546_v50 = vrot.slane %v4544_v35, 5  ;;  %v4556_v26 = vrot.slane %v4554_v6, 4  ;;  %v4264_v6 = vld [vmem:[#allocation2 + $0xa8] sm:$0xf] }
 0x2aa   : > { %v8483_v7 = vpop.f32.mrf.mxu1 }
 0x2ab   : > { %v8469_v59 = vpack.c.b16 %v5130_v38, %v5129_v51  ;;  %v4529_v0 = vsel %vm7157_vm7, %v4524_v60, %v4528_v57  ;;  %v4698_v51 = vunpack.c.l.b16 %v4539_v54  ;;  %v2196_v38 = vrot.slane %v2194_v61, 4 }
 0x2ac   : > { %4842 = vmatmul.bf16.gmra.mxu0 %v4718_v41  ;;  %v2298_v41 = vpack.c.b16 %v2275_v46, %v2274_v2  ;;  %v8481_v1 = vpop.f32.mrf.mxu0  ;;  %v4543_v46 = vrot.slane %v4541_v63, 4  ;;  %v6705_v2 = vld [vmem:[#allocation2 + $0x74] sm:$0x1]  ;;  %v4560_v63 = vshll.u32 %v8352_v56, 16  ;;  %v4578_v56 = vshrl.u32 %v8396_v23, 16 }
 0x2ad   : > { %9278 = vst [vmem:[#allocation89_spill] sm:$0xff] %v8481_v1  ;;  %v2197_v49 = vrot.slane %v6705_v2, 5 }
 0x2ae   : > { %v4547_v3 = vor.u32 %v4546_v50, %v4543_v46  ;;  %v4574_v46 = vshll.u32 %v8396_v23, 16 }
 0x2af   : > { %v2075_v17 = vpop.f32.mrf.mxu3  ;;  %v2198_v60 = vsel %vm7449_vm14, %v2196_v38, %v2197_v49  ;;  %v4568_v38 = vshll.u32 %v4264_v6, 16 }
 0x2b0   : > { %v8472_v19 = vadd.f32 %v2075_v17, %v8201_v44  ;;  %v6542_v44 = vld [vmem:[#allocation8 + $0x190] sm:$0xff]  ;;  %v4552_v17 = vrot.slane %v4550_v25, 5  ;;  %v2277_v25 = vunpack.c.l.b16 %v2198_v60 }
 0x2b1   : > { %4112 = vmatpush.bf16.msra.mxu3 %v6542_v44  ;;  %v4548_v44 = vrot.slane %v4547_v3, 4  ;;  %v4570_v60 = vrot.slane %v4568_v38, 5  ;;  %v4576_v3 = vrot.slane %v4574_v46, 5 }
 0x2b2   : > { %v4557_v54 = vor.u32 %v4556_v26, %v4552_v17  ;;  %v8499_v50 = vpop.f32.mrf.mxu1 }
 0x2b3   : > { %v4553_v49 = vsel %vm7157_vm7, %v4548_v44, %v4552_v17 }
 0x2b4   : > { %2418 = vmatmul.bf16.gmra.mxu3 %v2298_v41  ;;  %v6007_v41 = vrot.slane %v2087_v53, 9 }
 0x2b5   : > { %5223 = vmatmul.bf16.vlgmr.msra.gmra.mxu1 %v7674_v16  ;;  %v4697_v16 = vunpack.c.l.b16 %v4529_v0  ;;  %v4558_v0 = vrot.slane %v4557_v54, 4  ;;  %v4580_v54 = vrot.slane %v4578_v56, 4  ;;  %v6570_v56 = vld [vmem:[#allocation9 + $0x30] sm:$0xff] }
 0x2b6   : > { %v2195_v35 = vsel %vm7449_vm14, %v6007_v41, %v2194_v61  ;;  %v6706_v61 = vld [vmem:[#allocation2 + $0x7c] sm:$0xf]  ;;  %5489 = vmatpush.bf16.msra.mxu2 %v6570_v56 }
 0x2b7   : > { %v2379_v37 = vpop.f32.mrf.mxu3  ;;  %v4719_v57 = vpack.c.b16 %v4698_v51, %v4697_v16  ;;  %v8495_v51 = vpop.f32.mrf.mxu0  ;;  %v2276_v53 = vunpack.c.l.b16 %v2195_v35  ;;  %v4565_v16 = vshrl.u32 %v4264_v6, 16  ;;  %v2201_v2 = vrot.slane %v6706_v61, 5  ;;  %v6707_v61 = vld [vmem:[#allocation2 + $0x80] sm:$0x1] }
 0x2b8   : > { %v8486_v43 = vadd.f32 %v2379_v37, %v7331_v58  ;;  %v4562_v37 = vrot.slane %v4560_v63, 5  ;;  %9279 = vst [vmem:[#allocation90_spill] sm:$0xff] %v8495_v51  ;;  %v4699_v63 = vunpack.c.l.b16 %v4553_v49  ;;  %v2204_v17 = vrot.slane %v6707_v61, 5 }
 0x2b9   : > { %v2299_v26 = vpack.c.b16 %v2277_v25, %v2276_v53  ;;  %v4567_v41 = vrot.slane %v4565_v16, 4  ;;  %v2203_v35 = vrot.slane %v2201_v2, 4  ;;  %v2088_v25 = vld [vmem:[#allocation2 + $0x78] sm:$0xe]  ;;  %v4581_v51 = vor.u32 %v4580_v54, %v4576_v3  ;;  %v4267_v54 = vld [vmem:[#allocation2 + $0xb4] sm:$0xf] }
 0x2ba   : > { %v6008_v16 = vrot.slane %v2088_v25, 9  ;;  %v8514_v46 = vpop.f32.mrf.mxu1  ;;  %v4592_v25 = vshll.u32 %v4267_v54, 16  ;;  %v4598_v61 = vshll.u32 %v8447_v30, 16 }
 0x2bb   : > { %v4571_v44 = vor.u32 %v4570_v60, %v4567_v41  ;;  %v2205_v38 = vsel %vm7449_vm14, %v2203_v35, %v2204_v17  ;;  %9280 = vst [vmem:[#allocation91_spill] sm:$0xff] %v8514_v46  ;;  %v6708_v17 = vld [vmem:[#allocation2 + $0x88] sm:$0xf] }
 0x2bc   : > { %4847 = vmatmul.bf16.gmra.mxu0 %v4719_v57  ;;  %v4563_v57 = vsel %vm7157_vm7, %v4558_v0, %v4562_v37  ;;  %v4584_v0 = vshll.u32 %v8398_v45, 16  ;;  %v4600_v56 = vrot.slane %v4598_v61, 5 }
 0x2bd   : > { %v4700_v23 = vunpack.c.l.b16 %v4563_v57  ;;  %v4572_v49 = vrot.slane %v4571_v44, 4  ;;  %v4582_v57 = vrot.slane %v4581_v51, 4  ;;  %v4602_v51 = vshrl.u32 %v8447_v30, 16 }
 0x2be   : > { %v4586_v41 = vrot.slane %v4584_v0, 5  ;;  %v2208_v44 = vrot.slane %v6708_v17, 5 }
 0x2bf   : > { %v8493_v58 = vpop.f32.mrf.mxu3  ;;  %v8510_v37 = vpop.f32.mrf.mxu0  ;;  %v4577_v35 = vsel %vm7157_vm7, %v4572_v49, %v4576_v3 }
 0x2c2   : > { %v8530_v3 = vpop.f32.mrf.mxu1 }
 0x2c3   : > { %9281 = vst [vmem:[#allocation92_spill] sm:$0xff] %v8530_v3 }
 0x2c4   : > { %2423 = vmatmul.bf16.gmra.mxu3 %v2299_v26  ;;  %v2279_v26 = vunpack.c.l.b16 %v2205_v38 }
 0x2c5   : > { %5228 = vmatmul.bf16.gmra.mxu1 %v7696_v33  ;;  %v4720_v33 = vpack.c.b16 %v4700_v23, %v4699_v63 }
 0x2c7   : > { %v2384_v6 = vpop.f32.mrf.mxu3  ;;  %v8527_v0 = vpop.f32.mrf.mxu0 }
 0x2c8   : > { %v8507_v53 = vadd.f32 %v2384_v6, %v7404_v29  ;;  %v2202_v29 = vsel %vm7449_vm14, %v6008_v16, %v2201_v2  ;;  %v4587_v6 = vsel %vm7157_vm7, %v4582_v57, %v4586_v41  ;;  %v4589_v2 = vshrl.u32 %v4267_v54, 16  ;;  %v2089_v41 = vld [vmem:[#allocation2 + $0x84] sm:$0xe] }
 0x2c9   : > { %v2278_v60 = vunpack.c.l.b16 %v2202_v29  ;;  %v4702_v16 = vunpack.c.l.b16 %v4587_v6  ;;  %v4594_v29 = vrot.slane %v4592_v25, 5  ;;  %v2210_v57 = vrot.slane %v2208_v44, 4 }
 0x2ca   : > { %v4591_v38 = vrot.slane %v4589_v2, 4  ;;  %v6009_v6 = vrot.slane %v2089_v41, 9  ;;  %v6710_v41 = vld [vmem:[#allocation2 + $0x94] sm:$0xf] }
 0x2cb   : > { %v2300_v23 = vpack.c.b16 %v2279_v26, %v2278_v60  ;;  %v4604_v26 = vrot.slane %v4602_v51, 4 }
 0x2cc   : > { %4852 = vmatmul.bf16.gmra.mxu0 %v4720_v33  ;;  %v4701_v33 = vunpack.c.l.b16 %v4577_v35  ;;  %v4608_v35 = vshll.u32 %v8449_v40, 16  ;;  %v2209_v25 = vsel %vm7449_vm14, %v6009_v6, %v2208_v44 }
 0x2cd   : > { %v2280_v40 = vunpack.c.l.b16 %v2209_v25  ;;  %v2090_v25 = vld [vmem:[#allocation2 + $0x90] sm:$0xe] }
 0x2ce   : > { %v4721_v54 = vpack.c.b16 %v4702_v16, %v4701_v33  ;;  %v8542_v33 = vpop.f32.mrf.mxu1 }
 0x2cf   : > { %v2386_v45 = vpop.f32.mrf.mxu3  ;;  %v8540_v61 = vpop.f32.mrf.mxu0  ;;  %9282 = vst [vmem:[#allocation93_spill] sm:$0xff] %v8542_v33 }
 0x2d0   : > { %v8519_v63 = vadd.f32 %v2386_v45, %v7424_v48  ;;  %v6541_v48 = vld [vmem:[#allocation8 + $0x188] sm:$0xff]  ;;  %v6709_v45 = vld [vmem:[#allocation2 + $0x8c] sm:$0x1] }
 0x2d1   : > { %4113 = vmatpush.bf16.msra.mxu3 %v6541_v48  ;;  %v2211_v60 = vrot.slane %v6709_v45, 5  ;;  %v4610_v48 = vrot.slane %v4608_v35, 5  ;;  %v2215_v45 = vrot.slane %v6710_v41, 5 }
 0x2d3   : > { %v2212_v2 = vsel %vm7449_vm14, %v2210_v57, %v2211_v60  ;;  %v2217_v6 = vrot.slane %v2215_v45, 4 }
 0x2d4   : > { %2428 = vmatmul.bf16.gmra.mxu3 %v2300_v23  ;;  %v4605_v23 = vor.u32 %v4604_v26, %v4600_v56 }
 0x2d5   : > { %5233 = vmatmul.bf16.gmra.mxu1 %v7715_v27  ;;  %v4595_v27 = vor.u32 %v4594_v29, %v4591_v38  ;;  %v4270_v38 = vld [vmem:[#allocation2 + $0xc0] sm:$0xf]  ;;  %v8547_v29 = vld [vmem:[#allocation2 + $0xc4] sm:$0xf] }
 0x2d6   : > { %v4606_v17 = vrot.slane %v4605_v23, 4  ;;  %v4613_v60 = vshrl.u32 %v4270_v38, 16  ;;  %v8563_v41 = vpop.f32.mrf.mxu1 }
 0x2d7   : > { %v2389_v49 = vpop.f32.mrf.mxu3  ;;  %v4596_v51 = vrot.slane %v4595_v27, 4  ;;  %v4622_v27 = vshll.u32 %v8547_v29, 16  ;;  %9283 = vst [vmem:[#allocation94_spill] sm:$0xff] %v8563_v41  ;;  %v9323_v41 = vld [vmem:[#allocation85_spill] sm:$0xff] }
 0x2d8   : > { %v8533_v30 = vadd.f32 %v2389_v49, %v7441_v52  ;;  %v2281_v52 = vunpack.c.l.b16 %v2212_v2  ;;  %v4611_v57 = vsel %vm7157_vm7, %v4606_v17, %v4610_v48  ;;  %v8556_v48 = vpop.f32.mrf.mxu0 }
 0x2d9   : > { %v4601_v44 = vsel %vm7157_vm7, %v4596_v51, %v4600_v56  ;;  %v4704_v35 = vunpack.c.l.b16 %v4611_v57  ;;  %v4615_v56 = vrot.slane %v4613_v60, 4  ;;  %v4624_v51 = vrot.slane %v4622_v27, 5 }
 0x2da   : > { %v2301_v26 = vpack.c.b16 %v2281_v52, %v2280_v40  ;;  %v4703_v23 = vunpack.c.l.b16 %v4601_v44  ;;  %v8561_v40 = vld [vmem:[#allocation2 + $0xc8] sm:$0x1]  ;;  %v6010_v44 = vrot.slane %v2090_v25, 9 }
 0x2db   : > { %v4632_v27 = vshll.u32 %v8561_v40, 16 }
 0x2dc   : > { %4857 = vmatmul.bf16.gmra.mxu0 %v4721_v54  ;;  %v4616_v54 = vshll.u32 %v4270_v38, 16  ;;  %v6711_v38 = vld [vmem:[#allocation2 + $0x98] sm:$0x1] }
 0x2dd   : > { %v4634_v39 = vrot.slane %v4632_v27, 5  ;;  %v6713_v27 = vld [vmem:[#allocation2 + $0xa4] sm:$0x1] }
 0x2de   : > { %v4618_v52 = vrot.slane %v4616_v54, 5 }
 0x2df   : > { %v2391_v49 = vpop.f32.mrf.mxu3 }
 0x2e0   : > { %v8545_v16 = vadd.f32 %v2391_v49, %v7484_v42  ;;  %v4626_v42 = vshrl.u32 %v8547_v29, 16  ;;  %v4619_v60 = vor.u32 %v4618_v52, %v4615_v56 }
 0x2e2   : > { %v4628_v17 = vrot.slane %v4626_v42, 4  ;;  %v6569_v42 = vld [vmem:[#allocation9 + $0x28] sm:$0xff] }
 0x2e3   : > { %5490 = vmatpush.bf16.msra.mxu2 %v6569_v42 }
 0x2e4   : > { %2433 = vmatmul.bf16.gmra.mxu3 %v2301_v26  ;;  %v2218_v26 = vrot.slane %v6711_v38, 5  ;;  %v4629_v54 = vor.u32 %v4628_v17, %v4624_v51  ;;  %v4620_v38 = vrot.slane %v4619_v60, 4 }
 0x2e5   : > { %5238 = vmatmul.bf16.gmra.mxu1 %v7755_v24  ;;  %v4722_v24 = vpack.c.b16 %v4704_v35, %v4703_v23 }
 0x2e6   : > { %v2219_v57 = vsel %vm7449_vm14, %v2217_v6, %v2218_v26  ;;  %v4630_v8 = vrot.slane %v4629_v54, 4  ;;  %v8573_v6 = vpop.f32.mrf.mxu0  ;;  %v4625_v56 = vsel %vm7157_vm7, %v4620_v38, %v4624_v51  ;;  %v8579_v26 = vpop.f32.mrf.mxu1  ;;  %v2225_v51 = vrot.slane %v6713_v27, 5 }
 0x2e7   : > { %v2394_v2 = vpop.f32.mrf.mxu3  ;;  %9284 = vst [vmem:[#allocation95_spill] sm:$0xff] %v8579_v26 }
 0x2e8   : > { %v8559_v49 = vadd.f32 %v2394_v2, %v7504_v36  ;;  %v2216_v36 = vsel %vm7449_vm14, %v6010_v44, %v2215_v45  ;;  %v2283_v2 = vunpack.c.l.b16 %v2219_v57  ;;  %v4635_v52 = vsel %vm7157_vm7, %v4630_v8, %v4634_v39  ;;  %v6712_v45 = vld [vmem:[#allocation2 + $0xa0] sm:$0xf] }
 0x2e9   : > { %v2282_v35 = vunpack.c.l.b16 %v2216_v36  ;;  %v2222_v17 = vrot.slane %v6712_v45, 5  ;;  %v4706_v44 = vunpack.c.l.b16 %v4635_v52  ;;  %v6714_v45 = vld [vmem:[#allocation2 + $0xac] sm:$0xf] }
 0x2eb   : > { %v2302_v25 = vpack.c.b16 %v2283_v2, %v2282_v35  ;;  %v2224_v54 = vrot.slane %v2222_v17, 4 }
 0x2ec   : > { %4862 = vmatmul.bf16.gmra.mxu0 %v4722_v24  ;;  %v2091_v24 = vld [vmem:[#allocation2 + $0x9c] sm:$0xe] }
 0x2ed   : > { %v6011_v60 = vrot.slane %v2091_v24, 9  ;;  %v2229_v24 = vrot.slane %v6714_v45, 5 }
 0x2ee   : > { %v8589_v36 = vpop.f32.mrf.mxu0  ;;  %v8591_v2 = vpop.f32.mrf.mxu1 }
 0x2ef   : > { %v2396_v1 = vpop.f32.mrf.mxu3  ;;  %v2223_v8 = vsel %vm7449_vm14, %v6011_v60, %v2222_v17  ;;  %9285 = vst [vmem:[#allocation96_spill] sm:$0xff] %v8591_v2  ;;  %v2092_v17 = vld [vmem:[#allocation2 + $0xa8] sm:$0xe]  ;;  %v6715_v60 = vld [vmem:[#allocation2 + $0xb0] sm:$0x1]  ;;  %v9295_v2 = vld [vmem:[#allocation32_spill] sm:$0xff] }
 0x2f0   : > { %v8571_v23 = vadd.f32 %v2396_v1, %v7525_v32  ;;  %v6540_v32 = vld [vmem:[#allocation8 + $0x180] sm:$0xff]  ;;  %v4705_v1 = vunpack.c.l.b16 %v4625_v56  ;;  %v2284_v38 = vunpack.c.l.b16 %v2223_v8  ;;  %v9286_v56 = vld [vmem:[#allocation25_spill] sm:$0xff] }
 0x2f1   : > { %4114 = vmatpush.bf16.msra.mxu3 %v6540_v32  ;;  %v9287_v32 = vld [vmem:[#allocation50_spill] sm:$0xff]  ;;  %v6568_v8 = vld [vmem:[#allocation9 + $0x20] sm:$0xff] }
 0x2f2   : > { %v4723_v39 = vpack.c.b16 %v4706_v44, %v4705_v1  ;;  %v6012_v44 = vrot.slane %v2092_v17, 9  ;;  %5491 = vmatpush.bf16.msra.mxu2 %v6568_v8  ;;  %v4924_v8 = vld [vmem:[#allocation2 + $0xc0] sm:$0xe] }
 0x2f4   : > { %2438 = vmatmul.bf16.gmra.mxu3 %v2302_v25 }
 0x2f5   : > { %5243 = vmatmul.bf16.gmra.mxu1 %v7804_v14  ;;  %v2226_v14 = vsel %vm7449_vm14, %v2224_v54, %v2225_v51  ;;  %v2232_v54 = vrot.slane %v6715_v60, 5  ;;  %v9289_v51 = vld [vmem:[#allocation27_spill] sm:$0xff] }
 0x2f6   : > { %v2285_v35 = vunpack.c.l.b16 %v2226_v14  ;;  %v8597_v27 = vpop.f32.mrf.mxu1  ;;  %v2230_v14 = vsel %vm7449_vm14, %v6012_v44, %v2229_v24  ;;  %v2093_v60 = vld [vmem:[#allocation2 + $0xb4] sm:$0xe] }
 0x2f7   : > { %v2399_v57 = vpop.f32.mrf.mxu3  ;;  %9288 = vst [vmem:[#allocation25_spill] sm:$0xff] %v8597_v27  ;;  %v6013_v44 = vrot.slane %v2093_v60, 9  ;;  %v6364_v27 = vrot.slane %v4924_v8, 9 }
 0x2f8   : > { %v8583_v42 = vadd.f32 %v2399_v57, %v7540_v10  ;;  %v2303_v10 = vpack.c.b16 %v2285_v35, %v2284_v38  ;;  %v2231_v57 = vrot.slane %v2229_v24, 4  ;;  %v2286_v35 = vunpack.c.l.b16 %v2230_v14 }
 0x2f9   : > { %v5074_v24 = vrot.slane %v8547_v29, 5 }
 0x2fa   : > { %v2233_v38 = vsel %vm7449_vm14, %v2231_v57, %v2232_v54  ;;  %v6717_v57 = vld [vmem:[#allocation2 + $0xbc] sm:$0x1] }
 0x2fb   : > { %v2239_v54 = vrot.slane %v6717_v57, 5 }
 0x2fc   : > { %4867 = vmatmul.bf16.gmra.mxu0 %v4723_v39 }
 0x2ff   : > { %v2401_v25 = vpop.f32.mrf.mxu3 }
 0x300   : > { %v8594_v52 = vadd.f32 %v2401_v25, %v9286_v56  ;;  %v2287_v25 = vunpack.c.l.b16 %v2233_v38 }
 0x302   : > { %v2304_v17 = vpack.c.b16 %v2287_v25, %v2286_v35  ;;  %v5075_v25 = vsel %vm7449_vm14, %v6364_v27, %v5074_v24 }
 0x303   : > { %v5131_v29 = vunpack.c.l.b16 %v5075_v25 }
 0x304   : > { %2443 = vmatmul.bf16.gmra.mxu3 %v2303_v10  ;;  %v9290_v10 = vld [vmem:[#allocation29_spill] sm:$0xff] }
 0x305   : > { %5248 = vmatmul.bf16.gmra.mxu1 %v9287_v32  ;;  %v8609_v32 = vpop.f32.mrf.mxu1 }
 0x306   : > { %9291 = vst [vmem:[#allocation50_spill] sm:$0xff] %v8609_v32  ;;  %v9293_v32 = vld [vmem:[#allocation31_spill] sm:$0xff] }
 0x307   : > { %v2404_v1 = vpop.f32.mrf.mxu3 }
 0x308   : > { %v8600_v39 = vadd.f32 %v2404_v1, %v9289_v51  ;;  %v6716_v1 = vld [vmem:[#allocation2 + $0xb8] sm:$0xf] }
 0x309   : > { %v2236_v51 = vrot.slane %v6716_v1, 5 }
 0x30b   : > { %v2238_v38 = vrot.slane %v2236_v51, 4  ;;  %v2237_v60 = vsel %vm7449_vm14, %v6013_v44, %v2236_v51  ;;  %v9298_v44 = vld [vmem:[#allocation34_spill] sm:$0xff] }
 0x30d   : > { %v2240_v1 = vsel %vm7449_vm14, %v2238_v38, %v2239_v54  ;;  %v8625_v57 = vpop.f32.mrf.mxu1  ;;  %v6567_v54 = vld [vmem:[#allocation9 + $0x18] sm:$0xff] }
 0x30e   : > { %9294 = vst [vmem:[#allocation27_spill] sm:$0xff] %v8625_v57  ;;  %v2289_v8 = vunpack.c.l.b16 %v2240_v1  ;;  %5492 = vmatpush.bf16.msra.mxu2 %v6567_v54  ;;  %v9301_v1 = vld [vmem:[#allocation38_spill] sm:$0xff] }
 0x30f   : > { %v2406_v56 = vpop.f32.mrf.mxu3  ;;  %v6528_v57 = vld [vmem:[#allocation2 + $0x48] sm:$0xff] }
 0x310   : > { %v8607_v45 = vadd.f32 %v2406_v56, %v9290_v10  ;;  %v5076_v56 = vrot.slane %v5074_v24, 4  ;;  %v5077_v10 = vrot.slane %v8561_v40, 5 }
 0x314   : > { %2448 = vmatmul.bf16.gmra.mxu3 %v2304_v17 }
 0x315   : > { %5253 = vmatmul.bf16.gmra.mxu1 %v9292_v5  ;;  %v5078_v5 = vsel %vm7449_vm14, %v5076_v56, %v5077_v10  ;;  %v9296_v56 = vld [vmem:[#allocation61_spill] sm:$0xff]  ;;  %v8633_v10 = vpop.f32.mrf.mxu1 }
 0x316   : > { %v5132_v17 = vunpack.c.l.b16 %v5078_v5  ;;  %9297 = vst [vmem:[#allocation29_spill] sm:$0xff] %v8633_v10 }
 0x317   : > { %v2409_v14 = vpop.f32.mrf.mxu3 }
 0x318   : > { %v8615_v35 = vadd.f32 %v2409_v14, %v9293_v32  ;;  %v8627_v40 = vpack.c.b16 %v5132_v17, %v5131_v29  ;;  %v2288_v32 = vunpack.c.l.b16 %v2237_v60  ;;  %v9300_v29 = vld [vmem:[#allocation36_spill] sm:$0xff] }
 0x31a   : > { %v2305_v24 = vpack.c.b16 %v2289_v8, %v2288_v32 }
 0x31d   : > { %v8638_v5 = vpop.f32.mrf.mxu1 }
 0x31e   : > { %9299 = vst [vmem:[#allocation54_spill] sm:$0xff] %v8638_v5 }
 0x31f   : > { %v2411_v14 = vpop.f32.mrf.mxu3 }
 0x320   : > { %v8630_v27 = vadd.f32 %v2411_v14, %v9295_v2  ;;  %v6524_v2 = vld [vmem:[#allocation2 + $0x18] sm:$0xff] }
 0x324   : > { %2453 = vmatmul.bf16.gmra.mxu3 %v2305_v24  ;;  %v9303_v24 = vld [vmem:[#allocation40_spill] sm:$0xff] }
 0x325   : > { %5258 = vmatmul.bf16.gmra.mxu1 %v9296_v56  ;;  %v8647_v8 = vpop.f32.mrf.mxu1 }
 0x326   : > { %9302 = vst [vmem:[#allocation31_spill] sm:$0xff] %v8647_v8 }
 0x327   : > { %v2414_v51 = vpop.f32.mrf.mxu3 }
 0x328   : > { %v8636_v25 = vadd.f32 %v2414_v51, %v9298_v44  ;;  %v6525_v51 = vld [vmem:[#allocation2 + $0x24] sm:$0xff] }
 0x32d   : > { %v8652_v44 = vpop.f32.mrf.mxu1 }
 0x32e   : > { %9304 = vst [vmem:[#allocation32_spill] sm:$0xff] %v8652_v44 }
 0x32f   : > { %v2416_v38 = vpop.f32.mrf.mxu3 }
 0x330   : > { %v8641_v17 = vadd.f32 %v2416_v38, %v9300_v29  ;;  %v9305_v38 = vld [vmem:[#allocation42_spill] sm:$0xff] }
 0x334   : > { %4115 = vmatmul.bf16.vlgmr.msra.gmra.mxu3 %v6524_v2 }
 0x335   : > { %5263 = vmatmul.bf16.gmra.mxu1 %v8334_v22  ;;  %v6566_v22 = vld [vmem:[#allocation9 + $0x10] sm:$0xff]  ;;  %v8658_v2 = vpop.f32.mrf.mxu1 }
 0x336   : > { %5493 = vmatpush.bf16.msra.mxu2 %v6566_v22  ;;  %9307 = vst [vmem:[#allocation34_spill] sm:$0xff] %v8658_v2  ;;  %v8672_v22 = vpop.f32.mrf.mxu2 }
 0x337   : > { %v2419_v60 = vpop.f32.mrf.mxu3 }
 0x338   : > { %v8645_v32 = vadd.f32 %v2419_v60, %v9301_v1  ;;  %v9308_v1 = vld [vmem:[#allocation43_spill] sm:$0xff] }
 0x33e   : > { %v8680_v10 = vpop.f32.mrf.mxu2 }
 0x33f   : > { %v2421_v14 = vpop.f32.mrf.mxu3 }
 0x340   : > { %v8650_v56 = vadd.f32 %v2421_v14, %v9303_v24  ;;  %v6526_v14 = vld [vmem:[#allocation2 + $0x30] sm:$0xff] }
 0x344   : > { %4120 = vmatmul.bf16.gmra.mxu3 %v6525_v51  ;;  %v8664_v51 = vpop.f32.mrf.mxu1 }
 0x345   : > { %5268 = vmatmul.bf16.gmra.mxu1 %v8371_v28  ;;  %9310 = vst [vmem:[#allocation38_spill] sm:$0xff] %v8664_v51  ;;  %v9311_v28 = vld [vmem:[#allocation45_spill] sm:$0xff] }
 0x346   : > { %v6565_v51 = vld [vmem:[#allocation9 + $0x8] sm:$0xff] }
 0x347   : > { %v2424_v54 = vpop.f32.mrf.mxu3  ;;  %5494 = vmatpush.bf16.msra.mxu2 %v6565_v51 }
 0x348   : > { %v8656_v29 = vadd.f32 %v2424_v54, %v9305_v38  ;;  %v9313_v38 = vld [vmem:[#allocation47_spill] sm:$0xff] }
 0x34a   : > { %9306 = vst [vmem:[#allocation61_spill] sm:$0xff] %v8656_v29 }
 0x34c   : > { %v8674_v2 = vpop.f32.mrf.mxu1 }
 0x34f   : > { %v2426_v60 = vpop.f32.mrf.mxu3 }
 0x350   : > { %v8661_v8 = vadd.f32 %v2426_v60, %v9308_v1  ;;  %v6527_v60 = vld [vmem:[#allocation2 + $0x3c] sm:$0xff] }
 0x352   : > { %9309 = vst [vmem:[#allocation36_spill] sm:$0xff] %v8661_v8 }
 0x354   : > { %4125 = vmatmul.bf16.gmra.mxu3 %v6526_v14 }
 0x355   : > { %5273 = vmatmul.bf16.gmra.mxu1 %v8381_v13  ;;  %v9315_v13 = vld [vmem:[#allocation49_spill] sm:$0xff] }
 0x357   : > { %v2429_v24 = vpop.f32.mrf.mxu3 }
 0x358   : > { %v8667_v44 = vadd.f32 %v2429_v24, %v9311_v28  ;;  %v8682_v24 = vpop.f32.mrf.mxu1 }
 0x35a   : > { %9312 = vst [vmem:[#allocation40_spill] sm:$0xff] %v8667_v44 }
 0x35f   : > { %v2431_v54 = vpop.f32.mrf.mxu3 }
 0x360   : > { %v8670_v5 = vadd.f32 %v2431_v54, %v9313_v38  ;;  %v9317_v54 = vld [vmem:[#allocation52_spill] sm:$0xff] }
 0x362   : > { %9314 = vst [vmem:[#allocation42_spill] sm:$0xff] %v8670_v5 }
 0x364   : > { %4130 = vmatmul.bf16.gmra.mxu3 %v6527_v60  ;;  %v8688_v60 = vpop.f32.mrf.mxu2 }
 0x365   : > { %5278 = vmatmul.bf16.gmra.mxu1 %v8408_v9  ;;  %v8690_v9 = vpop.f32.mrf.mxu1 }
 0x367   : > { %v2434_v1 = vpop.f32.mrf.mxu3 }
 0x368   : > { %v8678_v14 = vadd.f32 %v2434_v1, %v9315_v13 }
 0x36a   : > { %9316 = vst [vmem:[#allocation43_spill] sm:$0xff] %v8678_v14 }
 0x36c   : > { %v8695_v14 = vpop.f32.mrf.mxu2 }
 0x36d   : > { %v8697_v51 = vpop.f32.mrf.mxu1 }
 0x36f   : > { %v2436_v28 = vpop.f32.mrf.mxu3 }
 0x370   : > { %v8685_v38 = vadd.f32 %v2436_v28, %v9317_v54  ;;  %v6529_v54 = vld [vmem:[#allocation2 + $0x54] sm:$0xff] }
 0x372   : > { %9318 = vst [vmem:[#allocation45_spill] sm:$0xff] %v8685_v38 }
 0x374   : > { %4135 = vmatmul.bf16.gmra.mxu3 %v6528_v57  ;;  %v9321_v57 = vld [vmem:[#allocation81_spill] sm:$0xff]  ;;  %v8706_v5 = vpop.f32.mrf.mxu2 }
 0x375   : > { %5283 = vmatmul.bf16.gmra.mxu1 %v8431_v11 }
 0x377   : > { %v2439_v1 = vpop.f32.mrf.mxu3 }
 0x378   : > { %v8693_v13 = vadd.f32 %v2439_v1, %v8231_v47  ;;  %v8708_v47 = vpop.f32.mrf.mxu1  ;;  %v6564_v1 = vld [vmem:[#allocation9] sm:$0xff] }
 0x379   : > { %5495 = vmatpush.bf16.msra.mxu2 %v6564_v1 }
 0x37a   : > { %9319 = vst [vmem:[#allocation47_spill] sm:$0xff] %v8693_v13 }
 0x37f   : > { %v2441_v26 = vpop.f32.mrf.mxu3 }
 0x380   : > { %v8700_v28 = vadd.f32 %v2441_v26, %v8267_v18  ;;  %v6530_v18 = vld [vmem:[#allocation2 + $0x60] sm:$0xff]  ;;  %v8713_v26 = vpop.f32.mrf.mxu2 }
 0x382   : > { %9320 = vst [vmem:[#allocation49_spill] sm:$0xff] %v8700_v28 }
 0x384   : > { %4140 = vmatmul.bf16.gmra.mxu3 %v6529_v54  ;;  %v8715_v54 = vpop.f32.mrf.mxu1 }
 0x385   : > { %5288 = vmatmul.bf16.gmra.mxu1 %v8469_v59 }
 0x387   : > { %v2444_v11 = vpop.f32.mrf.mxu3 }
 0x388   : > { %v8704_v38 = vadd.f32 %v2444_v11, %v9321_v57  ;;  %v8721_v57 = vpop.f32.mrf.mxu2 }
 0x38a   : > { %9322 = vst [vmem:[#allocation52_spill] sm:$0xff] %v8704_v38 }
 0x38f   : > { %v2446_v13 = vpop.f32.mrf.mxu3 }
 0x390   : > { %v8711_v44 = vadd.f32 %v2446_v13, %v9323_v41  ;;  %v6531_v41 = vld [vmem:[#allocation2 + $0x6c] sm:$0xff]  ;;  %v8726_v13 = vpop.f32.mrf.mxu2 }
 0x392   : > { %9324 = vst [vmem:[#allocation81_spill] sm:$0xff] %v8711_v44 }
 0x394   : > { %4145 = vmatmul.bf16.gmra.mxu3 %v6530_v18 }
 0x395   : > { %5293 = vmatmul.bf16.gmra.mxu1 %v8627_v40  ;;  %v9328_v40 = vld [vmem:[#allocation20_spill] sm:$0xff] }
 0x396   : > { %v2773_v18 = vadd.f32 %v9328_v40, %v8486_v43  ;;  %v8744_v40 = vpop.f32.mrf.mxu0 }
 0x397   : > { %v2449_v59 = vpop.f32.mrf.mxu3 }
 0x398   : > { %v8719_v11 = vadd.f32 %v2449_v59, %v8406_v34  ;;  %v9329_v34 = vld [vmem:[#allocation19_spill] sm:$0xff]  ;;  %v9330_v59 = vld [vmem:[#allocation18_spill] sm:$0xff] }
 0x39a   : > { %9325 = vst [vmem:[#allocation85_spill] sm:$0xff] %v8719_v11  ;;  %v2001_v11 = vadd.f32 %v9330_v59, %v9329_v34  ;;  %v8746_v34 = vpop.f32.mrf.mxu1 }
 0x39f   : > { %v2451_v38 = vpop.f32.mrf.mxu3 }
 0x3a0   : > { %v8724_v1 = vadd.f32 %v2451_v38, %v8434_v31  ;;  %v8738_v31 = vpop.f32.mrf.mxu2  ;;  %v2460_v38 = vadd.f32 %v8493_v58, %v2001_v11  ;;  %v9338_v11 = vld [vmem:[#allocation22_spill] sm:$0xff] }
 0x3a1   : > { %9332 = vst [vmem:[#allocation19_spill] sm:$0xff] %v8738_v31 }
 0x3a2   : > { %9326 = vst [vmem:[#allocation97_spill] sm:$0xff] %v8724_v1  ;;  %v9333_v1 = vld [vmem:[#allocation53_spill] sm:$0xff] }
 0x3a3   : > { %v3455_v3 = vadd.f32 %v9333_v1, %v2773_v18  ;;  %v2775_v1 = vadd.f32 %v9338_v11, %v8507_v53  ;;  %v9339_v18 = vld [vmem:[#allocation66_spill] sm:$0xff] }
 0x3a4   : > { %4150 = vmatmul.bf16.gmra.mxu3 %v6531_v41  ;;  %v6532_v41 = vld [vmem:[#allocation2 + $0x78] sm:$0xff] }
 0x3a7   : > { %v2454_v44 = vpop.f32.mrf.mxu3 }
 0x3a8   : > { %v8729_v28 = vadd.f32 %v2454_v44, %v8453_v20  ;;  %v9334_v20 = vld [vmem:[#allocation21_spill] sm:$0xff]  ;;  %v8749_v59 = vpop.f32.mrf.mxu2 }
 0x3a9   : > { %v2774_v44 = vadd.f32 %v9334_v20, %v2460_v38  ;;  %9337 = vst [vmem:[#allocation18_spill] sm:$0xff] %v8749_v59  ;;  %v8761_v20 = vpop.f32.mrf.mxu0  ;;  %v9343_v59 = vld [vmem:[#allocation60_spill] sm:$0xff] }
 0x3aa   : > { %9327 = vst [vmem:[#allocation98_spill] sm:$0xff] %v8729_v28  ;;  %v9335_v28 = vld [vmem:[#allocation63_spill] sm:$0xff] }
 0x3ab   : > { %v3881_v29 = vadd.f32 %v9335_v28, %v3455_v3 }
 0x3af   : > { %v2456_v33 = vpop.f32.mrf.mxu3 }
 0x3b0   : > { %v8736_v8 = vadd.f32 %v2456_v33, %v8472_v19  ;;  %v9336_v19 = vld [vmem:[#allocation56_spill] sm:$0xff] }
 0x3b1   : > { %v3456_v33 = vadd.f32 %v9336_v19, %v2774_v44  ;;  %v8765_v19 = vpop.f32.mrf.mxu1 }
 0x3b2   : > { %9331 = vst [vmem:[#allocation20_spill] sm:$0xff] %v8736_v8 }
 0x3b4   : > { %4155 = vmatmul.bf16.gmra.mxu3 %v6532_v41  ;;  %v3882_v41 = vadd.f32 %v9339_v18, %v3456_v33 }
 0x3b7   : > { %v4116_v43 = vpop.f32.mrf.mxu3 }
 0x3b8   : > { %v4196_v46 = vadd.f32 %v4116_v43, %v3881_v29  ;;  %v8759_v29 = vld [vmem:[%s9158_s5] ss:$0 sm:$0xff]  ;;  %v6533_v43 = vld [vmem:[#allocation2 + $0x84] sm:$0xff] }
 0x3ba   : > { %v4878_v58 = vadd.f32 %v8510_v37, %v4196_v46  ;;  %v9340_v37 = vld [vmem:[#allocation58_spill] sm:$0xff] }
 0x3bb   : > { %v3457_v46 = vadd.f32 %v9340_v37, %v2775_v1 }
 0x3bc   : > { %v5304_v3 = vadd.f32 %v8674_v2, %v4878_v58  ;;  %v8769_v2 = vpop.f32.mrf.mxu2  ;;  %v9341_v58 = vld [vmem:[#allocation23_spill] sm:$0xff] }
 0x3bd   : > { %v2776_v11 = vadd.f32 %v9341_v58, %v8519_v63  ;;  %v8781_v63 = vpop.f32.mrf.mxu1 }
 0x3be   : > { %v5340_v53 = vadd.f32 %v8759_v29, %v5304_v3  ;;  %v8776_v3 = vpop.f32.mrf.mxu0 }
 0x3bf   : > { %v4118_v38 = vpop.f32.mrf.mxu3  ;;  %v3458_v31 = vadd.f32 %v9343_v59, %v2776_v11  ;;  %v6534_v11 = vld [vmem:[#allocation2 + $0x90] sm:$0xff] }
 0x3c0   : > { %v4197_v28 = vadd.f32 %v4118_v38, %v3882_v41  ;;  %v9342_v41 = vld [vmem:[#allocation69_spill] sm:$0xff] }
 0x3c1   : > { %v3883_v38 = vadd.f32 %v9342_v41, %v3457_v46  ;;  %v9346_v41 = vld [vmem:[#allocation62_spill] sm:$0xff] }
 0x3c2   : > { %v4879_v44 = vadd.f32 %v8527_v0, %v4197_v28  ;;  %v5372_v28 = vmax.f32 %v5340_v53, 0.0 }
 0x3c4   : > { %v5305_v33 = vadd.f32 %v8682_v24, %v4879_v44  ;;  %4160 = vmatmul.bf16.gmra.mxu3 %v6533_v43  ;;  %v9344_v44 = vld [vmem:[#allocation24_spill] sm:$0xff]  ;;  %v8784_v46 = vpop.f32.mrf.mxu2 }
 0x3c5   : > { %v2777_v43 = vadd.f32 %v9344_v44, %v8533_v30  ;;  %v8797_v44 = vpop.f32.mrf.mxu1 }
 0x3c6   : > { %v5341_v18 = vadd.f32 %v8759_v29, %v5305_v33  ;;  %v9345_v33 = vld [vmem:[#allocation72_spill] sm:$0xff] }
 0x3c7   : > { %v4121_v0 = vpop.f32.mrf.mxu3  ;;  %v3884_v58 = vadd.f32 %v9345_v33, %v3458_v31  ;;  %v8793_v31 = vpop.f32.mrf.mxu0 }
 0x3c8   : > { %v5373_v8 = vmax.f32 %v5341_v18, 0.0  ;;  %v4198_v1 = vadd.f32 %v4121_v0, %v3883_v38  ;;  %v3459_v38 = vadd.f32 %v9346_v41, %v2777_v43  ;;  %v9347_v0 = vld [vmem:[#allocation26_spill] sm:$0xff] }
 0x3ca   : > { %v5404_v37 = vpack.c.bf16 %v5373_v8, %v5372_v28  ;;  %v4880_v24 = vadd.f32 %v8540_v61, %v4198_v1  ;;  %v2778_v28 = vadd.f32 %v9347_v0, %v8545_v16  ;;  %v9348_v1 = vld [vmem:[#allocation75_spill] sm:$0xff]  ;;  %v9350_v16 = vld [vmem:[#allocation28_spill] sm:$0xff] }
 0x3cc   : > { %5496 = vmatmul.bf16.vlgmr.msra.gmra.mxu2 %v5404_v37  ;;  %v5306_v18 = vadd.f32 %v8690_v9, %v4880_v24  ;;  %v3885_v37 = vadd.f32 %v9348_v1, %v3459_v38 }
 0x3cd   : > { %v8809_v1 = vpop.f32.mrf.mxu1 }
 0x3ce   : > { %v5342_v30 = vadd.f32 %v8759_v29, %v5306_v18 }
 0x3cf   : > { %v4123_v53 = vpop.f32.mrf.mxu3 }
 0x3d0   : > { %v4199_v8 = vadd.f32 %v4123_v53, %v3884_v58  ;;  %v5374_v33 = vmax.f32 %v5342_v30, 0.0  ;;  %v8799_v58 = vpop.f32.mrf.mxu2  ;;  %v9349_v53 = vld [vmem:[#allocation65_spill] sm:$0xff] }
 0x3d1   : > { %v3460_v18 = vadd.f32 %v9349_v53, %v2778_v28  ;;  %v9352_v28 = vld [vmem:[#allocation68_spill] sm:$0xff] }
 0x3d2   : > { %v4881_v59 = vadd.f32 %v8556_v48, %v4199_v8 }
 0x3d4   : > { %v5307_v61 = vadd.f32 %v8697_v51, %v4881_v59  ;;  %4165 = vmatmul.bf16.gmra.mxu3 %v6534_v11  ;;  %v2779_v59 = vadd.f32 %v9350_v16, %v8559_v49  ;;  %v9351_v11 = vld [vmem:[#allocation78_spill] sm:$0xff] }
 0x3d5   : > { %v3886_v41 = vadd.f32 %v9351_v11, %v3460_v18 }
 0x3d6   : > { %v5343_v9 = vadd.f32 %v8759_v29, %v5307_v61  ;;  %v8806_v61 = vpop.f32.mrf.mxu0 }
 0x3d7   : > { %v4126_v24 = vpop.f32.mrf.mxu3 }
 0x3d8   : > { %v4200_v48 = vadd.f32 %v4126_v24, %v3885_v37  ;;  %v5375_v43 = vmax.f32 %v5343_v9, 0.0  ;;  %v6535_v9 = vld [vmem:[#allocation2 + $0x9c] sm:$0xff]  ;;  %v3461_v24 = vadd.f32 %v9352_v28, %v2779_v59 }
 0x3da   : > { %v5405_v51 = vpack.c.bf16 %v5375_v43, %v5374_v33  ;;  %v4882_v8 = vadd.f32 %v8573_v6, %v4200_v48  ;;  %v8813_v6 = vpop.f32.mrf.mxu2  ;;  %v9353_v33 = vld [vmem:[#allocation30_spill] sm:$0xff] }
 0x3db   : > { %v2780_v43 = vadd.f32 %v9353_v33, %v8571_v23  ;;  %v9356_v23 = vld [vmem:[#allocation33_spill] sm:$0xff]  ;;  %v6536_v33 = vld [vmem:[#allocation2 + $0xa8] sm:$0xff] }
 0x3dc   : > { %5501 = vmatmul.bf16.gmra.mxu2 %v5405_v51  ;;  %v5308_v0 = vadd.f32 %v8708_v47, %v4882_v8  ;;  %v9354_v51 = vld [vmem:[#allocation82_spill] sm:$0xff] }
 0x3dd   : > { %v3887_v47 = vadd.f32 %v9354_v51, %v3461_v24 }
 0x3de   : > { %v5344_v49 = vadd.f32 %v8759_v29, %v5308_v0  ;;  %v8821_v11 = vpop.f32.mrf.mxu0 }
 0x3df   : > { %v4128_v38 = vpop.f32.mrf.mxu3 }
 0x3e0   : > { %v4201_v30 = vadd.f32 %v4128_v38, %v3886_v41  ;;  %v9355_v41 = vld [vmem:[#allocation71_spill] sm:$0xff] }
 0x3e1   : > { %v3462_v38 = vadd.f32 %v9355_v41, %v2780_v43  ;;  %v9357_v43 = vld [vmem:[#allocation74_spill] sm:$0xff] }
 0x3e2   : > { %v4883_v37 = vadd.f32 %v8589_v36, %v4201_v30  ;;  %v5376_v36 = vmax.f32 %v5344_v49, 0.0  ;;  %v8827_v30 = vpop.f32.mrf.mxu2 }
 0x3e4   : > { %v5309_v48 = vadd.f32 %v8715_v54, %v4883_v37  ;;  %4170 = vmatmul.bf16.gmra.mxu3 %v6535_v9  ;;  %v8824_v54 = vpop.f32.mrf.mxu1  ;;  %v2781_v37 = vadd.f32 %v9356_v23, %v8583_v42  ;;  %v3888_v9 = vadd.f32 %v8401_v62, %v3462_v38  ;;  %v9358_v42 = vld [vmem:[#allocation35_spill] sm:$0xff] }
 0x3e6   : > { %v5345_v53 = vadd.f32 %v8759_v29, %v5309_v48  ;;  %v3463_v51 = vadd.f32 %v9357_v43, %v2781_v37 }
 0x3e7   : > { %v4131_v18 = vpop.f32.mrf.mxu3 }
 0x3e8   : > { %v4202_v8 = vadd.f32 %v4131_v18, %v3887_v47  ;;  %v5377_v16 = vmax.f32 %v5345_v53, 0.0  ;;  %v8835_v47 = vpop.f32.mrf.mxu0  ;;  %v2782_v18 = vadd.f32 %v9358_v42, %v8594_v52  ;;  %v9360_v52 = vld [vmem:[#allocation37_spill] sm:$0xff]  ;;  %v648_v42 = vld [vmem:[#allocation2 + $0xcc] sm:$0x1] }
 0x3ea   : > { %v5406_v59 = vpack.c.bf16 %v5377_v16, %v5376_v36  ;;  %v4884_v0 = vadd.f32 %v8744_v40, %v4202_v8 }
 0x3ec   : > { %5506 = vmatmul.bf16.gmra.mxu2 %v5406_v59  ;;  %v5310_v24 = vadd.f32 %v8746_v34, %v4884_v0  ;;  %v8841_v62 = vpop.f32.mrf.mxu1  ;;  %v3889_v34 = vadd.f32 %v8672_v22, %v3463_v51  ;;  %v6537_v51 = vld [vmem:[#allocation2 + $0xb4] sm:$0xff] }
 0x3ee   : > { %v5346_v53 = vadd.f32 %v8759_v29, %v5310_v24 }
 0x3ef   : > { %v4133_v28 = vpop.f32.mrf.mxu3 }
 0x3f0   : > { %v4203_v48 = vadd.f32 %v4133_v28, %v3888_v9  ;;  %v5378_v59 = vmax.f32 %v5346_v53, 0.0  ;;  %v8849_v37 = vpop.f32.mrf.mxu0  ;;  %v2783_v9 = vadd.f32 %v9360_v52, %v8600_v39 }
 0x3f2   : > { %v4885_v49 = vadd.f32 %v8761_v20, %v4203_v48  ;;  %v8845_v20 = vpop.f32.mrf.mxu2 }
 0x3f4   : > { %v5311_v40 = vadd.f32 %v8765_v19, %v4885_v49  ;;  %4175 = vmatmul.bf16.gmra.mxu3 %v6536_v33  ;;  %v9359_v19 = vld [vmem:[#allocation77_spill] sm:$0xff]  ;;  %v8854_v24 = vpop.f32.mrf.mxu1 }
 0x3f5   : > { %v3464_v0 = vadd.f32 %v9359_v19, %v2782_v18  ;;  %v4274_v18 = vld [vmem:[#allocation2 + $0xd0] sm:$0xf] }
 0x3f6   : > { %v5347_v8 = vadd.f32 %v8759_v29, %v5311_v40 }
 0x3f7   : > { %v4136_v36 = vpop.f32.mrf.mxu3  ;;  %v3890_v22 = vadd.f32 %v8680_v10, %v3464_v0  ;;  %v704_v10 = vld [vmem:[#allocation2 + $0xd4] sm:$0x1] }
 0x3f8   : > { %v4204_v16 = vadd.f32 %v4136_v36, %v3889_v34  ;;  %v5379_v41 = vmax.f32 %v5347_v8, 0.0  ;;  %v649_v8 = vsel %vm7128_vm2, 0, %v648_v42  ;;  %v705_v36 = vsel %vm7139_vm4, 0, %v704_v10 }
 0x3f9   : > { %650 = vst [vmem:[#allocation2 + $0xcc] sm:$0x1] %v649_v8 }
 0x3fa   : > { %v5407_v38 = vpack.c.bf16 %v5379_v41, %v5378_v59  ;;  %v4886_v23 = vadd.f32 %v8776_v3, %v4204_v16  ;;  %v8857_v33 = vpop.f32.mrf.mxu2  ;;  %v9361_v3 = vld [vmem:[#allocation80_spill] sm:$0xff]  ;;  %v4646_v16 = vshll.u32 %v4274_v18, 16  ;;  %v4650_v59 = vshrl.u32 %v4274_v18, 16  ;;  %v9364_v41 = vld [vmem:[#allocation39_spill] sm:$0xff]  ;;  %706 = vst [vmem:[#allocation2 + $0xd4] sm:$0x1] %v705_v36 }
 0x3fb   : > { %v3465_v40 = vadd.f32 %v9361_v3, %v2783_v9  ;;  %v8871_v9 = vpop.f32.mrf.mxu0 }
 0x3fc   : > { %5511 = vmatmul.bf16.gmra.mxu2 %v5407_v38  ;;  %v5312_v48 = vadd.f32 %v8781_v63, %v4886_v23  ;;  %v2784_v38 = vadd.f32 %v9364_v41, %v8607_v45  ;;  %v4648_v23 = vrot.slane %v4646_v16, 5  ;;  %v4652_v52 = vrot.slane %v4650_v59, 4  ;;  %v9365_v45 = vld [vmem:[#allocation84_spill] sm:$0xff] }
 0x3fe   : > { %v5348_v39 = vadd.f32 %v8759_v29, %v5312_v48  ;;  %v3466_v42 = vadd.f32 %v9365_v45, %v2784_v38 }
 0x3ff   : > { %v4138_v28 = vpop.f32.mrf.mxu3 }
 0x400   : > { %v4205_v49 = vadd.f32 %v4138_v28, %v3890_v22  ;;  %v5380_v28 = vmax.f32 %v5348_v39, 0.0  ;;  %v4273_v34 = vld [vmem:[#allocation2 + $0xcc] sm:$0xf]  ;;  %v9366_v39 = vld [vmem:[#allocation41_spill] sm:$0xff] }
 0x401   : > { %v2785_v63 = vadd.f32 %v9366_v39, %v8615_v35  ;;  %v4275_v36 = vld [vmem:[#allocation2 + $0xd4] sm:$0x1]  ;;  %v4637_v16 = vshrl.u32 %v4273_v34, 16  ;;  %v4640_v59 = vshll.u32 %v4273_v34, 16 }
 0x402   : > { %v4887_v43 = vadd.f32 %v8793_v31, %v4205_v49  ;;  %v4925_v31 = vld [vmem:[#allocation2 + $0xcc] sm:$0xe]  ;;  %v4656_v38 = vshll.u32 %v4275_v36, 16 }
 0x403   : > { %v6365_v49 = vrot.slane %v4925_v31, 9  ;;  %v8887_v35 = vpop.f32.mrf.mxu0 }
 0x404   : > { %v5313_v53 = vadd.f32 %v8797_v44, %v4887_v43  ;;  %4180 = vmatmul.bf16.gmra.mxu3 %v6537_v51  ;;  %v3891_v44 = vadd.f32 %v8688_v60, %v3465_v40  ;;  %v5081_v43 = vrot.slane %v4274_v18, 5  ;;  %v8873_v51 = vpop.f32.mrf.mxu1  ;;  %v8876_v60 = vpop.f32.mrf.mxu2  ;;  %v4653_v40 = vor.u32 %v4652_v52, %v4648_v23 }
 0x405   : > { %v3892_v18 = vadd.f32 %v8695_v14, %v3466_v42  ;;  %v4639_v52 = vrot.slane %v4637_v16, 4 }
 0x406   : > { %v5349_v19 = vadd.f32 %v8759_v29, %v5313_v53  ;;  %v5082_v10 = vsel %vm7449_vm14, %v6365_v49, %v5081_v43  ;;  %v5083_v8 = vrot.slane %v5081_v43, 4  ;;  %v4654_v41 = vrot.slane %v4653_v40, 4  ;;  %v6538_v49 = vld [vmem:[#allocation2 + $0xc0] sm:$0xff] }
 0x407   : > { %v4141_v0 = vpop.f32.mrf.mxu3  ;;  %v3467_v43 = vadd.f32 %v8414_v15, %v2785_v63 }
 0x408   : > { %v4206_v22 = vadd.f32 %v4141_v0, %v3891_v44  ;;  %v5381_v48 = vmax.f32 %v5349_v19, 0.0  ;;  %v5084_v44 = vrot.slane %v4275_v36, 5  ;;  %v5133_v19 = vunpack.c.l.b16 %v5082_v10 }
 0x409   : > { %v3893_v15 = vadd.f32 %v8706_v5, %v3467_v43  ;;  %v9368_v5 = vld [vmem:[#allocation46_spill] sm:$0xff]  ;;  %v9369_v43 = vld [vmem:[#allocation48_spill] sm:$0xff] }
 0x40a   : > { %v5408_v3 = vpack.c.bf16 %v5381_v48, %v5380_v28  ;;  %v4888_v53 = vadd.f32 %v8806_v61, %v4206_v22  ;;  %v4642_v22 = vrot.slane %v4640_v59, 5  ;;  %v4658_v28 = vrot.slane %v4656_v38, 5 }
 0x40b   : > { %v5085_v48 = vsel %vm7449_vm14, %v5083_v8, %v5084_v44 }
 0x40c   : > { %5516 = vmatmul.bf16.gmra.mxu2 %v5408_v3  ;;  %v5314_v61 = vadd.f32 %v8809_v1, %v4888_v53  ;;  %v4643_v3 = vor.u32 %v4642_v22, %v4639_v52  ;;  %v5134_v45 = vunpack.c.l.b16 %v5085_v48  ;;  %v4659_v42 = vsel %vm7157_vm7, %v4654_v41, %v4658_v28  ;;  %v5261_v1 = vpop.f32.mrf.mxu1  ;;  %v8895_v34 = vpop.f32.mrf.mxu2  ;;  %v6539_v48 = vld [vmem:[#allocation2 + $0xcc] sm:$0xff] }
 0x40d   : > { %v4708_v8 = vunpack.c.l.b16 %v4659_v42 }
 0x40e   : > { %v5350_v53 = vadd.f32 %v8759_v29, %v5314_v61  ;;  %v4644_v55 = vrot.slane %v4643_v3, 4  ;;  %v5150_v10 = vpack.c.b16 %v5134_v45, %v5133_v19  ;;  %v4838_v19 = vpop.f32.mrf.mxu0  ;;  %v2787_v61 = vadd.f32 %v9368_v5, %v8636_v25 }
 0x40f   : > { %v4143_v31 = vpop.f32.mrf.mxu3 }
 0x410   : > { %v4207_v0 = vadd.f32 %v4143_v31, %v3892_v18  ;;  %v4649_v18 = vsel %vm7157_vm7, %v4644_v55, %v4648_v23  ;;  %5298 = vmatmul.bf16.gmra.mxu1 %v5150_v10  ;;  %v5382_v59 = vmax.f32 %v5350_v53, 0.0 }
 0x411   : > { %v4707_v36 = vunpack.c.l.b16 %v4649_v18 }
 0x412   : > { %v4889_v14 = vadd.f32 %v8821_v11, %v4207_v0  ;;  %v9367_v11 = vld [vmem:[#allocation44_spill] sm:$0xff] }
 0x413   : > { %v2786_v39 = vadd.f32 %v9367_v11, %v8630_v27  ;;  %v4724_v41 = vpack.c.b16 %v4708_v8, %v4707_v36  ;;  %v9370_v8 = vld [vmem:[#allocation51_spill] sm:$0xff] }
 0x414   : > { %v5315_v40 = vadd.f32 %v8824_v54, %v4889_v14  ;;  %4185 = vmatmul.bf16.gmra.mxu3 %v6538_v49  ;;  %v5264_v12 = vpop.f32.mrf.mxu1  ;;  %v8908_v0 = vpop.f32.mrf.mxu2  ;;  %v3469_v14 = vadd.f32 %v8467_v4, %v2787_v61  ;;  %v9373_v61 = vld [vmem:[#allocation91_spill] sm:$0xff] }
 0x415   : > { %v3468_v44 = vadd.f32 %v8442_v21, %v2786_v39  ;;  %4872 = vmatmul.bf16.gmra.mxu0 %v4724_v41 }
 0x416   : > { %v5351_v63 = vadd.f32 %v8759_v29, %v5315_v40  ;;  %v4840_v25 = vpop.f32.mrf.mxu0  ;;  %v3895_v3 = vadd.f32 %v8721_v57, %v3469_v14 }
 0x417   : > { %v4146_v54 = vpop.f32.mrf.mxu3  ;;  %v3894_v23 = vadd.f32 %v8713_v26, %v3468_v44  ;;  %v2788_v26 = vadd.f32 %v9369_v43, %v8641_v17  ;;  %v2789_v17 = vadd.f32 %v9370_v8, %v8645_v32 }
 0x418   : > { %v4208_v16 = vadd.f32 %v4146_v54, %v3893_v15  ;;  %v5383_v31 = vmax.f32 %v5351_v63, 0.0 }
 0x419   : > { %v3471_v36 = vadd.f32 %v8499_v50, %v2789_v17 }
 0x41a   : > { %v5409_v38 = vpack.c.bf16 %v5383_v31, %v5382_v59  ;;  %v4890_v27 = vadd.f32 %v8835_v47, %v4208_v16  ;;  %v9371_v59 = vld [vmem:[#allocation55_spill] sm:$0xff] }
 0x41b   : > { %v2790_v32 = vadd.f32 %v9371_v59, %v8650_v56  ;;  %v9372_v31 = vld [vmem:[#allocation19_spill] sm:$0xff] }
 0x41c   : > { %5521 = vmatmul.bf16.gmra.mxu2 %v5409_v38  ;;  %v5316_v22 = vadd.f32 %v8841_v62, %v4890_v27  ;;  %v5266_v42 = vpop.f32.mrf.mxu1  ;;  %v8919_v55 = vpop.f32.mrf.mxu2 }
 0x41d   : > { %v3472_v50 = vadd.f32 %v9373_v61, %v2790_v32 }
 0x41e   : > { %v5352_v49 = vadd.f32 %v8759_v29, %v5316_v22  ;;  %v4843_v39 = vpop.f32.mrf.mxu0  ;;  %v9374_v22 = vld [vmem:[#allocation61_spill] sm:$0xff] }
 0x41f   : > { %v4148_v52 = vpop.f32.mrf.mxu3 }
 0x420   : > { %v4209_v28 = vadd.f32 %v4148_v52, %v3894_v23  ;;  %v5384_v53 = vmax.f32 %v5352_v49, 0.0 }
 0x422   : > { %v4891_v21 = vadd.f32 %v8849_v37, %v4209_v28  ;;  %v9375_v28 = vld [vmem:[#allocation57_spill] sm:$0xff] }
 0x423   : > { %v2791_v56 = vadd.f32 %v9375_v28, %v9374_v22  ;;  %v9384_v28 = vld [vmem:[#allocation42_spill] sm:$0xff] }
 0x424   : > { %v5317_v47 = vadd.f32 %v8854_v24, %v4891_v21  ;;  %4190 = vmatmul.bf16.gmra.mxu3 %v6539_v48  ;;  %v3470_v24 = vadd.f32 %v8483_v7, %v2788_v26  ;;  %v5269_v18 = vpop.f32.mrf.mxu1  ;;  %v8929_v16 = vpop.f32.mrf.mxu2  ;;  %v9376_v48 = vld [vmem:[#allocation18_spill] sm:$0xff]  ;;  %v9377_v26 = vld [vmem:[#allocation92_spill] sm:$0xff] }
 0x425   : > { %v3898_v21 = vadd.f32 %v9376_v48, %v3472_v50 }
 0x426   : > { %v5353_v45 = vadd.f32 %v8759_v29, %v5317_v47  ;;  %v3896_v57 = vadd.f32 %v8726_v13, %v3470_v24  ;;  %v3897_v13 = vadd.f32 %v9372_v31, %v3471_v36  ;;  %v4845_v5 = vpop.f32.mrf.mxu0  ;;  %v9381_v36 = vld [vmem:[#allocation40_spill] sm:$0xff] }
 0x427   : > { %v4151_v62 = vpop.f32.mrf.mxu3 }
 0x428   : > { %v4210_v40 = vadd.f32 %v4151_v62, %v3895_v3  ;;  %v5385_v37 = vmax.f32 %v5353_v45, 0.0  ;;  %v3473_v3 = vadd.f32 %v9377_v26, %v2791_v56  ;;  %v9385_v56 = vld [vmem:[#allocation67_spill] sm:$0xff] }
 0x42a   : > { %v5410_v4 = vpack.c.bf16 %v5385_v37, %v5384_v53  ;;  %v4892_v10 = vadd.f32 %v8871_v9, %v4210_v40  ;;  %v9378_v53 = vld [vmem:[#allocation36_spill] sm:$0xff]  ;;  %v3899_v24 = vadd.f32 %v8769_v2, %v3473_v3 }
 0x42c   : > { %5526 = vmatmul.bf16.gmra.mxu2 %v5410_v4  ;;  %v5318_v15 = vadd.f32 %v8873_v51, %v4892_v10  ;;  %v5271_v23 = vpop.f32.mrf.mxu1 }
 0x42e   : > { %v5354_v9 = vadd.f32 %v8759_v29, %v5318_v15  ;;  %v4848_v45 = vpop.f32.mrf.mxu0  ;;  %v9380_v15 = vld [vmem:[#allocation93_spill] sm:$0xff] }
 0x42f   : > { %v4153_v11 = vpop.f32.mrf.mxu3 }
 0x430   : > { %v4211_v63 = vadd.f32 %v4153_v11, %v3896_v57  ;;  %v5386_v44 = vmax.f32 %v5354_v9, 0.0 }
 0x432   : > { %v4893_v54 = vadd.f32 %v8887_v35, %v4211_v63 }
 0x434   : > { %v5319_v7 = vadd.f32 %v5261_v1, %v4893_v54  ;;  %v8937_v1 = vpop.f32.mrf.mxu2  ;;  %v5274_v4 = vpop.f32.mrf.mxu1  ;;  %v8954_v54 = vld [vmem:[%s9159_s6] ss:$0 sm:$0xff] }
 0x436   : > { %v5355_v41 = vadd.f32 %v8759_v29, %v5319_v7  ;;  %v4850_v2 = vpop.f32.mrf.mxu0  ;;  %v9382_v7 = vld [vmem:[#allocation64_spill] sm:$0xff] }
 0x437   : > { %v4156_v38 = vpop.f32.mrf.mxu3  ;;  %v2793_v9 = vadd.f32 %v9382_v7, %v9381_v36 }
 0x438   : > { %v4212_v51 = vadd.f32 %v4156_v38, %v3897_v13  ;;  %v5387_v27 = vmax.f32 %v5355_v41, 0.0  ;;  %v5577_v13 = vld [vmem:[%s7081_s15] sm:$0xff] }
 0x43a   : > { %v5411_v35 = vpack.c.bf16 %v5387_v27, %v5386_v44  ;;  %v4894_v52 = vadd.f32 %v4838_v19, %v4212_v51  ;;  %v9379_v19 = vld [vmem:[#allocation59_spill] sm:$0xff] }
 0x43b   : > { %v2792_v37 = vadd.f32 %v9379_v19, %v9378_v53  ;;  %v9386_v53 = vld [vmem:[#allocation95_spill] sm:$0xff] }
 0x43c   : > { %5531 = vmatmul.bf16.gmra.mxu2 %v5411_v35  ;;  %v5320_v47 = vadd.f32 %v5264_v12, %v4894_v52  ;;  %v8948_v8 = vpop.f32.mrf.mxu2  ;;  %v5276_v41 = vpop.f32.mrf.mxu1  ;;  %v9383_v35 = vld [vmem:[#allocation94_spill] sm:$0xff] }
 0x43d   : > { %v3475_v61 = vadd.f32 %v9383_v35, %v2793_v9  ;;  %v9389_v9 = vld [vmem:[#allocation96_spill] sm:$0xff] }
 0x43e   : > { %v5356_v40 = vadd.f32 %v8759_v29, %v5320_v47 }
 0x43f   : > { %v4158_v14 = vpop.f32.mrf.mxu3 }
 0x440   : > { %v4213_v49 = vadd.f32 %v4158_v14, %v3898_v21  ;;  %v5578_v14 = vld [vmem:[%s7081_s15 + $0x8] sm:$0xff] }
 0x442   : > { %v4895_v43 = vadd.f32 %v4840_v25, %v4213_v49  ;;  %v5388_v25 = vmax.f32 %v5356_v40, 0.0 }
 0x444   : > { %v5321_v62 = vadd.f32 %v5266_v42, %v4895_v43  ;;  %v3474_v42 = vadd.f32 %v9380_v15, %v2792_v37  ;;  %v5279_v3 = vpop.f32.mrf.mxu1 }
 0x446   : > { %v5357_v10 = vadd.f32 %v8759_v29, %v5321_v62  ;;  %v3900_v59 = vadd.f32 %v8784_v46, %v3474_v42  ;;  %v2794_v46 = vadd.f32 %v9385_v56, %v9384_v28  ;;  %v9392_v56 = vld [vmem:[#allocation25_spill] sm:$0xff] }
 0x447   : > { %v4161_v12 = vpop.f32.mrf.mxu3 }
 0x448   : > { %v4214_v17 = vadd.f32 %v4161_v12, %v3899_v24  ;;  %v5389_v57 = vmax.f32 %v5357_v10, 0.0  ;;  %v3476_v19 = vadd.f32 %v9386_v53, %v2794_v46  ;;  %v9387_v24 = vld [vmem:[#allocation43_spill] sm:$0xff]  ;;  %v9388_v10 = vld [vmem:[#allocation70_spill] sm:$0xff] }
 0x449   : > { %v2795_v12 = vadd.f32 %v9388_v10, %v9387_v24 }
 0x44a   : > { %v5412_v11 = vpack.c.bf16 %v5389_v57, %v5388_v25  ;;  %v4896_v63 = vadd.f32 %v4843_v39, %v4214_v17  ;;  %v3902_v17 = vadd.f32 %v8813_v6, %v3476_v19  ;;  %v9390_v6 = vld [vmem:[#allocation45_spill] sm:$0xff] }
 0x44c   : > { %5536 = vmatmul.bf16.gmra.mxu2 %v5412_v11  ;;  %v5322_v38 = vadd.f32 %v5269_v18, %v4896_v63  ;;  %v3901_v18 = vadd.f32 %v8799_v58, %v3475_v61  ;;  %v5579_v11 = vld [vmem:[%s7081_s15 + $0x10] sm:$0xff] }
 0x44e   : > { %v5358_v22 = vadd.f32 %v8759_v29, %v5322_v38 }
 0x44f   : > { %v4163_v32 = vpop.f32.mrf.mxu3  ;;  %v5497_v31 = vpop.f32.mrf.mxu2 }
 0x450   : > { %v4215_v39 = vadd.f32 %v4163_v32, %v3900_v59  ;;  %v5498_v51 = vadd.f32 %v8954_v54, %v5497_v31  ;;  %v5390_v43 = vmax.f32 %v5358_v22, 0.0  ;;  %v3477_v59 = vadd.f32 %v9389_v9, %v2795_v12  ;;  %v5281_v32 = vpop.f32.mrf.mxu1 }
 0x452   : > { %v4897_v44 = vadd.f32 %v4845_v5, %v4215_v39  ;;  %v5609_v27 = vadd.f32 %v5577_v13, %v5498_v51  ;;  %v9391_v39 = vld [vmem:[#allocation73_spill] sm:$0xff] }
 0x453   : > { %v2796_v51 = vadd.f32 %v9391_v39, %v9390_v6 }
 0x454   : > { %v5323_v50 = vadd.f32 %v5271_v23, %v4897_v44  ;;  %v5641_v52 = vmax.f32 %v5609_v27, 0.0  ;;  %v4853_v23 = vpop.f32.mrf.mxu0 }
 0x455   : > { %v3478_v46 = vadd.f32 %v9392_v56, %v2796_v51 }
 0x456   : > { %5673 = vst [vmem:[%s8967_s9] sm:$0xff] %v5641_v52  ;;  %v5359_v48 = vadd.f32 %v8759_v29, %v5323_v50 }
 0x457   : > { %v4166_v5 = vpop.f32.mrf.mxu3  ;;  %v5499_v21 = vpop.f32.mrf.mxu2 }
 0x458   : > { %v4216_v47 = vadd.f32 %v4166_v5, %v3901_v18  ;;  %v5500_v49 = vadd.f32 %v8954_v54, %v5499_v21  ;;  %v5391_v26 = vmax.f32 %v5359_v48, 0.0  ;;  %v9394_v21 = vld [vmem:[#allocation76_spill] sm:$0xff] }
 0x45a   : > { %v5610_v62 = vadd.f32 %v5578_v14, %v5500_v49  ;;  %v5413_v40 = vpack.c.bf16 %v5391_v26, %v5390_v43  ;;  %v4898_v37 = vadd.f32 %v4848_v45, %v4216_v47  ;;  %v5284_v47 = vpop.f32.mrf.mxu1  ;;  %v3904_v49 = vadd.f32 %v8845_v20, %v3478_v46 }
 0x45c   : > { %v5642_v58 = vmax.f32 %v5610_v62, 0.0  ;;  %5541 = vmatmul.bf16.gmra.mxu2 %v5413_v40  ;;  %v5324_v15 = vadd.f32 %v5274_v4, %v4898_v37  ;;  %v4855_v36 = vpop.f32.mrf.mxu0  ;;  %v3903_v4 = vadd.f32 %v8827_v30, %v3477_v59  ;;  %v9393_v30 = vld [vmem:[#allocation47_spill] sm:$0xff]  ;;  %v5581_v62 = vld [vmem:[%s7081_s15 + $0x20] sm:$0xff] }
 0x45d   : > { %v2797_v14 = vadd.f32 %v9394_v21, %v9393_v30 }
 0x45e   : > { %5674 = vst [vmem:[%s8967_s9 + $0x8] sm:$0xff] %v5642_v58  ;;  %v5360_v38 = vadd.f32 %v8759_v29, %v5324_v15  ;;  %v9395_v58 = vld [vmem:[#allocation50_spill] sm:$0xff] }
 0x45f   : > { %v4168_v25 = vpop.f32.mrf.mxu3  ;;  %v5502_v57 = vpop.f32.mrf.mxu2  ;;  %v3479_v24 = vadd.f32 %v9395_v58, %v2797_v14  ;;  %v9403_v14 = vld [vmem:[#allocation86_spill] sm:$0xff] }
 0x460   : > { %v4217_v42 = vadd.f32 %v4168_v25, %v3902_v17  ;;  %v5503_v63 = vadd.f32 %v8954_v54, %v5502_v57  ;;  %v9396_v57 = vld [vmem:[#allocation49_spill] sm:$0xff] }
 0x461   : > { %v3905_v15 = vadd.f32 %v8857_v33, %v3479_v24  ;;  %v9399_v33 = vld [vmem:[#allocation52_spill] sm:$0xff] }
 0x462   : > { %v4899_v7 = vadd.f32 %v4850_v2, %v4217_v42  ;;  %v5611_v45 = vadd.f32 %v5579_v11, %v5503_v63  ;;  %v5580_v2 = vld [vmem:[%s7081_s15 + $0x18] sm:$0xff] }
 0x463   : > { %v9397_v11 = vld [vmem:[#allocation79_spill] sm:$0xff] }
 0x464   : > { %v5325_v31 = vadd.f32 %v5276_v41, %v4899_v7  ;;  %v5643_v13 = vmax.f32 %v5611_v45, 0.0  ;;  %v5392_v41 = vmax.f32 %v5360_v38, 0.0  ;;  %v4858_v18 = vpop.f32.mrf.mxu0  ;;  %v2798_v20 = vadd.f32 %v9397_v11, %v9396_v57  ;;  %v5286_v7 = vpop.f32.mrf.mxu1  ;;  %v9398_v38 = vld [vmem:[#allocation27_spill] sm:$0xff]  ;;  %v9405_v11 = vld [vmem:[#allocation85_spill] sm:$0xff] }
 0x466   : > { %5675 = vst [vmem:[%s8967_s9 + $0x10] sm:$0xff] %v5643_v13  ;;  %v5361_v44 = vadd.f32 %v8759_v29, %v5325_v31  ;;  %v3480_v6 = vadd.f32 %v9398_v38, %v2798_v20  ;;  %v9406_v20 = vld [vmem:[#allocation87_spill] sm:$0xff] }
 0x467   : > { %v4171_v27 = vpop.f32.mrf.mxu3  ;;  %v5504_v35 = vpop.f32.mrf.mxu2 }
 0x468   : > { %v4218_v61 = vadd.f32 %v4171_v27, %v3903_v4  ;;  %v5505_v50 = vadd.f32 %v8954_v54, %v5504_v35  ;;  %v5393_v52 = vmax.f32 %v5361_v44, 0.0  ;;  %v9400_v4 = vld [vmem:[#allocation83_spill] sm:$0xff]  ;;  %v3906_v27 = vadd.f32 %v8876_v60, %v3480_v6  ;;  %v9402_v60 = vld [vmem:[#allocation81_spill] sm:$0xff] }
 0x469   : > { %v2799_v44 = vadd.f32 %v9400_v4, %v9399_v33  ;;  %v9408_v33 = vld [vmem:[#allocation97_spill] sm:$0xff] }
 0x46a   : > { %v5612_v22 = vadd.f32 %v5580_v2, %v5505_v50  ;;  %v5414_v28 = vpack.c.bf16 %v5393_v52, %v5392_v41  ;;  %v4900_v48 = vadd.f32 %v4853_v23, %v4218_v61  ;;  %v5583_v61 = vld [vmem:[%s7081_s15 + $0x30] sm:$0xff] }
 0x46c   : > { %v5644_v5 = vmax.f32 %v5612_v22, 0.0  ;;  %5546 = vmatmul.bf16.gmra.mxu2 %v5414_v28  ;;  %v5326_v40 = vadd.f32 %v5279_v3, %v4900_v48  ;;  %v4860_v25 = vpop.f32.mrf.mxu0  ;;  %v5289_v28 = vpop.f32.mrf.mxu1 }
 0x46e   : > { %5676 = vst [vmem:[%s8967_s9 + $0x18] sm:$0xff] %v5644_v5  ;;  %v5362_v17 = vadd.f32 %v8759_v29, %v5326_v40  ;;  %v5584_v40 = vld [vmem:[%s7081_s15 + $0x38] sm:$0xff] }
 0x46f   : > { %v4173_v43 = vpop.f32.mrf.mxu3  ;;  %v5507_v26 = vpop.f32.mrf.mxu2 }
 0x470   : > { %v4219_v53 = vadd.f32 %v4173_v43, %v3904_v49  ;;  %v5508_v19 = vadd.f32 %v8954_v54, %v5507_v26  ;;  %v5394_v59 = vmax.f32 %v5362_v17, 0.0  ;;  %v2800_v49 = vadd.f32 %v9403_v14, %v9402_v60  ;;  %v9412_v60 = vld [vmem:[#allocation89_spill] sm:$0xff] }
 0x472   : > { %v4901_v37 = vadd.f32 %v4855_v36, %v4219_v53  ;;  %v5613_v23 = vadd.f32 %v5581_v62, %v5508_v19  ;;  %v5582_v36 = vld [vmem:[%s7081_s15 + $0x28] sm:$0xff] }
 0x474   : > { %v5327_v10 = vadd.f32 %v5281_v32, %v4901_v37  ;;  %v5645_v12 = vmax.f32 %v5613_v23, 0.0  ;;  %v4863_v50 = vpop.f32.mrf.mxu0 }
 0x476   : > { %5677 = vst [vmem:[%s8967_s9 + $0x20] sm:$0xff] %v5645_v12  ;;  %v5363_v3 = vadd.f32 %v8759_v29, %v5327_v10  ;;  %v9404_v12 = vld [vmem:[#allocation54_spill] sm:$0xff] }
 0x477   : > { %v4176_v42 = vpop.f32.mrf.mxu3  ;;  %v5509_v63 = vpop.f32.mrf.mxu2  ;;  %v3482_v17 = vadd.f32 %v9404_v12, %v2800_v49 }
 0x478   : > { %v4220_v45 = vadd.f32 %v4176_v42, %v3905_v15  ;;  %v5510_v9 = vadd.f32 %v8954_v54, %v5509_v63  ;;  %v5395_v32 = vmax.f32 %v5363_v3, 0.0  ;;  %v2801_v15 = vadd.f32 %v9406_v20, %v9405_v11 }
 0x479   : > { %v3908_v3 = vadd.f32 %v8908_v0, %v3482_v17  ;;  %v9409_v0 = vld [vmem:[#allocation88_spill] sm:$0xff] }
 0x47a   : > { %v5614_v31 = vadd.f32 %v5582_v36, %v5510_v9  ;;  %v5415_v13 = vpack.c.bf16 %v5395_v32, %v5394_v59  ;;  %v4902_v39 = vadd.f32 %v4858_v18, %v4220_v45  ;;  %v9401_v18 = vld [vmem:[#allocation29_spill] sm:$0xff]  ;;  %v5585_v36 = vld [vmem:[%s7081_s15 + $0x40] sm:$0xff]  ;;  %v2802_v4 = vadd.f32 %v9409_v0, %v9408_v33 }
 0x47b   : > { %v3481_v48 = vadd.f32 %v9401_v18, %v2799_v44  ;;  %v9410_v18 = vld [vmem:[#allocation32_spill] sm:$0xff] }
 0x47c   : > { %v5646_v51 = vmax.f32 %v5614_v31, 0.0  ;;  %5551 = vmatmul.bf16.gmra.mxu2 %v5415_v13  ;;  %v5328_v41 = vadd.f32 %v5284_v47, %v4902_v39  ;;  %v4865_v58 = vpop.f32.mrf.mxu0  ;;  %v9407_v31 = vld [vmem:[#allocation31_spill] sm:$0xff]  ;;  %v5589_v33 = vld [vmem:[%s7081_s15 + $0x60] sm:$0xff] }
 0x47d   : > { %v3907_v43 = vadd.f32 %v8895_v34, %v3481_v48  ;;  %v3483_v13 = vadd.f32 %v9407_v31, %v2801_v15  ;;  %v3484_v48 = vadd.f32 %v9410_v18, %v2802_v4  ;;  %v9416_v31 = vld [vmem:[#allocation38_spill] sm:$0xff] }
 0x47e   : > { %5678 = vst [vmem:[%s8967_s9 + $0x28] sm:$0xff] %v5646_v51  ;;  %v5364_v21 = vadd.f32 %v8759_v29, %v5328_v41 }
 0x47f   : > { %v4178_v35 = vpop.f32.mrf.mxu3  ;;  %v5512_v2 = vpop.f32.mrf.mxu2  ;;  %v3910_v49 = vadd.f32 %v8929_v16, %v3484_v48 }
 0x480   : > { %v4221_v52 = vadd.f32 %v4178_v35, %v3906_v27  ;;  %v5513_v22 = vadd.f32 %v8954_v54, %v5512_v2  ;;  %v5396_v37 = vmax.f32 %v5364_v21, 0.0  ;;  %v3909_v27 = vadd.f32 %v8919_v55, %v3483_v13  ;;  %v9411_v21 = vld [vmem:[#allocation98_spill] sm:$0xff] }
 0x481   : > { %v2803_v14 = vadd.f32 %v9412_v60, %v9411_v21  ;;  %v5591_v21 = vld [vmem:[%s7081_s15 + $0x70] sm:$0xff] }
 0x482   : > { %v4903_v56 = vadd.f32 %v4860_v25, %v4221_v52  ;;  %v5615_v46 = vadd.f32 %v5583_v61, %v5513_v22  ;;  %v5291_v25 = vpop.f32.mrf.mxu1 }
 0x484   : > { %v5329_v5 = vadd.f32 %v5286_v7, %v4903_v56  ;;  %v5647_v30 = vmax.f32 %v5615_v46, 0.0  ;;  %v4868_v38 = vpop.f32.mrf.mxu0 }
 0x486   : > { %5679 = vst [vmem:[%s8967_s9 + $0x30] sm:$0xff] %v5647_v30  ;;  %v5365_v47 = vadd.f32 %v8759_v29, %v5329_v5 }
 0x487   : > { %v4181_v26 = vpop.f32.mrf.mxu3  ;;  %v5514_v62 = vpop.f32.mrf.mxu2 }
 0x488   : > { %v4222_v53 = vadd.f32 %v4181_v26, %v3907_v43  ;;  %v5515_v19 = vadd.f32 %v8954_v54, %v5514_v62  ;;  %v5397_v23 = vmax.f32 %v5365_v47, 0.0  ;;  %v5587_v26 = vld [vmem:[%s7081_s15 + $0x50] sm:$0xff] }
 0x48a   : > { %v5616_v24 = vadd.f32 %v5584_v40, %v5515_v19  ;;  %v5416_v10 = vpack.c.bf16 %v5397_v23, %v5396_v37  ;;  %v4904_v57 = vadd.f32 %v4863_v50, %v4222_v53  ;;  %v5294_v44 = vpop.f32.mrf.mxu1  ;;  %v5586_v50 = vld [vmem:[%s7081_s15 + $0x48] sm:$0xff] }
 0x48c   : > { %v5648_v34 = vmax.f32 %v5616_v24, 0.0  ;;  %5556 = vmatmul.bf16.gmra.mxu2 %v5416_v10  ;;  %v5330_v7 = vadd.f32 %v5289_v28, %v4904_v57  ;;  %v4870_v55 = vpop.f32.mrf.mxu0  ;;  %v9415_v57 = vld [vmem:[#allocation90_spill] sm:$0xff] }
 0x48e   : > { %5680 = vst [vmem:[%s8967_s9 + $0x38] sm:$0xff] %v5648_v34  ;;  %v5366_v51 = vadd.f32 %v8759_v29, %v5330_v7 }
 0x48f   : > { %v4183_v42 = vpop.f32.mrf.mxu3  ;;  %v5517_v63 = vpop.f32.mrf.mxu2 }
 0x490   : > { %v4223_v45 = vadd.f32 %v4183_v42, %v3908_v3  ;;  %v5518_v9 = vadd.f32 %v8954_v54, %v5517_v63  ;;  %v5398_v22 = vmax.f32 %v5366_v51, 0.0  ;;  %v5588_v42 = vld [vmem:[%s7081_s15 + $0x58] sm:$0xff] }
 0x492   : > { %v4905_v59 = vadd.f32 %v4865_v58, %v4223_v45  ;;  %v5617_v32 = vadd.f32 %v5585_v36, %v5518_v9  ;;  %v5296_v19 = vpop.f32.mrf.mxu1  ;;  %v9413_v58 = vld [vmem:[#allocation34_spill] sm:$0xff] }
 0x493   : > { %v3485_v24 = vadd.f32 %v9413_v58, %v2803_v14 }
 0x494   : > { %v5331_v6 = vadd.f32 %v5291_v25, %v4905_v59  ;;  %v5649_v39 = vmax.f32 %v5617_v32, 0.0  ;;  %v9414_v25 = vld [vmem:[#allocation20_spill] sm:$0xff]  ;;  %v4873_v34 = vpop.f32.mrf.mxu0 }
 0x495   : > { %v2804_v16 = vadd.f32 %v9415_v57, %v9414_v25  ;;  %v3911_v11 = vadd.f32 %v8937_v1, %v3485_v24  ;;  %v5594_v24 = vld [vmem:[%s7081_s15 + $0x88] sm:$0xff]  ;;  %v5595_v57 = vld [vmem:[%s7081_s15 + $0x90] sm:$0xff] }
 0x496   : > { %5681 = vst [vmem:[%s8967_s9 + $0x40] sm:$0xff] %v5649_v39  ;;  %v5367_v35 = vadd.f32 %v8759_v29, %v5331_v6 }
 0x497   : > { %v4186_v2 = vpop.f32.mrf.mxu3  ;;  %v5519_v61 = vpop.f32.mrf.mxu2  ;;  %v3486_v13 = vadd.f32 %v9416_v31, %v2804_v16  ;;  %v5598_v31 = vld [vmem:[%s7081_s15 + $0xa8] sm:$0xff] }
 0x498   : > { %v4224_v41 = vadd.f32 %v4186_v2, %v3909_v27  ;;  %v5520_v52 = vadd.f32 %v8954_v54, %v5519_v61  ;;  %v5399_v28 = vmax.f32 %v5367_v35, 0.0 }
 0x499   : > { %v3912_v1 = vadd.f32 %v8948_v8, %v3486_v13 }
 0x49a   : > { %v5618_v56 = vadd.f32 %v5586_v50, %v5520_v52  ;;  %v5417_v46 = vpack.c.bf16 %v5399_v28, %v5398_v22  ;;  %v4906_v5 = vadd.f32 %v4868_v38, %v4224_v41  ;;  %v5299_v9 = vpop.f32.mrf.mxu1  ;;  %v5590_v28 = vld [vmem:[%s7081_s15 + $0x68] sm:$0xff] }
 0x49c   : > { %v5650_v30 = vmax.f32 %v5618_v56, 0.0  ;;  %5561 = vmatmul.bf16.gmra.mxu2 %v5417_v46  ;;  %v5332_v62 = vadd.f32 %v5294_v44, %v4906_v5  ;;  %v4875_v27 = vpop.f32.mrf.mxu0 }
 0x49e   : > { %5682 = vst [vmem:[%s8967_s9 + $0x48] sm:$0xff] %v5650_v30  ;;  %v5368_v17 = vadd.f32 %v8759_v29, %v5332_v62 }
 0x49f   : > { %v4188_v43 = vpop.f32.mrf.mxu3  ;;  %v5522_v47 = vpop.f32.mrf.mxu2 }
 0x4a0   : > { %v4225_v40 = vadd.f32 %v4188_v43, %v3910_v49  ;;  %v5523_v53 = vadd.f32 %v8954_v54, %v5522_v47  ;;  %v5400_v7 = vmax.f32 %v5368_v17, 0.0  ;;  %v5592_v43 = vld [vmem:[%s7081_s15 + $0x78] sm:$0xff] }
 0x4a2   : > { %v4907_v37 = vadd.f32 %v4870_v55, %v4225_v40  ;;  %v5619_v23 = vadd.f32 %v5587_v26, %v5523_v53  ;;  %v5301_v61 = vpop.f32.mrf.mxu1  ;;  %v5593_v53 = vld [vmem:[%s7081_s15 + $0x80] sm:$0xff] }
 0x4a4   : > { %v5333_v10 = vadd.f32 %v5296_v19, %v4907_v37  ;;  %v5651_v12 = vmax.f32 %v5619_v23, 0.0 }
 0x4a6   : > { %5683 = vst [vmem:[%s8967_s9 + $0x50] sm:$0xff] %v5651_v12  ;;  %v5369_v20 = vadd.f32 %v8759_v29, %v5333_v10 }
 0x4a7   : > { %v4191_v15 = vpop.f32.mrf.mxu3  ;;  %v5524_v3 = vpop.f32.mrf.mxu2 }
 0x4a8   : > { %v4226_v63 = vadd.f32 %v4191_v15, %v3911_v11  ;;  %v5525_v36 = vadd.f32 %v8954_v54, %v5524_v3  ;;  %v5401_v45 = vmax.f32 %v5369_v20, 0.0  ;;  %v5596_v15 = vld [vmem:[%s7081_s15 + $0x98] sm:$0xff] }
 0x4aa   : > { %v5620_v59 = vadd.f32 %v5588_v42, %v5525_v36  ;;  %v5418_v32 = vpack.c.bf16 %v5401_v45, %v5400_v7  ;;  %v4908_v38 = vadd.f32 %v4873_v34, %v4226_v63  ;;  %v5597_v7 = vld [vmem:[%s7081_s15 + $0xa0] sm:$0xff] }
 0x4ac   : > { %v5652_v6 = vmax.f32 %v5620_v59, 0.0  ;;  %5566 = vmatmul.bf16.gmra.mxu2 %v5418_v32  ;;  %v5334_v0 = vadd.f32 %v5299_v9, %v4908_v38 }
 0x4ae   : > { %5684 = vst [vmem:[%s8967_s9 + $0x58] sm:$0xff] %v5652_v6  ;;  %v5370_v52 = vadd.f32 %v8759_v29, %v5334_v0 }
 0x4af   : > { %v4193_v39 = vpop.f32.mrf.mxu3  ;;  %v5527_v51 = vpop.f32.mrf.mxu2 }
 0x4b0   : > { %v4227_v4 = vadd.f32 %v4193_v39, %v3912_v1  ;;  %v5528_v44 = vadd.f32 %v8954_v54, %v5527_v51  ;;  %v5402_v46 = vmax.f32 %v5370_v52, 0.0  ;;  %v5599_v39 = vld [vmem:[%s7081_s15 + $0xb0] sm:$0xff] }
 0x4b2   : > { %v4909_v35 = vadd.f32 %v4875_v27, %v4227_v4  ;;  %v5621_v2 = vadd.f32 %v5589_v33, %v5528_v44  ;;  %v5600_v44 = vld [vmem:[%s7081_s15 + $0xb8] sm:$0xff] }
 0x4b4   : > { %v5335_v50 = vadd.f32 %v5301_v61, %v4909_v35  ;;  %v5653_v41 = vmax.f32 %v5621_v2, 0.0 }
 0x4b6   : > { %5685 = vst [vmem:[%s8967_s9 + $0x60] sm:$0xff] %v5653_v41  ;;  %v5371_v8 = vadd.f32 %v8759_v29, %v5335_v50  ;;  %v5601_v50 = vld [vmem:[%s7081_s15 + $0xc0] sm:$0xff] }
 0x4b7   : > { %v5529_v22 = vpop.f32.mrf.mxu2 }
 0x4b8   : > { %v5530_v56 = vadd.f32 %v8954_v54, %v5529_v22  ;;  %v5403_v18 = vmax.f32 %v5371_v8, 0.0 }
 0x4ba   : > { %v5622_v48 = vadd.f32 %v5590_v28, %v5530_v56  ;;  %v5419_v5 = vpack.c.bf16 %v5403_v18, %v5402_v46  ;;  %v5602_v28 = vld [vmem:[%s7081_s15 + $0xc8] sm:$0xff] }
 0x4bc   : > { %v5654_v30 = vmax.f32 %v5622_v48, 0.0  ;;  %5571 = vmatmul.bf16.gmra.mxu2 %v5419_v5  ;;  %v5603_v5 = vld [vmem:[%s7081_s15 + $0xd0] sm:$0xff] }
 0x4be   : > { %5686 = vst [vmem:[%s8967_s9 + $0x68] sm:$0xff] %v5654_v30 }
 0x4bf   : > { %v5532_v55 = vpop.f32.mrf.mxu2 }
 0x4c0   : > { %v5533_v29 = vadd.f32 %v8954_v54, %v5532_v55 }
 0x4c2   : > { %v5623_v60 = vadd.f32 %v5591_v21, %v5533_v29 }
 0x4c4   : > { %v5655_v14 = vmax.f32 %v5623_v60, 0.0  ;;  %v5604_v60 = vld [vmem:[%s7081_s15 + $0xd8] sm:$0xff] }
 0x4c6   : > { %5687 = vst [vmem:[%s8967_s9 + $0x70] sm:$0xff] %v5655_v14 }
 0x4c7   : > { %v5534_v49 = vpop.f32.mrf.mxu2 }
 0x4c8   : > { %v5535_v47 = vadd.f32 %v8954_v54, %v5534_v49 }
 0x4ca   : > { %v5624_v26 = vadd.f32 %v5592_v43, %v5535_v47 }
 0x4cc   : > { %v5656_v62 = vmax.f32 %v5624_v26, 0.0  ;;  %v5605_v26 = vld [vmem:[%s7081_s15 + $0xe0] sm:$0xff] }
 0x4ce   : > { %5688 = vst [vmem:[%s8967_s9 + $0x78] sm:$0xff] %v5656_v62 }
 0x4cf   : > { %v5537_v40 = vpop.f32.mrf.mxu2 }
 0x4d0   : > { %v5538_v19 = vadd.f32 %v8954_v54, %v5537_v40 }
 0x4d2   : > { %v5625_v37 = vadd.f32 %v5593_v53, %v5538_v19 }
 0x4d4   : > { %v5657_v23 = vmax.f32 %v5625_v37, 0.0  ;;  %v5606_v37 = vld [vmem:[%s7081_s15 + $0xe8] sm:$0xff] }
 0x4d6   : > { %5689 = vst [vmem:[%s8967_s9 + $0x80] sm:$0xff] %v5657_v23 }
 0x4d7   : > { %v5539_v58 = vpop.f32.mrf.mxu2 }
 0x4d8   : > { %v5540_v10 = vadd.f32 %v8954_v54, %v5539_v58 }
 0x4da   : > { %v5626_v12 = vadd.f32 %v5594_v24, %v5540_v10 }
 0x4dc   : > { %v5658_v17 = vmax.f32 %v5626_v12, 0.0  ;;  %v5607_v12 = vld [vmem:[%s7081_s15 + $0xf0] sm:$0xff] }
 0x4de   : > { %5690 = vst [vmem:[%s8967_s9 + $0x88] sm:$0xff] %v5658_v17 }
 0x4df   : > { %v5542_v25 = vpop.f32.mrf.mxu2 }
 0x4e0   : > { %v5543_v16 = vadd.f32 %v8954_v54, %v5542_v25 }
 0x4e2   : > { %v5627_v34 = vadd.f32 %v5595_v57, %v5543_v16 }
 0x4e4   : > { %v5659_v11 = vmax.f32 %v5627_v34, 0.0  ;;  %v5608_v34 = vld [vmem:[%s7081_s15 + $0xf8] sm:$0xff]  ;;  %s6858_s15 = scalar_lea.hbm %s9160_s7, 512 }
 0x4e5   : > { %p6860_p9 = scmp.lt.s32.totalorder %s6858_s15, %s6854_s14 }
 0x4e6   : > { %5691 = vst [vmem:[%s8967_s9 + $0x90] sm:$0xff] %v5659_v11 }
 0x4e7   : > { %v5544_v20 = vpop.f32.mrf.mxu2  ;;  %p6861_p2 = por %p6860_p9, %p6859_p11 }
 0x4e8   : > { %v5545_v3 = vadd.f32 %v8954_v54, %v5544_v20 }
 0x4e9   : > { %p6862_p10 = pnand %p6861_p2, %p6857_p8 }
 0x4ea   : > { %v5628_v42 = vadd.f32 %v5596_v15, %v5545_v3 }
 0x4ec   : > { %v5660_v63 = vmax.f32 %v5628_v42, 0.0 }
 0x4ee   : > { %5692 = vst [vmem:[%s8967_s9 + $0x98] sm:$0xff] %v5660_v63 }
 0x4ef   : > { %v5547_v36 = vpop.f32.mrf.mxu2 }
 0x4f0   : > { %v5548_v45 = vadd.f32 %v8954_v54, %v5547_v36 }
 0x4f2   : > { %v5629_v9 = vadd.f32 %v5597_v7, %v5548_v45 }
 0x4f4   : > { %v5661_v59 = vmax.f32 %v5629_v9, 0.0 }
 0x4f6   : > { %5693 = vst [vmem:[%s8967_s9 + $0xa0] sm:$0xff] %v5661_v59 }
 0x4f7   : > { %v5549_v32 = vpop.f32.mrf.mxu2 }
 0x4f8   : > { %v5550_v13 = vadd.f32 %v8954_v54, %v5549_v32 }
 0x4fa   : > { %v5630_v38 = vadd.f32 %v5598_v31, %v5550_v13 }
 0x4fc   : > { %v5662_v6 = vmax.f32 %v5630_v38, 0.0 }
 0x4fe   : > { %5694 = vst [vmem:[%s8967_s9 + $0xa8] sm:$0xff] %v5662_v6 }
 0x4ff   : > { %v5552_v1 = vpop.f32.mrf.mxu2 }
 0x500   : > { %v5553_v51 = vadd.f32 %v8954_v54, %v5552_v1 }
 0x502   : > { %v5631_v33 = vadd.f32 %v5599_v39, %v5553_v51 }
 0x504   : > { %v5663_v0 = vmax.f32 %v5631_v33, 0.0 }
 0x506   : > { %5695 = vst [vmem:[%s8967_s9 + $0xb0] sm:$0xff] %v5663_v0 }
 0x507   : > { %v5554_v4 = vpop.f32.mrf.mxu2 }
 0x508   : > { %v5555_v27 = vadd.f32 %v8954_v54, %v5554_v4 }
 0x50a   : > { %v5632_v35 = vadd.f32 %v5600_v44, %v5555_v27 }
 0x50c   : > { %v5664_v2 = vmax.f32 %v5632_v35, 0.0 }
 0x50e   : > { %5696 = vst [vmem:[%s8967_s9 + $0xb8] sm:$0xff] %v5664_v2 }
 0x50f   : > { %v5557_v61 = vpop.f32.mrf.mxu2 }
 0x510   : > { %v5558_v41 = vadd.f32 %v8954_v54, %v5557_v61 }
 0x512   : > { %v5633_v52 = vadd.f32 %v5601_v50, %v5558_v41 }
 0x514   : > { %v5665_v8 = vmax.f32 %v5633_v52, 0.0 }
 0x516   : > { %5697 = vst [vmem:[%s8967_s9 + $0xc0] sm:$0xff] %v5665_v8 }
 0x517   : > { %v5559_v22 = vpop.f32.mrf.mxu2 }
 0x518   : > { %v5560_v56 = vadd.f32 %v8954_v54, %v5559_v22 }
 0x51a   : > { %v5634_v46 = vadd.f32 %v5602_v28, %v5560_v56 }
 0x51c   : > { %v5666_v18 = vmax.f32 %v5634_v46, 0.0 }
 0x51e   : > { %5698 = vst [vmem:[%s8967_s9 + $0xc8] sm:$0xff] %v5666_v18 }
 0x51f   : > { %v5562_v48 = vpop.f32.mrf.mxu2 }
 0x520   : > { %v5563_v30 = vadd.f32 %v8954_v54, %v5562_v48 }
 0x522   : > { %v5635_v55 = vadd.f32 %v5603_v5, %v5563_v30 }
 0x524   : > { %v5667_v21 = vmax.f32 %v5635_v55, 0.0 }
 0x526   : > { %5699 = vst [vmem:[%s8967_s9 + $0xd0] sm:$0xff] %v5667_v21 }
 0x527   : > { %v5564_v29 = vpop.f32.mrf.mxu2 }
 0x528   : > { %v5565_v14 = vadd.f32 %v8954_v54, %v5564_v29 }
 0x52a   : > { %v5636_v49 = vadd.f32 %v5604_v60, %v5565_v14 }
 0x52c   : > { %v5668_v43 = vmax.f32 %v5636_v49, 0.0 }
 0x52e   : > { %5700 = vst [vmem:[%s8967_s9 + $0xd8] sm:$0xff] %v5668_v43 }
 0x52f   : > { %v5567_v47 = vpop.f32.mrf.mxu2 }
 0x530   : > { %v5568_v62 = vadd.f32 %v8954_v54, %v5567_v47 }
 0x532   : > { %v5637_v40 = vadd.f32 %v5605_v26, %v5568_v62 }
 0x534   : > { %v5669_v53 = vmax.f32 %v5637_v40, 0.0 }
 0x536   : > { %5701 = vst [vmem:[%s8967_s9 + $0xe0] sm:$0xff] %v5669_v53 }
 0x537   : > { %v5569_v19 = vpop.f32.mrf.mxu2 }
 0x538   : > { %v5570_v23 = vadd.f32 %v8954_v54, %v5569_v19 }
 0x53a   : > { %v5638_v58 = vadd.f32 %v5606_v37, %v5570_v23 }
 0x53c   : > { %v5670_v24 = vmax.f32 %v5638_v58, 0.0 }
 0x53e   : > { %5702 = vst [vmem:[%s8967_s9 + $0xe8] sm:$0xff] %v5670_v24 }
 0x53f   : > { %v5572_v10 = vpop.f32.mrf.mxu2 }
 0x540   : > { %v5573_v17 = vadd.f32 %v8954_v54, %v5572_v10 }
 0x542   : > { %v5639_v25 = vadd.f32 %v5607_v12, %v5573_v17 }
 0x544   : > { %v5671_v57 = vmax.f32 %v5639_v25, 0.0 }
 0x546   : > { %5703 = vst [vmem:[%s8967_s9 + $0xf0] sm:$0xff] %v5671_v57 }
 0x547   : > { %v5574_v16 = vpop.f32.mrf.mxu2 }
 0x548   : > { %v5575_v11 = vadd.f32 %v8954_v54, %v5574_v16 }
 0x54a   : > { %v5640_v20 = vadd.f32 %v5608_v34, %v5575_v11 }
 0x54c   : > { %v5672_v15 = vmax.f32 %v5640_v20, 0.0 }
 0x54e   : > { %5704 = vst [vmem:[%s8967_s9 + $0xf8] sm:$0xff] %v5672_v15 }
 0x54f   : > { %6865 = shalt.err (!%p6862_p10)
}
 0x550   : > { %s6922_s22 = smov 128   ;;  %s6923_s9 = smov 8  }
 0x551   : > { %6611 = dma.vmem_to_hbm [thread:$0]  (%p7047_p7), %s5719_s29, 4096, %s5721_s10, %s5706_s13, %s6922_s22, %s6922_s22, %s6923_s9  }
 0x552 PF: > { %s5735_s16 = sand.u32 1, %s6900_s24   ;;  %p9417_p12 = scmp.ge.s32.totalorder %s6912_s27, 2 }
 0x553   : > { %s5736_s1 = scalar_lea.sflag [#allocation5], %s5735_s16 }
 0x554   : > { %p6628_p13 = pnand %p9417_p12, %p6999_p6 }
 0x556   : > { %p6629_p0 = pneg %p6628_p13 }
 0x558   : > { %6895 = dma.done.wait (%p6629_p0), %s5736_s1, 4096  }
 0x559   : > { %6897 = vsyncadd (%p6629_p0), %s5736_s1, 4294963200  ;;  %p22_p3 = scmp.ge.s32.totalorder %s7031_s11, 4   ;;  %s9418_s24 = smov %s6904_s25 }
 0x55a   : > { %s9419_s25 = smov %s6908_s26  ;;  %s9420_s26 = smov %s7043_s17 }
 0x55b   : > { %s9421_s27 = smov %s7031_s11  ;;  %24 = sbr.rel (!%p22_p3) target bundleno = 9 (0x9), region = 116 }
 0x560   :  { %5742 = vsyncpa [#allocation4], 1 }
 0x561   :  { %5744 = vsyncpa [#allocation4 + $0x1], 1 }
 0x562   :  { %5745 = vsyncpa [#allocation7], 1 }
 0x563   :  { %5746 = vsyncpa [#allocation10], 1 }
 0x564   :  { %5747 = vsyncpa [#allocation5], 1 }
 0x565   :  { %5749 = vsyncpa [#allocation5 + $0x1], 1 }

</bundles_post_ra>
